<compile_context>
chip_gen: v5e
topology: v5e:2x2
jax: 0.10.0
libtpu: 0.0.40
codegen_flags: <defaults>
</compile_context>

<pallas_src>
import math
import functools

import jax
import jax.numpy as jnp
from jax.experimental import pallas as pl
from jax.experimental.pallas import tpu as pltpu  # noqa: F401  (TPU backend)

EPS = 1e-5  # PyTorch LayerNorm default eps


# ---------------------------------------------------------------------------
# Fused forward kernel
# ---------------------------------------------------------------------------
def _layer_norm(x, g, b):
    mu = jnp.mean(x, axis=-1, keepdims=True)
    var = jnp.mean((x - mu) ** 2, axis=-1, keepdims=True)
    return (x - mu) * jax.lax.rsqrt(var + EPS) * g + b


def _fused_forward_kernel(n_layers, d_model, d_hid,
                          x_ref, w_in_ref, pe_b_ref,
                          rep_ref, rep_t_ref, maskS_ref, biasS_ref, pmat_ref,
                          wA_ref, w2_ref, bvec_ref, fcw_ref, fcb_ref,
                          o_ref):
    D = d_model

    # ---- embed: linear_in + (bias + positional encoding) precombined ----
    y = jnp.dot(x_ref[...], w_in_ref[...],
                preferred_element_type=jnp.float32) + pe_b_ref[...]   # (N, D)

    rep = rep_ref[...]        # (H*N, N)   head replication matrix
    rep_t = rep_t_ref[...]    # (N, H*N)   its transpose (head recombination)
    maskS = maskS_ref[...]    # (H*N, D)   per-head lane masks, stacked
    biasS = biasS_ref[...]    # (H*N, N)   block-diagonal cross-batch bias, stacked
    bias_all = bvec_ref[...]  # (L, 8, 128) per-layer bias slab

    # ---- n_layers post-norm TransformerEncoderLayers (static unroll) ----
    for l in range(n_layers):
        wA = wA_ref[l]                         # (D, 3D + D + d_hid)
        wqkv = wA[:, :3 * D]                   # fused q|k|v projection (scale folded into q)
        wo = wA[:, 3 * D:4 * D]
        w1 = wA[:, 4 * D:4 * D + d_hid]
        w2 = w2_ref[l]                         # (d_hid, D)

        bt = bias_all[l]                       # (8, 128)
        bqkv = bt[0:1, :3 * D]
        bo = bt[1:2, :D]
        g1 = bt[2:3, :D]
        be1 = bt[3:4, :D]
        b1 = bt[4:5, :d_hid]
        b2 = bt[5:6, :D]
        g2 = bt[6:7, :D]
        be2 = bt[7:8, :D]

        # fused QKV projection
        qkv = jnp.dot(y, wqkv, preferred_element_type=jnp.float32) + bqkv   # (N, 3D)
        q = qkv[:, :D]
        k = qkv[:, D:2 * D]
        v = qkv[:, 2 * D:3 * D]

        # all heads at once: stack heads on the sublane axis
        q_st = jnp.dot(rep, q, preferred_element_type=jnp.float32) * maskS  # (H*N, D)
        s = jnp.dot(q_st, k.T, preferred_element_type=jnp.float32) + biasS  # (H*N, N)
        s = s - jnp.max(s, axis=-1, keepdims=True)
        p = jnp.exp(s)
        p = p / jnp.sum(p, axis=-1, keepdims=True)
        o_st = jnp.dot(p, v, preferred_element_type=jnp.float32) * maskS    # (H*N, D)
        attn = jnp.dot(rep_t, o_st, preferred_element_type=jnp.float32)     # (N, D)
        attn = jnp.dot(attn, wo, preferred_element_type=jnp.float32) + bo

        # residual + LayerNorm1, ReLU-FFN, residual + LayerNorm2
        h1 = _layer_norm(y + attn, g1, be1)
        ff = jnp.maximum(jnp.dot(h1, w1, preferred_element_type=jnp.float32) + b1, 0.0)
        ff = jnp.dot(ff, w2, preferred_element_type=jnp.float32) + b2
        y = _layer_norm(h1 + ff, g2, be2)

    # ---- head: AvgPool2d((5,1)) as block-diagonal matmul + fc1/fc2/fc3 ----
    pooled = jnp.dot(pmat_ref[...], y, preferred_element_type=jnp.float32)  # (B*P, D)
    fcw = fcw_ref[...]   # (3, D, 16) padded blob: fc1 / fc2 / fc3 weights
    fcb = fcb_ref[...]   # (3, 1, 16) padded blob: fc1 / fc2 / fc3 biases
    h = jnp.maximum(jnp.dot(pooled, fcw[0],
                            preferred_element_type=jnp.float32) + fcb[0], 0.0)
    h = jnp.maximum(jnp.dot(h, fcw[1, :16, :8],
                            preferred_element_type=jnp.float32) + fcb[1, :, :8], 0.0)
    o_ref[...] = jnp.dot(h, fcw[2, :8, :1],
                         preferred_element_type=jnp.float32) + fcb[2, :, :1]


# ---------------------------------------------------------------------------
# Wrapper: constants / weight packing (done once) + jitted fused call
# ---------------------------------------------------------------------------
def build_constants(B, S, D, n_head, pool, pe, b_in):
    """Precompute every data-independent matrix used by the kernel."""
    N = B * S
    hd = D // n_head

    lane = jnp.arange(D)
    head_masks = ((lane[None, :] // hd) ==
                  jnp.arange(n_head)[:, None]).astype(jnp.float32)       # (H, D)
    maskS = jnp.repeat(head_masks, N, axis=0)                            # (H*N, D)

    rep = jnp.tile(jnp.eye(N, dtype=jnp.float32), (n_head, 1))           # (H*N, N)
    rep_t = rep.T                                                        # (N, H*N)

    row = jnp.arange(N)
    bias = jnp.where((row[:, None] // S) == (row[None, :] // S),
                     0.0, -1e30).astype(jnp.float32)                     # (N, N)
    biasS = jnp.tile(bias, (n_head, 1))                                  # (H*N, N)

    P = S // pool
    prow = jnp.arange(B * P)
    pcol = jnp.arange(N)
    same_batch = (prow[:, None] // P) == (pcol[None, :] // S)
    in_window = ((pcol[None, :] % S) // pool) == (prow[:, None] % P)
    pmat = jnp.where(same_batch & in_window, 1.0 / pool, 0.0).astype(jnp.float32)

    pe_b = jnp.tile(pe[:S], (B, 1)) + b_in                               # (N, D)

    return dict(rep=rep, rep_t=rep_t, maskS=maskS, biasS=biasS,
                pmat=pmat, pe_b=pe_b)


def pack_params(params, n_head):
    """Pack per-layer weights into a few slabs; fold 1/sqrt(hd) into wq/bq."""
    D = params["w_in"].shape[1]
    d_hid = params["w1"].shape[-1]
    hd = D // n_head
    scale = 1.0 / math.sqrt(hd)

    wq = params["wq"] * scale
    bq = params["bq"] * scale
    wqkv = jnp.concatenate([wq, params["wk"], params["wv"]], axis=-1)    # (L, D, 3D)
    wA = jnp.concatenate([wqkv, params["wo"], params["w1"]], axis=-1)    # (L, D, 3D+D+d_hid)
    w2 = params["w2"]                                                    # (L, d_hid, D)

    def pad128(a):
        return jnp.pad(a, ((0, 0), (0, 0), (0, 128 - a.shape[-1])))
    rows = [jnp.concatenate([bq, params["bk"], params["bv"]], axis=-1),  # (L,1,3D)
            params["bo"], params["g1"], params["be1"],
            params["b1"], params["b2"], params["g2"], params["be2"]]
    bias_slab = jnp.concatenate([pad128(r) for r in rows], axis=1)       # (L, 8, 128)

    fcw = jnp.zeros((3, D, 16), jnp.float32)
    fcw = fcw.at[0, :, :].set(params["wf1"])
    fcw = fcw.at[1, :16, :8].set(params["wf2"])
    fcw = fcw.at[2, :8, :1].set(params["wf3"])
    fcb = jnp.zeros((3, 1, 16), jnp.float32)
    fcb = fcb.at[0].set(params["bf1"])
    fcb = fcb.at[1, :, :8].set(params["bf2"])
    fcb = fcb.at[2, :, :1].set(params["bf3"])

    return dict(w_in=params["w_in"], wA=wA, w2=w2,
                bias_slab=bias_slab, fcw=fcw, fcb=fcb)


@functools.partial(jax.jit, static_argnames=("n_layers", "d_model", "d_hid", "out_rows"))
def run_fused(consts, packed, x_flat, *, n_layers, d_model, d_hid, out_rows):
    args = [x_flat, packed["w_in"], consts["pe_b"],
            consts["rep"], consts["rep_t"], consts["maskS"], consts["biasS"],
            consts["pmat"],
            packed["wA"], packed["w2"], packed["bias_slab"],
            packed["fcw"], packed["fcb"]]
    return pl.pallas_call(
        functools.partial(_fused_forward_kernel, n_layers, d_model, d_hid),
        out_shape=jax.ShapeDtypeStruct((out_rows, 1), jnp.float32),
    )(*args)


def pallas_forward(x, params, consts, n_head, pool=5):
    B, S, Cin = x.shape
    D = params["w_in"].shape[1]
    L = params["wq"].shape[0]
    d_hid = params["w1"].shape[-1]
    P = S // pool
    packed = pack_params(params, n_head)
    out = run_fused(consts, packed, x.reshape(B * S, Cin),
                    n_layers=L, d_model=D, d_hid=d_hid, out_rows=B * P)
    out = out.reshape(B, P, 1)
    if P == 1:                              # torch .squeeze(1) semantics
        out = jnp.squeeze(out, axis=1)
    return out


# ---------------------------------------------------------------------------
# Parameter construction (deterministic, in-script)
# ---------------------------------------------------------------------------
def init_linear(key, fan_in, fan_out):
    kw, kb = jax.random.split(key)
    bound = 1.0 / math.sqrt(fan_in)
    w = jax.random.uniform(kw, (fan_in, fan_out), jnp.float32, -bound, bound)
    b = jax.random.uniform(kb, (1, fan_out), jnp.float32, -bound, bound)
    return w, b


def init_layer(key, d_model, d_hid):
    ks = jax.random.split(key, 6)
    wq, bq = init_linear(ks[0], d_model, d_model)
    wk, bk = init_linear(ks[1], d_model, d_model)
    wv, bv = init_linear(ks[2], d_model, d_model)
    wo, bo = init_linear(ks[3], d_model, d_model)
    w1, b1 = init_linear(ks[4], d_model, d_hid)
    w2, b2 = init_linear(ks[5], d_hid, d_model)
    ones = jnp.ones((1, d_model), jnp.float32)
    zeros = jnp.zeros((1, d_model), jnp.float32)
    return dict(wq=wq, wk=wk, wv=wv, bq=bq, bk=bk, bv=bv, wo=wo, bo=bo,
                g1=ones, be1=zeros, w1=w1, b1=b1, w2=w2, b2=b2,
                g2=ones, be2=zeros)


def make_pe(max_len, d_model):
    # d_model=32 is even -> the "flag" branch of PositionalEncoding
    position = jnp.arange(max_len, dtype=jnp.float32)[:, None]
    div_term = jnp.exp(jnp.arange(0, d_model, 2, dtype=jnp.float32)
                       * (-math.log(10000.0) / d_model))
    pe = jnp.zeros((max_len, d_model), jnp.float32)
    pe = pe.at[:, 0::2].set(jnp.sin(position * div_term))
    pe = pe.at[:, 1::2].set(jnp.cos(position * div_term))
    return pe


# ---------------------------------------------------------------------------
# Pure-JAX reference (PyTorch semantics, eval mode)
# ---------------------------------------------------------------------------
def _ref_layer_norm(x, g, b):
    mu = jnp.mean(x, axis=-1, keepdims=True)
    var = jnp.mean((x - mu) ** 2, axis=-1, keepdims=True)
    return (x - mu) * jax.lax.rsqrt(var + EPS) * g + b


def _ref_layer(y, params, l, n_head):
    B, S, D = y.shape
    hd = D // n_head
    q = (y @ params["wq"][l] + params["bq"][l]).reshape(B, S, n_head, hd)
    k = (y @ params["wk"][l] + params["bk"][l]).reshape(B, S, n_head, hd)
    v = (y @ params["wv"][l] + params["bv"][l]).reshape(B, S, n_head, hd)
    s = jnp.einsum("bqhd,bkhd->bhqk", q, k) / math.sqrt(hd)
    p = jax.nn.softmax(s, axis=-1)
    a = jnp.einsum("bhqk,bkhd->bqhd", p, v).reshape(B, S, D)
    a = a @ params["wo"][l] + params["bo"][l]
    h1 = _ref_layer_norm(y + a, params["g1"][l], params["be1"][l])
    ff = jax.nn.relu(h1 @ params["w1"][l] + params["b1"][l]) @ params["w2"][l] \
        + params["b2"][l]
    return _ref_layer_norm(h1 + ff, params["g2"][l], params["be2"][l])


def ref_forward(x, params, n_head, pool=5):
    S = x.shape[1]
    y = x @ params["w_in"] + params["b_in"] + params["pe"][None, :S, :]
    L = params["wq"].shape[0]
    for l in range(L):
        y = _ref_layer(y, params, l, n_head)
    B, S, D = y.shape
    y = y.reshape(B, S // pool, pool, D).mean(axis=2)
    h = jax.nn.relu(y @ params["wf1"] + params["bf1"])
    h = jax.nn.relu(h @ params["wf2"] + params["bf2"])
    out = h @ params["wf3"] + params["bf3"]
    if out.shape[1] == 1:
        out = jnp.squeeze(out, axis=1)
    return out


if __name__ == "__main__":
    # Small config consistent with AttentionTransformer_Ning(eeg_channel=17,
    # d_model=32, n_head=8, d_hid=<small>, n_layers=3); seq chosen divisible
    # by the AvgPool2d((5,1)) window and <= max_len=(1600-1)//2.
    B, S = 2, 10
    eeg_channel, d_model, n_head, d_hid, n_layers = 17, 32, 8, 64, 3
    pool = 5

    key = jax.random.PRNGKey(0)
    kx, kin, kl, kf1, kf2, kf3 = jax.random.split(key, 6)
    x = jax.random.normal(kx, (B, S, eeg_channel), jnp.float32)

    w_in, b_in = init_linear(kin, eeg_channel, d_model)
    layer_dicts = [init_layer(k, d_model, d_hid)
                   for k in jax.random.split(kl, n_layers)]
    stacked = {k: jnp.stack([ld[k] for ld in layer_dicts], axis=0)
               for k in layer_dicts[0]}
    wf1, bf1 = init_linear(kf1, d_model, 16)
    wf2, bf2 = init_linear(kf2, 16, 8)
    wf3, bf3 = init_linear(kf3, 8, 1)
    pe = make_pe((1600 - 1) // 2, d_model)   # max_len = (seq_len-1)//2

    params = dict(w_in=w_in, b_in=b_in, pe=pe,
                  wf1=wf1, bf1=bf1, wf2=wf2, bf2=bf2, wf3=wf3, bf3=bf3,
                  **stacked)

    # Constants built once (not on the per-call path).
    consts = build_constants(B, S, d_model, n_head, pool, pe, b_in)

    # TODO(synk): dropout (p=0.1) is implemented as identity (eval mode);
    # stochastic training-mode dropout is not reproduced in-kernel.
    out = jax.block_until_ready(pallas_forward(x, params, consts, n_head, pool))
    ref = ref_forward(x, params, n_head, pool)
    assert out.shape == ref.shape, (out.shape, ref.shape)
    if not jnp.allclose(out, ref, atol=3e-3, rtol=3e-3):
        raise AssertionError("Pallas output mismatch vs JAX reference")
    print("KERNEL_OK")
</pallas_src>

<mosaic_0001>
module attributes {stable_mosaic.version = 11 : i64} {
  func.func @_fused_forward_kernel(%arg0: memref<20x17xf32, #tpu.memory_space<vmem>>, %arg1: memref<17x32xf32, #tpu.memory_space<vmem>>, %arg2: memref<20x32xf32, #tpu.memory_space<vmem>>, %arg3: memref<160x20xf32, #tpu.memory_space<vmem>>, %arg4: memref<20x160xf32, #tpu.memory_space<vmem>>, %arg5: memref<160x32xf32, #tpu.memory_space<vmem>>, %arg6: memref<160x20xf32, #tpu.memory_space<vmem>>, %arg7: memref<4x20xf32, #tpu.memory_space<vmem>>, %arg8: memref<3x32x192xf32, #tpu.memory_space<vmem>>, %arg9: memref<3x64x32xf32, #tpu.memory_space<vmem>>, %arg10: memref<3x8x128xf32, #tpu.memory_space<vmem>>, %arg11: memref<3x32x16xf32, #tpu.memory_space<vmem>>, %arg12: memref<3x1x16xf32, #tpu.memory_space<vmem>>, %arg13: memref<4x1xf32, #tpu.memory_space<vmem>>) attributes {dimension_semantics = [], scalar_prefetch = 0 : i64, scratch_operands = 0 : i64, tpu.core_type = #tpu.core_type<tc>} {
    %c0 = arith.constant 0 : index
    %c0_0 = arith.constant 0 : index
    %0 = vector.load %arg0[%c0, %c0_0] : memref<20x17xf32, #tpu.memory_space<vmem>>, vector<20x17xf32>
    %c0_1 = arith.constant 0 : index
    %c0_2 = arith.constant 0 : index
    %1 = vector.load %arg1[%c0_1, %c0_2] : memref<17x32xf32, #tpu.memory_space<vmem>>, vector<17x32xf32>
    %cst = arith.constant dense<0.000000e+00> : vector<20x32xf32>
    %2 = tpu.matmul %0, %1, %cst {dimension_numbers = #tpu.dot_dimension_numbers<[1], [0], [0], [1], [0, 0, 1, 1], [], []>} : vector<20x17xf32>, vector<17x32xf32>, vector<20x32xf32> -> vector<20x32xf32>
    %c0_3 = arith.constant 0 : index
    %c0_4 = arith.constant 0 : index
    %3 = vector.load %arg2[%c0_3, %c0_4] : memref<20x32xf32, #tpu.memory_space<vmem>>, vector<20x32xf32>
    %4 = arith.addf %2, %3 : vector<20x32xf32>
    %c0_5 = arith.constant 0 : index
    %c0_6 = arith.constant 0 : index
    %5 = vector.load %arg3[%c0_5, %c0_6] : memref<160x20xf32, #tpu.memory_space<vmem>>, vector<160x20xf32>
    %c0_7 = arith.constant 0 : index
    %c0_8 = arith.constant 0 : index
    %6 = vector.load %arg4[%c0_7, %c0_8] : memref<20x160xf32, #tpu.memory_space<vmem>>, vector<20x160xf32>
    %c0_9 = arith.constant 0 : index
    %c0_10 = arith.constant 0 : index
    %7 = vector.load %arg5[%c0_9, %c0_10] : memref<160x32xf32, #tpu.memory_space<vmem>>, vector<160x32xf32>
    %c0_11 = arith.constant 0 : index
    %c0_12 = arith.constant 0 : index
    %8 = vector.load %arg6[%c0_11, %c0_12] : memref<160x20xf32, #tpu.memory_space<vmem>>, vector<160x20xf32>
    %c0_13 = arith.constant 0 : index
    %c0_14 = arith.constant 0 : index
    %c0_15 = arith.constant 0 : index
    %9 = vector.load %arg10[%c0_13, %c0_14, %c0_15] : memref<3x8x128xf32, #tpu.memory_space<vmem>>, vector<3x8x128xf32>
    %c0_16 = arith.constant 0 : index
    %c0_17 = arith.constant 0 : index
    %c0_18 = arith.constant 0 : index
    %10 = vector.load %arg8[%c0_16, %c0_17, %c0_18] : memref<3x32x192xf32, #tpu.memory_space<vmem>>, vector<1x32x192xf32>
    %11 = vector.shape_cast %10 : vector<1x32x192xf32> to vector<32x192xf32>
    %12 = vector.extract_strided_slice %11 {offsets = [0, 0], sizes = [32, 96], strides = [1, 1]} : vector<32x192xf32> to vector<32x96xf32>
    %13 = vector.extract_strided_slice %11 {offsets = [0, 96], sizes = [32, 32], strides = [1, 1]} : vector<32x192xf32> to vector<32x32xf32>
    %14 = vector.extract_strided_slice %11 {offsets = [0, 128], sizes = [32, 64], strides = [1, 1]} : vector<32x192xf32> to vector<32x64xf32>
    %c0_19 = arith.constant 0 : index
    %c0_20 = arith.constant 0 : index
    %c0_21 = arith.constant 0 : index
    %15 = vector.load %arg9[%c0_19, %c0_20, %c0_21] : memref<3x64x32xf32, #tpu.memory_space<vmem>>, vector<1x64x32xf32>
    %16 = vector.shape_cast %15 : vector<1x64x32xf32> to vector<64x32xf32>
    %17 = vector.extract_strided_slice %9 {offsets = [0, 0, 0], sizes = [1, 8, 128], strides = [1, 1, 1]} : vector<3x8x128xf32> to vector<1x8x128xf32>
    %18 = vector.shape_cast %17 : vector<1x8x128xf32> to vector<8x128xf32>
    %19 = vector.extract_strided_slice %18 {offsets = [0, 0], sizes = [1, 96], strides = [1, 1]} : vector<8x128xf32> to vector<1x96xf32>
    %20 = vector.extract_strided_slice %18 {offsets = [1, 0], sizes = [1, 32], strides = [1, 1]} : vector<8x128xf32> to vector<1x32xf32>
    %21 = vector.extract_strided_slice %18 {offsets = [2, 0], sizes = [1, 32], strides = [1, 1]} : vector<8x128xf32> to vector<1x32xf32>
    %22 = vector.extract_strided_slice %18 {offsets = [3, 0], sizes = [1, 32], strides = [1, 1]} : vector<8x128xf32> to vector<1x32xf32>
    %23 = vector.extract_strided_slice %18 {offsets = [4, 0], sizes = [1, 64], strides = [1, 1]} : vector<8x128xf32> to vector<1x64xf32>
    %24 = vector.extract_strided_slice %18 {offsets = [5, 0], sizes = [1, 32], strides = [1, 1]} : vector<8x128xf32> to vector<1x32xf32>
    %25 = vector.extract_strided_slice %18 {offsets = [6, 0], sizes = [1, 32], strides = [1, 1]} : vector<8x128xf32> to vector<1x32xf32>
    %26 = vector.extract_strided_slice %18 {offsets = [7, 0], sizes = [1, 32], strides = [1, 1]} : vector<8x128xf32> to vector<1x32xf32>
    %cst_22 = arith.constant dense<0.000000e+00> : vector<20x96xf32>
    %27 = tpu.matmul %4, %12, %cst_22 {dimension_numbers = #tpu.dot_dimension_numbers<[1], [0], [0], [1], [0, 0, 1, 1], [], []>} : vector<20x32xf32>, vector<32x96xf32>, vector<20x96xf32> -> vector<20x96xf32>
    %28 = vector.broadcast %19 : vector<1x96xf32> to vector<20x96xf32>
    %29 = arith.addf %27, %28 : vector<20x96xf32>
    %30 = vector.extract_strided_slice %29 {offsets = [0, 0], sizes = [20, 32], strides = [1, 1]} : vector<20x96xf32> to vector<20x32xf32>
    %31 = vector.extract_strided_slice %29 {offsets = [0, 32], sizes = [20, 32], strides = [1, 1]} : vector<20x96xf32> to vector<20x32xf32>
    %32 = vector.extract_strided_slice %29 {offsets = [0, 64], sizes = [20, 32], strides = [1, 1]} : vector<20x96xf32> to vector<20x32xf32>
    %cst_23 = arith.constant dense<0.000000e+00> : vector<160x32xf32>
    %33 = tpu.matmul %5, %30, %cst_23 {dimension_numbers = #tpu.dot_dimension_numbers<[1], [0], [0], [1], [0, 0, 1, 1], [], []>} : vector<160x20xf32>, vector<20x32xf32>, vector<160x32xf32> -> vector<160x32xf32>
    %34 = arith.mulf %33, %7 : vector<160x32xf32>
    %35 = tpu.transpose %31, [1, 0] : vector<20x32xf32> -> vector<32x20xf32>
    %cst_24 = arith.constant dense<0.000000e+00> : vector<160x20xf32>
    %36 = tpu.matmul %34, %35, %cst_24 {dimension_numbers = #tpu.dot_dimension_numbers<[1], [0], [0], [1], [0, 0, 1, 1], [], []>} : vector<160x32xf32>, vector<32x20xf32>, vector<160x20xf32> -> vector<160x20xf32>
    %37 = arith.addf %36, %8 : vector<160x20xf32>
    %cst_25 = arith.constant dense<0xFF800000> : vector<160xf32>
    %38 = vector.multi_reduction <maximumf>, %37, %cst_25 [1] : vector<160x20xf32> to vector<160xf32>
    %39 = vector.shape_cast %38 : vector<160xf32> to vector<160x1xf32>
    %40 = vector.broadcast %39 : vector<160x1xf32> to vector<160x20xf32>
    %41 = arith.subf %37, %40 : vector<160x20xf32>
    %42 = math.exp %41 : vector<160x20xf32>
    %cst_26 = arith.constant dense<0.000000e+00> : vector<160xf32>
    %43 = vector.multi_reduction <add>, %42, %cst_26 [1] : vector<160x20xf32> to vector<160xf32>
    %44 = vector.shape_cast %43 : vector<160xf32> to vector<160x1xf32>
    %45 = vector.broadcast %44 : vector<160x1xf32> to vector<160x20xf32>
    %46 = arith.divf %42, %45 : vector<160x20xf32>
    %cst_27 = arith.constant dense<0.000000e+00> : vector<160x32xf32>
    %47 = tpu.matmul %46, %32, %cst_27 {dimension_numbers = #tpu.dot_dimension_numbers<[1], [0], [0], [1], [0, 0, 1, 1], [], []>} : vector<160x20xf32>, vector<20x32xf32>, vector<160x32xf32> -> vector<160x32xf32>
    %48 = arith.mulf %47, %7 : vector<160x32xf32>
    %cst_28 = arith.constant dense<0.000000e+00> : vector<20x32xf32>
    %49 = tpu.matmul %6, %48, %cst_28 {dimension_numbers = #tpu.dot_dimension_numbers<[1], [0], [0], [1], [0, 0, 1, 1], [], []>} : vector<20x160xf32>, vector<160x32xf32>, vector<20x32xf32> -> vector<20x32xf32>
    %cst_29 = arith.constant dense<0.000000e+00> : vector<20x32xf32>
    %50 = tpu.matmul %49, %13, %cst_29 {dimension_numbers = #tpu.dot_dimension_numbers<[1], [0], [0], [1], [0, 0, 1, 1], [], []>} : vector<20x32xf32>, vector<32x32xf32>, vector<20x32xf32> -> vector<20x32xf32>
    %51 = vector.broadcast %20 : vector<1x32xf32> to vector<20x32xf32>
    %52 = arith.addf %50, %51 : vector<20x32xf32>
    %53 = arith.addf %4, %52 : vector<20x32xf32>
    %cst_30 = arith.constant dense<0.000000e+00> : vector<20xf32>
    %54 = vector.multi_reduction <add>, %53, %cst_30 [1] : vector<20x32xf32> to vector<20xf32>
    %55 = vector.shape_cast %54 : vector<20xf32> to vector<20x1xf32>
    %cst_31 = arith.constant 3.200000e+01 : f32
    %56 = vector.broadcast %cst_31 : f32 to vector<20x1xf32>
    %57 = arith.divf %55, %56 : vector<20x1xf32>
    %58 = vector.broadcast %57 : vector<20x1xf32> to vector<20x32xf32>
    %59 = arith.subf %53, %58 : vector<20x32xf32>
    %60 = arith.mulf %59, %59 : vector<20x32xf32>
    %cst_32 = arith.constant dense<0.000000e+00> : vector<20xf32>
    %61 = vector.multi_reduction <add>, %60, %cst_32 [1] : vector<20x32xf32> to vector<20xf32>
    %62 = vector.shape_cast %61 : vector<20xf32> to vector<20x1xf32>
    %cst_33 = arith.constant 3.200000e+01 : f32
    %63 = vector.broadcast %cst_33 : f32 to vector<20x1xf32>
    %64 = arith.divf %62, %63 : vector<20x1xf32>
    %65 = vector.broadcast %57 : vector<20x1xf32> to vector<20x32xf32>
    %66 = arith.subf %53, %65 : vector<20x32xf32>
    %cst_34 = arith.constant 9.99999974E-6 : f32
    %67 = vector.broadcast %cst_34 : f32 to vector<20x1xf32>
    %68 = arith.addf %64, %67 : vector<20x1xf32>
    %69 = math.rsqrt %68 : vector<20x1xf32>
    %70 = vector.broadcast %69 : vector<20x1xf32> to vector<20x32xf32>
    %71 = arith.mulf %66, %70 : vector<20x32xf32>
    %72 = vector.broadcast %21 : vector<1x32xf32> to vector<20x32xf32>
    %73 = arith.mulf %71, %72 : vector<20x32xf32>
    %74 = vector.broadcast %22 : vector<1x32xf32> to vector<20x32xf32>
    %75 = arith.addf %73, %74 : vector<20x32xf32>
    %cst_35 = arith.constant dense<0.000000e+00> : vector<20x64xf32>
    %76 = tpu.matmul %75, %14, %cst_35 {dimension_numbers = #tpu.dot_dimension_numbers<[1], [0], [0], [1], [0, 0, 1, 1], [], []>} : vector<20x32xf32>, vector<32x64xf32>, vector<20x64xf32> -> vector<20x64xf32>
    %77 = vector.broadcast %23 : vector<1x64xf32> to vector<20x64xf32>
    %78 = arith.addf %76, %77 : vector<20x64xf32>
    %cst_36 = arith.constant 0.000000e+00 : f32
    %79 = vector.broadcast %cst_36 : f32 to vector<20x64xf32>
    %80 = arith.maximumf %78, %79 : vector<20x64xf32>
    %cst_37 = arith.constant dense<0.000000e+00> : vector<20x32xf32>
    %81 = tpu.matmul %80, %16, %cst_37 {dimension_numbers = #tpu.dot_dimension_numbers<[1], [0], [0], [1], [0, 0, 1, 1], [], []>} : vector<20x64xf32>, vector<64x32xf32>, vector<20x32xf32> -> vector<20x32xf32>
    %82 = vector.broadcast %24 : vector<1x32xf32> to vector<20x32xf32>
    %83 = arith.addf %81, %82 : vector<20x32xf32>
    %84 = arith.addf %75, %83 : vector<20x32xf32>
    %cst_38 = arith.constant dense<0.000000e+00> : vector<20xf32>
    %85 = vector.multi_reduction <add>, %84, %cst_38 [1] : vector<20x32xf32> to vector<20xf32>
    %86 = vector.shape_cast %85 : vector<20xf32> to vector<20x1xf32>
    %cst_39 = arith.constant 3.200000e+01 : f32
    %87 = vector.broadcast %cst_39 : f32 to vector<20x1xf32>
    %88 = arith.divf %86, %87 : vector<20x1xf32>
    %89 = vector.broadcast %88 : vector<20x1xf32> to vector<20x32xf32>
    %90 = arith.subf %84, %89 : vector<20x32xf32>
    %91 = arith.mulf %90, %90 : vector<20x32xf32>
    %cst_40 = arith.constant dense<0.000000e+00> : vector<20xf32>
    %92 = vector.multi_reduction <add>, %91, %cst_40 [1] : vector<20x32xf32> to vector<20xf32>
    %93 = vector.shape_cast %92 : vector<20xf32> to vector<20x1xf32>
    %cst_41 = arith.constant 3.200000e+01 : f32
    %94 = vector.broadcast %cst_41 : f32 to vector<20x1xf32>
    %95 = arith.divf %93, %94 : vector<20x1xf32>
    %96 = vector.broadcast %88 : vector<20x1xf32> to vector<20x32xf32>
    %97 = arith.subf %84, %96 : vector<20x32xf32>
    %cst_42 = arith.constant 9.99999974E-6 : f32
    %98 = vector.broadcast %cst_42 : f32 to vector<20x1xf32>
    %99 = arith.addf %95, %98 : vector<20x1xf32>
    %100 = math.rsqrt %99 : vector<20x1xf32>
    %101 = vector.broadcast %100 : vector<20x1xf32> to vector<20x32xf32>
    %102 = arith.mulf %97, %101 : vector<20x32xf32>
    %103 = vector.broadcast %25 : vector<1x32xf32> to vector<20x32xf32>
    %104 = arith.mulf %102, %103 : vector<20x32xf32>
    %105 = vector.broadcast %26 : vector<1x32xf32> to vector<20x32xf32>
    %106 = arith.addf %104, %105 : vector<20x32xf32>
    %c1 = arith.constant 1 : index
    %c0_43 = arith.constant 0 : index
    %c0_44 = arith.constant 0 : index
    %107 = vector.load %arg8[%c1, %c0_43, %c0_44] : memref<3x32x192xf32, #tpu.memory_space<vmem>>, vector<1x32x192xf32>
    %108 = vector.shape_cast %107 : vector<1x32x192xf32> to vector<32x192xf32>
    %109 = vector.extract_strided_slice %108 {offsets = [0, 0], sizes = [32, 96], strides = [1, 1]} : vector<32x192xf32> to vector<32x96xf32>
    %110 = vector.extract_strided_slice %108 {offsets = [0, 96], sizes = [32, 32], strides = [1, 1]} : vector<32x192xf32> to vector<32x32xf32>
    %111 = vector.extract_strided_slice %108 {offsets = [0, 128], sizes = [32, 64], strides = [1, 1]} : vector<32x192xf32> to vector<32x64xf32>
    %c1_45 = arith.constant 1 : index
    %c0_46 = arith.constant 0 : index
    %c0_47 = arith.constant 0 : index
    %112 = vector.load %arg9[%c1_45, %c0_46, %c0_47] : memref<3x64x32xf32, #tpu.memory_space<vmem>>, vector<1x64x32xf32>
    %113 = vector.shape_cast %112 : vector<1x64x32xf32> to vector<64x32xf32>
    %114 = vector.extract_strided_slice %9 {offsets = [1, 0, 0], sizes = [1, 8, 128], strides = [1, 1, 1]} : vector<3x8x128xf32> to vector<1x8x128xf32>
    %115 = vector.shape_cast %114 : vector<1x8x128xf32> to vector<8x128xf32>
    %116 = vector.extract_strided_slice %115 {offsets = [0, 0], sizes = [1, 96], strides = [1, 1]} : vector<8x128xf32> to vector<1x96xf32>
    %117 = vector.extract_strided_slice %115 {offsets = [1, 0], sizes = [1, 32], strides = [1, 1]} : vector<8x128xf32> to vector<1x32xf32>
    %118 = vector.extract_strided_slice %115 {offsets = [2, 0], sizes = [1, 32], strides = [1, 1]} : vector<8x128xf32> to vector<1x32xf32>
    %119 = vector.extract_strided_slice %115 {offsets = [3, 0], sizes = [1, 32], strides = [1, 1]} : vector<8x128xf32> to vector<1x32xf32>
    %120 = vector.extract_strided_slice %115 {offsets = [4, 0], sizes = [1, 64], strides = [1, 1]} : vector<8x128xf32> to vector<1x64xf32>
    %121 = vector.extract_strided_slice %115 {offsets = [5, 0], sizes = [1, 32], strides = [1, 1]} : vector<8x128xf32> to vector<1x32xf32>
    %122 = vector.extract_strided_slice %115 {offsets = [6, 0], sizes = [1, 32], strides = [1, 1]} : vector<8x128xf32> to vector<1x32xf32>
    %123 = vector.extract_strided_slice %115 {offsets = [7, 0], sizes = [1, 32], strides = [1, 1]} : vector<8x128xf32> to vector<1x32xf32>
    %cst_48 = arith.constant dense<0.000000e+00> : vector<20x96xf32>
    %124 = tpu.matmul %106, %109, %cst_48 {dimension_numbers = #tpu.dot_dimension_numbers<[1], [0], [0], [1], [0, 0, 1, 1], [], []>} : vector<20x32xf32>, vector<32x96xf32>, vector<20x96xf32> -> vector<20x96xf32>
    %125 = vector.broadcast %116 : vector<1x96xf32> to vector<20x96xf32>
    %126 = arith.addf %124, %125 : vector<20x96xf32>
    %127 = vector.extract_strided_slice %126 {offsets = [0, 0], sizes = [20, 32], strides = [1, 1]} : vector<20x96xf32> to vector<20x32xf32>
    %128 = vector.extract_strided_slice %126 {offsets = [0, 32], sizes = [20, 32], strides = [1, 1]} : vector<20x96xf32> to vector<20x32xf32>
    %129 = vector.extract_strided_slice %126 {offsets = [0, 64], sizes = [20, 32], strides = [1, 1]} : vector<20x96xf32> to vector<20x32xf32>
    %cst_49 = arith.constant dense<0.000000e+00> : vector<160x32xf32>
    %130 = tpu.matmul %5, %127, %cst_49 {dimension_numbers = #tpu.dot_dimension_numbers<[1], [0], [0], [1], [0, 0, 1, 1], [], []>} : vector<160x20xf32>, vector<20x32xf32>, vector<160x32xf32> -> vector<160x32xf32>
    %131 = arith.mulf %130, %7 : vector<160x32xf32>
    %132 = tpu.transpose %128, [1, 0] : vector<20x32xf32> -> vector<32x20xf32>
    %cst_50 = arith.constant dense<0.000000e+00> : vector<160x20xf32>
    %133 = tpu.matmul %131, %132, %cst_50 {dimension_numbers = #tpu.dot_dimension_numbers<[1], [0], [0], [1], [0, 0, 1, 1], [], []>} : vector<160x32xf32>, vector<32x20xf32>, vector<160x20xf32> -> vector<160x20xf32>
    %134 = arith.addf %133, %8 : vector<160x20xf32>
    %cst_51 = arith.constant dense<0xFF800000> : vector<160xf32>
    %135 = vector.multi_reduction <maximumf>, %134, %cst_51 [1] : vector<160x20xf32> to vector<160xf32>
    %136 = vector.shape_cast %135 : vector<160xf32> to vector<160x1xf32>
    %137 = vector.broadcast %136 : vector<160x1xf32> to vector<160x20xf32>
    %138 = arith.subf %134, %137 : vector<160x20xf32>
    %139 = math.exp %138 : vector<160x20xf32>
    %cst_52 = arith.constant dense<0.000000e+00> : vector<160xf32>
    %140 = vector.multi_reduction <add>, %139, %cst_52 [1] : vector<160x20xf32> to vector<160xf32>
    %141 = vector.shape_cast %140 : vector<160xf32> to vector<160x1xf32>
    %142 = vector.broadcast %141 : vector<160x1xf32> to vector<160x20xf32>
    %143 = arith.divf %139, %142 : vector<160x20xf32>
    %cst_53 = arith.constant dense<0.000000e+00> : vector<160x32xf32>
    %144 = tpu.matmul %143, %129, %cst_53 {dimension_numbers = #tpu.dot_dimension_numbers<[1], [0], [0], [1], [0, 0, 1, 1], [], []>} : vector<160x20xf32>, vector<20x32xf32>, vector<160x32xf32> -> vector<160x32xf32>
    %145 = arith.mulf %144, %7 : vector<160x32xf32>
    %cst_54 = arith.constant dense<0.000000e+00> : vector<20x32xf32>
    %146 = tpu.matmul %6, %145, %cst_54 {dimension_numbers = #tpu.dot_dimension_numbers<[1], [0], [0], [1], [0, 0, 1, 1], [], []>} : vector<20x160xf32>, vector<160x32xf32>, vector<20x32xf32> -> vector<20x32xf32>
    %cst_55 = arith.constant dense<0.000000e+00> : vector<20x32xf32>
    %147 = tpu.matmul %146, %110, %cst_55 {dimension_numbers = #tpu.dot_dimension_numbers<[1], [0], [0], [1], [0, 0, 1, 1], [], []>} : vector<20x32xf32>, vector<32x32xf32>, vector<20x32xf32> -> vector<20x32xf32>
    %148 = vector.broadcast %117 : vector<1x32xf32> to vector<20x32xf32>
    %149 = arith.addf %147, %148 : vector<20x32xf32>
    %150 = arith.addf %106, %149 : vector<20x32xf32>
    %cst_56 = arith.constant dense<0.000000e+00> : vector<20xf32>
    %151 = vector.multi_reduction <add>, %150, %cst_56 [1] : vector<20x32xf32> to vector<20xf32>
    %152 = vector.shape_cast %151 : vector<20xf32> to vector<20x1xf32>
    %cst_57 = arith.constant 3.200000e+01 : f32
    %153 = vector.broadcast %cst_57 : f32 to vector<20x1xf32>
    %154 = arith.divf %152, %153 : vector<20x1xf32>
    %155 = vector.broadcast %154 : vector<20x1xf32> to vector<20x32xf32>
    %156 = arith.subf %150, %155 : vector<20x32xf32>
    %157 = arith.mulf %156, %156 : vector<20x32xf32>
    %cst_58 = arith.constant dense<0.000000e+00> : vector<20xf32>
    %158 = vector.multi_reduction <add>, %157, %cst_58 [1] : vector<20x32xf32> to vector<20xf32>
    %159 = vector.shape_cast %158 : vector<20xf32> to vector<20x1xf32>
    %cst_59 = arith.constant 3.200000e+01 : f32
    %160 = vector.broadcast %cst_59 : f32 to vector<20x1xf32>
    %161 = arith.divf %159, %160 : vector<20x1xf32>
    %162 = vector.broadcast %154 : vector<20x1xf32> to vector<20x32xf32>
    %163 = arith.subf %150, %162 : vector<20x32xf32>
    %cst_60 = arith.constant 9.99999974E-6 : f32
    %164 = vector.broadcast %cst_60 : f32 to vector<20x1xf32>
    %165 = arith.addf %161, %164 : vector<20x1xf32>
    %166 = math.rsqrt %165 : vector<20x1xf32>
    %167 = vector.broadcast %166 : vector<20x1xf32> to vector<20x32xf32>
    %168 = arith.mulf %163, %167 : vector<20x32xf32>
    %169 = vector.broadcast %118 : vector<1x32xf32> to vector<20x32xf32>
    %170 = arith.mulf %168, %169 : vector<20x32xf32>
    %171 = vector.broadcast %119 : vector<1x32xf32> to vector<20x32xf32>
    %172 = arith.addf %170, %171 : vector<20x32xf32>
    %cst_61 = arith.constant dense<0.000000e+00> : vector<20x64xf32>
    %173 = tpu.matmul %172, %111, %cst_61 {dimension_numbers = #tpu.dot_dimension_numbers<[1], [0], [0], [1], [0, 0, 1, 1], [], []>} : vector<20x32xf32>, vector<32x64xf32>, vector<20x64xf32> -> vector<20x64xf32>
    %174 = vector.broadcast %120 : vector<1x64xf32> to vector<20x64xf32>
    %175 = arith.addf %173, %174 : vector<20x64xf32>
    %cst_62 = arith.constant 0.000000e+00 : f32
    %176 = vector.broadcast %cst_62 : f32 to vector<20x64xf32>
    %177 = arith.maximumf %175, %176 : vector<20x64xf32>
    %cst_63 = arith.constant dense<0.000000e+00> : vector<20x32xf32>
    %178 = tpu.matmul %177, %113, %cst_63 {dimension_numbers = #tpu.dot_dimension_numbers<[1], [0], [0], [1], [0, 0, 1, 1], [], []>} : vector<20x64xf32>, vector<64x32xf32>, vector<20x32xf32> -> vector<20x32xf32>
    %179 = vector.broadcast %121 : vector<1x32xf32> to vector<20x32xf32>
    %180 = arith.addf %178, %179 : vector<20x32xf32>
    %181 = arith.addf %172, %180 : vector<20x32xf32>
    %cst_64 = arith.constant dense<0.000000e+00> : vector<20xf32>
    %182 = vector.multi_reduction <add>, %181, %cst_64 [1] : vector<20x32xf32> to vector<20xf32>
    %183 = vector.shape_cast %182 : vector<20xf32> to vector<20x1xf32>
    %cst_65 = arith.constant 3.200000e+01 : f32
    %184 = vector.broadcast %cst_65 : f32 to vector<20x1xf32>
    %185 = arith.divf %183, %184 : vector<20x1xf32>
    %186 = vector.broadcast %185 : vector<20x1xf32> to vector<20x32xf32>
    %187 = arith.subf %181, %186 : vector<20x32xf32>
    %188 = arith.mulf %187, %187 : vector<20x32xf32>
    %cst_66 = arith.constant dense<0.000000e+00> : vector<20xf32>
    %189 = vector.multi_reduction <add>, %188, %cst_66 [1] : vector<20x32xf32> to vector<20xf32>
    %190 = vector.shape_cast %189 : vector<20xf32> to vector<20x1xf32>
    %cst_67 = arith.constant 3.200000e+01 : f32
    %191 = vector.broadcast %cst_67 : f32 to vector<20x1xf32>
    %192 = arith.divf %190, %191 : vector<20x1xf32>
    %193 = vector.broadcast %185 : vector<20x1xf32> to vector<20x32xf32>
    %194 = arith.subf %181, %193 : vector<20x32xf32>
    %cst_68 = arith.constant 9.99999974E-6 : f32
    %195 = vector.broadcast %cst_68 : f32 to vector<20x1xf32>
    %196 = arith.addf %192, %195 : vector<20x1xf32>
    %197 = math.rsqrt %196 : vector<20x1xf32>
    %198 = vector.broadcast %197 : vector<20x1xf32> to vector<20x32xf32>
    %199 = arith.mulf %194, %198 : vector<20x32xf32>
    %200 = vector.broadcast %122 : vector<1x32xf32> to vector<20x32xf32>
    %201 = arith.mulf %199, %200 : vector<20x32xf32>
    %202 = vector.broadcast %123 : vector<1x32xf32> to vector<20x32xf32>
    %203 = arith.addf %201, %202 : vector<20x32xf32>
    %c2 = arith.constant 2 : index
    %c0_69 = arith.constant 0 : index
    %c0_70 = arith.constant 0 : index
    %204 = vector.load %arg8[%c2, %c0_69, %c0_70] : memref<3x32x192xf32, #tpu.memory_space<vmem>>, vector<1x32x192xf32>
    %205 = vector.shape_cast %204 : vector<1x32x192xf32> to vector<32x192xf32>
    %206 = vector.extract_strided_slice %205 {offsets = [0, 0], sizes = [32, 96], strides = [1, 1]} : vector<32x192xf32> to vector<32x96xf32>
    %207 = vector.extract_strided_slice %205 {offsets = [0, 96], sizes = [32, 32], strides = [1, 1]} : vector<32x192xf32> to vector<32x32xf32>
    %208 = vector.extract_strided_slice %205 {offsets = [0, 128], sizes = [32, 64], strides = [1, 1]} : vector<32x192xf32> to vector<32x64xf32>
    %c2_71 = arith.constant 2 : index
    %c0_72 = arith.constant 0 : index
    %c0_73 = arith.constant 0 : index
    %209 = vector.load %arg9[%c2_71, %c0_72, %c0_73] : memref<3x64x32xf32, #tpu.memory_space<vmem>>, vector<1x64x32xf32>
    %210 = vector.shape_cast %209 : vector<1x64x32xf32> to vector<64x32xf32>
    %211 = vector.extract_strided_slice %9 {offsets = [2, 0, 0], sizes = [1, 8, 128], strides = [1, 1, 1]} : vector<3x8x128xf32> to vector<1x8x128xf32>
    %212 = vector.shape_cast %211 : vector<1x8x128xf32> to vector<8x128xf32>
    %213 = vector.extract_strided_slice %212 {offsets = [0, 0], sizes = [1, 96], strides = [1, 1]} : vector<8x128xf32> to vector<1x96xf32>
    %214 = vector.extract_strided_slice %212 {offsets = [1, 0], sizes = [1, 32], strides = [1, 1]} : vector<8x128xf32> to vector<1x32xf32>
    %215 = vector.extract_strided_slice %212 {offsets = [2, 0], sizes = [1, 32], strides = [1, 1]} : vector<8x128xf32> to vector<1x32xf32>
    %216 = vector.extract_strided_slice %212 {offsets = [3, 0], sizes = [1, 32], strides = [1, 1]} : vector<8x128xf32> to vector<1x32xf32>
    %217 = vector.extract_strided_slice %212 {offsets = [4, 0], sizes = [1, 64], strides = [1, 1]} : vector<8x128xf32> to vector<1x64xf32>
    %218 = vector.extract_strided_slice %212 {offsets = [5, 0], sizes = [1, 32], strides = [1, 1]} : vector<8x128xf32> to vector<1x32xf32>
    %219 = vector.extract_strided_slice %212 {offsets = [6, 0], sizes = [1, 32], strides = [1, 1]} : vector<8x128xf32> to vector<1x32xf32>
    %220 = vector.extract_strided_slice %212 {offsets = [7, 0], sizes = [1, 32], strides = [1, 1]} : vector<8x128xf32> to vector<1x32xf32>
    %cst_74 = arith.constant dense<0.000000e+00> : vector<20x96xf32>
    %221 = tpu.matmul %203, %206, %cst_74 {dimension_numbers = #tpu.dot_dimension_numbers<[1], [0], [0], [1], [0, 0, 1, 1], [], []>} : vector<20x32xf32>, vector<32x96xf32>, vector<20x96xf32> -> vector<20x96xf32>
    %222 = vector.broadcast %213 : vector<1x96xf32> to vector<20x96xf32>
    %223 = arith.addf %221, %222 : vector<20x96xf32>
    %224 = vector.extract_strided_slice %223 {offsets = [0, 0], sizes = [20, 32], strides = [1, 1]} : vector<20x96xf32> to vector<20x32xf32>
    %225 = vector.extract_strided_slice %223 {offsets = [0, 32], sizes = [20, 32], strides = [1, 1]} : vector<20x96xf32> to vector<20x32xf32>
    %226 = vector.extract_strided_slice %223 {offsets = [0, 64], sizes = [20, 32], strides = [1, 1]} : vector<20x96xf32> to vector<20x32xf32>
    %cst_75 = arith.constant dense<0.000000e+00> : vector<160x32xf32>
    %227 = tpu.matmul %5, %224, %cst_75 {dimension_numbers = #tpu.dot_dimension_numbers<[1], [0], [0], [1], [0, 0, 1, 1], [], []>} : vector<160x20xf32>, vector<20x32xf32>, vector<160x32xf32> -> vector<160x32xf32>
    %228 = arith.mulf %227, %7 : vector<160x32xf32>
    %229 = tpu.transpose %225, [1, 0] : vector<20x32xf32> -> vector<32x20xf32>
    %cst_76 = arith.constant dense<0.000000e+00> : vector<160x20xf32>
    %230 = tpu.matmul %228, %229, %cst_76 {dimension_numbers = #tpu.dot_dimension_numbers<[1], [0], [0], [1], [0, 0, 1, 1], [], []>} : vector<160x32xf32>, vector<32x20xf32>, vector<160x20xf32> -> vector<160x20xf32>
    %231 = arith.addf %230, %8 : vector<160x20xf32>
    %cst_77 = arith.constant dense<0xFF800000> : vector<160xf32>
    %232 = vector.multi_reduction <maximumf>, %231, %cst_77 [1] : vector<160x20xf32> to vector<160xf32>
    %233 = vector.shape_cast %232 : vector<160xf32> to vector<160x1xf32>
    %234 = vector.broadcast %233 : vector<160x1xf32> to vector<160x20xf32>
    %235 = arith.subf %231, %234 : vector<160x20xf32>
    %236 = math.exp %235 : vector<160x20xf32>
    %cst_78 = arith.constant dense<0.000000e+00> : vector<160xf32>
    %237 = vector.multi_reduction <add>, %236, %cst_78 [1] : vector<160x20xf32> to vector<160xf32>
    %238 = vector.shape_cast %237 : vector<160xf32> to vector<160x1xf32>
    %239 = vector.broadcast %238 : vector<160x1xf32> to vector<160x20xf32>
    %240 = arith.divf %236, %239 : vector<160x20xf32>
    %cst_79 = arith.constant dense<0.000000e+00> : vector<160x32xf32>
    %241 = tpu.matmul %240, %226, %cst_79 {dimension_numbers = #tpu.dot_dimension_numbers<[1], [0], [0], [1], [0, 0, 1, 1], [], []>} : vector<160x20xf32>, vector<20x32xf32>, vector<160x32xf32> -> vector<160x32xf32>
    %242 = arith.mulf %241, %7 : vector<160x32xf32>
    %cst_80 = arith.constant dense<0.000000e+00> : vector<20x32xf32>
    %243 = tpu.matmul %6, %242, %cst_80 {dimension_numbers = #tpu.dot_dimension_numbers<[1], [0], [0], [1], [0, 0, 1, 1], [], []>} : vector<20x160xf32>, vector<160x32xf32>, vector<20x32xf32> -> vector<20x32xf32>
    %cst_81 = arith.constant dense<0.000000e+00> : vector<20x32xf32>
    %244 = tpu.matmul %243, %207, %cst_81 {dimension_numbers = #tpu.dot_dimension_numbers<[1], [0], [0], [1], [0, 0, 1, 1], [], []>} : vector<20x32xf32>, vector<32x32xf32>, vector<20x32xf32> -> vector<20x32xf32>
    %245 = vector.broadcast %214 : vector<1x32xf32> to vector<20x32xf32>
    %246 = arith.addf %244, %245 : vector<20x32xf32>
    %247 = arith.addf %203, %246 : vector<20x32xf32>
    %cst_82 = arith.constant dense<0.000000e+00> : vector<20xf32>
    %248 = vector.multi_reduction <add>, %247, %cst_82 [1] : vector<20x32xf32> to vector<20xf32>
    %249 = vector.shape_cast %248 : vector<20xf32> to vector<20x1xf32>
    %cst_83 = arith.constant 3.200000e+01 : f32
    %250 = vector.broadcast %cst_83 : f32 to vector<20x1xf32>
    %251 = arith.divf %249, %250 : vector<20x1xf32>
    %252 = vector.broadcast %251 : vector<20x1xf32> to vector<20x32xf32>
    %253 = arith.subf %247, %252 : vector<20x32xf32>
    %254 = arith.mulf %253, %253 : vector<20x32xf32>
    %cst_84 = arith.constant dense<0.000000e+00> : vector<20xf32>
    %255 = vector.multi_reduction <add>, %254, %cst_84 [1] : vector<20x32xf32> to vector<20xf32>
    %256 = vector.shape_cast %255 : vector<20xf32> to vector<20x1xf32>
    %cst_85 = arith.constant 3.200000e+01 : f32
    %257 = vector.broadcast %cst_85 : f32 to vector<20x1xf32>
    %258 = arith.divf %256, %257 : vector<20x1xf32>
    %259 = vector.broadcast %251 : vector<20x1xf32> to vector<20x32xf32>
    %260 = arith.subf %247, %259 : vector<20x32xf32>
    %cst_86 = arith.constant 9.99999974E-6 : f32
    %261 = vector.broadcast %cst_86 : f32 to vector<20x1xf32>
    %262 = arith.addf %258, %261 : vector<20x1xf32>
    %263 = math.rsqrt %262 : vector<20x1xf32>
    %264 = vector.broadcast %263 : vector<20x1xf32> to vector<20x32xf32>
    %265 = arith.mulf %260, %264 : vector<20x32xf32>
    %266 = vector.broadcast %215 : vector<1x32xf32> to vector<20x32xf32>
    %267 = arith.mulf %265, %266 : vector<20x32xf32>
    %268 = vector.broadcast %216 : vector<1x32xf32> to vector<20x32xf32>
    %269 = arith.addf %267, %268 : vector<20x32xf32>
    %cst_87 = arith.constant dense<0.000000e+00> : vector<20x64xf32>
    %270 = tpu.matmul %269, %208, %cst_87 {dimension_numbers = #tpu.dot_dimension_numbers<[1], [0], [0], [1], [0, 0, 1, 1], [], []>} : vector<20x32xf32>, vector<32x64xf32>, vector<20x64xf32> -> vector<20x64xf32>
    %271 = vector.broadcast %217 : vector<1x64xf32> to vector<20x64xf32>
    %272 = arith.addf %270, %271 : vector<20x64xf32>
    %cst_88 = arith.constant 0.000000e+00 : f32
    %273 = vector.broadcast %cst_88 : f32 to vector<20x64xf32>
    %274 = arith.maximumf %272, %273 : vector<20x64xf32>
    %cst_89 = arith.constant dense<0.000000e+00> : vector<20x32xf32>
    %275 = tpu.matmul %274, %210, %cst_89 {dimension_numbers = #tpu.dot_dimension_numbers<[1], [0], [0], [1], [0, 0, 1, 1], [], []>} : vector<20x64xf32>, vector<64x32xf32>, vector<20x32xf32> -> vector<20x32xf32>
    %276 = vector.broadcast %218 : vector<1x32xf32> to vector<20x32xf32>
    %277 = arith.addf %275, %276 : vector<20x32xf32>
    %278 = arith.addf %269, %277 : vector<20x32xf32>
    %cst_90 = arith.constant dense<0.000000e+00> : vector<20xf32>
    %279 = vector.multi_reduction <add>, %278, %cst_90 [1] : vector<20x32xf32> to vector<20xf32>
    %280 = vector.shape_cast %279 : vector<20xf32> to vector<20x1xf32>
    %cst_91 = arith.constant 3.200000e+01 : f32
    %281 = vector.broadcast %cst_91 : f32 to vector<20x1xf32>
    %282 = arith.divf %280, %281 : vector<20x1xf32>
    %283 = vector.broadcast %282 : vector<20x1xf32> to vector<20x32xf32>
    %284 = arith.subf %278, %283 : vector<20x32xf32>
    %285 = arith.mulf %284, %284 : vector<20x32xf32>
    %cst_92 = arith.constant dense<0.000000e+00> : vector<20xf32>
    %286 = vector.multi_reduction <add>, %285, %cst_92 [1] : vector<20x32xf32> to vector<20xf32>
    %287 = vector.shape_cast %286 : vector<20xf32> to vector<20x1xf32>
    %cst_93 = arith.constant 3.200000e+01 : f32
    %288 = vector.broadcast %cst_93 : f32 to vector<20x1xf32>
    %289 = arith.divf %287, %288 : vector<20x1xf32>
    %290 = vector.broadcast %282 : vector<20x1xf32> to vector<20x32xf32>
    %291 = arith.subf %278, %290 : vector<20x32xf32>
    %cst_94 = arith.constant 9.99999974E-6 : f32
    %292 = vector.broadcast %cst_94 : f32 to vector<20x1xf32>
    %293 = arith.addf %289, %292 : vector<20x1xf32>
    %294 = math.rsqrt %293 : vector<20x1xf32>
    %295 = vector.broadcast %294 : vector<20x1xf32> to vector<20x32xf32>
    %296 = arith.mulf %291, %295 : vector<20x32xf32>
    %297 = vector.broadcast %219 : vector<1x32xf32> to vector<20x32xf32>
    %298 = arith.mulf %296, %297 : vector<20x32xf32>
    %299 = vector.broadcast %220 : vector<1x32xf32> to vector<20x32xf32>
    %300 = arith.addf %298, %299 : vector<20x32xf32>
    %c0_95 = arith.constant 0 : index
    %c0_96 = arith.constant 0 : index
    %301 = vector.load %arg7[%c0_95, %c0_96] : memref<4x20xf32, #tpu.memory_space<vmem>>, vector<4x20xf32>
    %cst_97 = arith.constant dense<0.000000e+00> : vector<4x32xf32>
    %302 = tpu.matmul %301, %300, %cst_97 {dimension_numbers = #tpu.dot_dimension_numbers<[1], [0], [0], [1], [0, 0, 1, 1], [], []>} : vector<4x20xf32>, vector<20x32xf32>, vector<4x32xf32> -> vector<4x32xf32>
    %c0_98 = arith.constant 0 : index
    %c0_99 = arith.constant 0 : index
    %c0_100 = arith.constant 0 : index
    %303 = vector.load %arg11[%c0_98, %c0_99, %c0_100] : memref<3x32x16xf32, #tpu.memory_space<vmem>>, vector<3x32x16xf32>
    %c0_101 = arith.constant 0 : index
    %c0_102 = arith.constant 0 : index
    %c0_103 = arith.constant 0 : index
    %304 = vector.load %arg12[%c0_101, %c0_102, %c0_103] : memref<3x1x16xf32, #tpu.memory_space<vmem>>, vector<3x1x16xf32>
    %305 = vector.extract_strided_slice %303 {offsets = [0, 0, 0], sizes = [1, 32, 16], strides = [1, 1, 1]} : vector<3x32x16xf32> to vector<1x32x16xf32>
    %306 = vector.shape_cast %305 : vector<1x32x16xf32> to vector<32x16xf32>
    %cst_104 = arith.constant dense<0.000000e+00> : vector<4x16xf32>
    %307 = tpu.matmul %302, %306, %cst_104 {dimension_numbers = #tpu.dot_dimension_numbers<[1], [0], [0], [1], [0, 0, 1, 1], [], []>} : vector<4x32xf32>, vector<32x16xf32>, vector<4x16xf32> -> vector<4x16xf32>
    %308 = vector.extract_strided_slice %304 {offsets = [0, 0, 0], sizes = [1, 1, 16], strides = [1, 1, 1]} : vector<3x1x16xf32> to vector<1x1x16xf32>
    %309 = vector.shape_cast %308 : vector<1x1x16xf32> to vector<1x16xf32>
    %310 = vector.broadcast %309 : vector<1x16xf32> to vector<4x16xf32>
    %311 = arith.addf %307, %310 : vector<4x16xf32>
    %cst_105 = arith.constant 0.000000e+00 : f32
    %312 = vector.broadcast %cst_105 : f32 to vector<4x16xf32>
    %313 = arith.maximumf %311, %312 : vector<4x16xf32>
    %314 = vector.extract_strided_slice %303 {offsets = [1, 0, 0], sizes = [1, 16, 8], strides = [1, 1, 1]} : vector<3x32x16xf32> to vector<1x16x8xf32>
    %315 = vector.shape_cast %314 : vector<1x16x8xf32> to vector<16x8xf32>
    %cst_106 = arith.constant dense<0.000000e+00> : vector<4x8xf32>
    %316 = tpu.matmul %313, %315, %cst_106 {dimension_numbers = #tpu.dot_dimension_numbers<[1], [0], [0], [1], [0, 0, 1, 1], [], []>} : vector<4x16xf32>, vector<16x8xf32>, vector<4x8xf32> -> vector<4x8xf32>
    %317 = vector.extract_strided_slice %304 {offsets = [1, 0, 0], sizes = [1, 1, 8], strides = [1, 1, 1]} : vector<3x1x16xf32> to vector<1x1x8xf32>
    %318 = vector.shape_cast %317 : vector<1x1x8xf32> to vector<1x8xf32>
    %319 = vector.broadcast %318 : vector<1x8xf32> to vector<4x8xf32>
    %320 = arith.addf %316, %319 : vector<4x8xf32>
    %cst_107 = arith.constant 0.000000e+00 : f32
    %321 = vector.broadcast %cst_107 : f32 to vector<4x8xf32>
    %322 = arith.maximumf %320, %321 : vector<4x8xf32>
    %323 = vector.extract_strided_slice %303 {offsets = [2, 0, 0], sizes = [1, 8, 1], strides = [1, 1, 1]} : vector<3x32x16xf32> to vector<1x8x1xf32>
    %324 = vector.shape_cast %323 : vector<1x8x1xf32> to vector<8x1xf32>
    %cst_108 = arith.constant dense<0.000000e+00> : vector<4x1xf32>
    %325 = tpu.matmul %322, %324, %cst_108 {dimension_numbers = #tpu.dot_dimension_numbers<[1], [0], [0], [1], [0, 0, 1, 1], [], []>} : vector<4x8xf32>, vector<8x1xf32>, vector<4x1xf32> -> vector<4x1xf32>
    %326 = vector.extract_strided_slice %304 {offsets = [2, 0, 0], sizes = [1, 1, 1], strides = [1, 1, 1]} : vector<3x1x16xf32> to vector<1x1x1xf32>
    %327 = vector.shape_cast %326 : vector<1x1x1xf32> to vector<1x1xf32>
    %328 = vector.broadcast %327 : vector<1x1xf32> to vector<4x1xf32>
    %329 = arith.addf %325, %328 : vector<4x1xf32>
    %c0_109 = arith.constant 0 : index
    %c0_110 = arith.constant 0 : index
    %330 = vector.load %arg13[%c0_109, %c0_110] : memref<4x1xf32, #tpu.memory_space<vmem>>, vector<4x1xf32>
    tpu.vector_store %arg13[%c0_109, %c0_110], %329 {strides = array<i32>} : memref<4x1xf32, #tpu.memory_space<vmem>>, vector<4x1xf32>,
    return
  }
}

</mosaic_0001>

<bundles_post_ra>
// kernel: run_fused.1
= control target key start
LH: loop header
LB: loop body
LE: loop exit
PB: predicated region body
PF: predicated region fallthrough
CT: control target
= control target key end

     0   :  { %vm63_vm0 = vcmask 1040384   ;;  %vm53_vm1 = vcmask 138240   ;;  %vm179_vm2 = vcmask 261120   ;;  %s4987_s17 = smov 96   ;;  %vm276_vm3 = vcmask 1043456   ;;  %s4989_s26 = smov 32   ;;  %s7473_s1 = inlined_call_operand.vmem [shape: f32[17,32], index: 1, kind: input, shape index: {}]   ;;  %s7474_s8 = inlined_call_operand.vmem [shape: f32[3,32,192], index: 8, kind: input, shape index: {}]   ;;  %s7475_s0 = inlined_call_operand.vmem [shape: f32[20,17], index: 0, kind: input, shape index: {}]   ;;  %s7476_s2 = inlined_call_operand.vmem [shape: f32[20,32], index: 2, kind: input, shape index: {}]   ;;  %s7477_s10 = inlined_call_operand.vmem [shape: f32[3,8,128], index: 10, kind: input, shape index: {}]   ;;  %s7478_s3 = inlined_call_operand.vmem [shape: f32[160,20], index: 3, kind: input, shape index: {}]   ;;  %s7479_s5 = inlined_call_operand.vmem [shape: f32[160,32], index: 5, kind: input, shape index: {}]   ;;  %s7480_s6 = inlined_call_operand.vmem [shape: f32[160,20], index: 6, kind: input, shape index: {}]   ;;  %s7481_s4 = inlined_call_operand.vmem [shape: f32[20,160], index: 4, kind: input, shape index: {}]   ;;  %s7482_s9 = inlined_call_operand.vmem [shape: f32[3,64,32], index: 9, kind: input, shape index: {}]   ;;  %s7483_s7 = inlined_call_operand.vmem [shape: f32[4,20], index: 7, kind: input, shape index: {}]   ;;  %s7484_s11 = inlined_call_operand.vmem [shape: f32[3,32,16], index: 11, kind: input, shape index: {}]   ;;  %s7485_s12 = inlined_call_operand.vmem [shape: f32[3,1,16], index: 12, kind: input, shape index: {}]   ;;  %s7486_s13 = inlined_call_operand.vmem [shape: f32[4,1], index: 13, kind: output, shape index: {}]  }
   0x1   :  { %v49_v0 = vld [vmem:[%s7473_s1 + $0x10] sm:$0x1]  ;;  %v48_v1 = vld [vmem:[%s7473_s1 + $0x8] sm:$0xff]  ;;  %v47_v2 = vld [vmem:[%s7473_s1] sm:$0xff]  ;;  %vm215_vm4 = vcmask 162816  }
   0x2   :  { %4221 = vmatpush.msk.msra.mxu0 %vm63_vm0, %v49_v0  ;;  %v5073_v3 = vld [vmem:[%s7474_s8 + $0x30] sm:$0xff]  ;;  %v5078_v4 = vld [vmem:[%s7474_s8 + $0x20] sm:$0xff]  ;;  %v45_v7 = vld [vmem:[%s7475_s0 + $0x8] sm:$0xff] }
   0x3   :  { %v44_v5 = vld [vmem:[%s7475_s0] sm:$0xff]  ;;  %201 = vmatpush.msra.mxu1 %v5073_v3  ;;  %v4511_v6 = vpack.i.bf16 %v5078_v4, %v5073_v3  ;;  %v46_v8 = vld [vmem:[%s7475_s0 + $0x10] sm:$0xf]  ;;  %v51_v15 = vld [vmem:[%s7476_s2 + $0x8] sm:$0xff]  ;;  %s4988_s0 = smov 64  }
   0x4   :  { %81 = vmatpush.msra.mxu0 %v48_v1  ;;  %v5096_v9 = vld [vmem:[%s7474_s8 + $0x10] sm:$0xff]  ;;  %v5102_v10 = vld [vmem:[%s7474_s8] sm:$0xff]  ;;  %v94_v31 = vld [vmem:[%s7478_s3 + $0x8] sm:$0xff] }
   0x5   :  { %202 = vmatpush.msra.mxu1 %v5078_v4  ;;  %v4516_v11 = vpack.i.bf16 %v5102_v10, %v5096_v9  ;;  %v50_v12 = vld [vmem:[%s7476_s2] sm:$0xff]  ;;  %v52_v18 = vld [vmem:[%s7476_s2 + $0x10] sm:$0xf]  ;;  %v96_v33 = vld [vmem:[%s7478_s3 + $0x18] sm:$0xff] }
   0x6   :  { %82 = vmatpush.msra.mxu0 %v47_v2  ;;  %v159_v21 = vld [vmem:[%s7477_s10] sm:$0xff]  ;;  %v95_v32 = vld [vmem:[%s7478_s3 + $0x10] sm:$0xff]  ;;  %v98_v35 = vld [vmem:[%s7478_s3 + $0x28] sm:$0xff] }
   0x7   :  { %4222 = vmatmul.msk.f32.vlgmr.msra.gmra.mxu0 %vm53_vm1, %v44_v5  ;;  %203 = vmatpush.msra.mxu1 %v5096_v9  ;;  %v178_v22 = vperm.slane %v159_v21, 0  ;;  %v93_v30 = vld [vmem:[%s7478_s3] sm:$0xff]  ;;  %v99_v36 = vld [vmem:[%s7478_s3 + $0x30] sm:$0xff]  ;;  %v100_v37 = vld [vmem:[%s7478_s3 + $0x38] sm:$0xff] }
   0x8   :  { %v97_v34 = vld [vmem:[%s7478_s3 + $0x20] sm:$0xff]  ;;  %v102_v39 = vld [vmem:[%s7478_s3 + $0x48] sm:$0xff]  ;;  %v103_v40 = vld [vmem:[%s7478_s3 + $0x50] sm:$0xff] }
   0x9   :  { %204 = vmatpush.msra.mxu1 %v5102_v10  ;;  %v101_v38 = vld [vmem:[%s7478_s3 + $0x40] sm:$0xff]  ;;  %v104_v41 = vld [vmem:[%s7478_s3 + $0x58] sm:$0xff]  ;;  %v120_v49 = vld [vmem:[%s7479_s5 + $0x8] sm:$0xff] }
   0xa   :  { %v105_v42 = vld [vmem:[%s7478_s3 + $0x60] sm:$0xff]  ;;  %v121_v52 = vld [vmem:[%s7479_s5 + $0x10] sm:$0xff]  ;;  %v106_v55 = vld [vmem:[%s7478_s3 + $0x68] sm:$0xff] }
   0xb   :  { %v119_v46 = vld [vmem:[%s7479_s5] sm:$0xff]  ;;  %v122_v56 = vld [vmem:[%s7479_s5 + $0x18] sm:$0xff]  ;;  %v107_v59 = vld [vmem:[%s7478_s3 + $0x70] sm:$0xff] }
   0xc   :  { %v123_v60 = vld [vmem:[%s7479_s5 + $0x20] sm:$0xff]  ;;  %v108_v63 = vld [vmem:[%s7478_s3 + $0x78] sm:$0xff]  ;;  %v124_v0 = vld [vmem:[%s7479_s5 + $0x28] sm:$0xff] }
   0xd   :  { %v109_v5 = vld [vmem:[%s7478_s3 + $0x80] sm:$0xff]  ;;  %v5690_v9 = vld [vmem:[%s7479_s5 + $0x58] sm:$0xff] }
   0xe   :  { %v5684_v4 = vld [vmem:[%s7479_s5 + $0x60] sm:$0xff] }
   0xf   :  { %4223 = vmatmul.msk.f32.gmra.mxu0 %vm53_vm1, %v45_v7  ;;  %v125_v7 = vld [vmem:[%s7479_s5 + $0x30] sm:$0xff] }
  0x17   :  { %4224 = vmatmul.msk.f32.gmra.mxu0 %vm53_vm1, %v46_v8 }
  0x84   :  { %v84_v13 = vpop.f32.mrf.mxu0 }
  0x85   :  { %v5110_v14 = vadd.f32 %v84_v13, %v50_v12  ;;  %v126_v13 = vld [vmem:[%s7479_s5 + $0x38] sm:$0xff] }
  0x87   :  { %4225 = vmatmul.msk.f32.vlgmr.msra.gmra.mxu1 %vm179_vm2, %v5110_v14 }
  0x8c   :  { %v87_v16 = vpop.f32.mrf.mxu0 }
  0x8d   :  { %v5117_v17 = vadd.f32 %v87_v16, %v51_v15 }
  0x8f   :  { %4226 = vmatmul.msk.f32.gmra.mxu1 %vm179_vm2, %v5117_v17 }
  0x94   :  { %v90_v19 = vpop.f32.mrf.mxu0 }
  0x95   :  { %v5124_v20 = vadd.f32 %v90_v19, %v52_v18  ;;  %v110_v18 = vld [vmem:[%s7478_s3 + $0x88] sm:$0xff]  ;;  %v127_v19 = vld [vmem:[%s7479_s5 + $0x40] sm:$0xff] }
  0x97   :  { %4227 = vmatmul.msk.f32.gmra.mxu1 %vm179_vm2, %v5124_v20 }
 0x104   :  { %v206_v23 = vpop.f32.mrf.mxu1 }
 0x105   :  { %v5131_v24 = vadd.f32 %v206_v23, %v178_v22  ;;  %v111_v23 = vld [vmem:[%s7478_s3 + $0x90] sm:$0xff] }
 0x107   :  { %379 = vrot.lane.b32.xlu1 %v5131_v24, %s4987_s17 }
 0x10c   :  { %v209_v25 = vpop.f32.mrf.mxu1 }
 0x10d   :  { %v5135_v26 = vadd.f32 %v209_v25, %v178_v22  ;;  %v128_v25 = vld [vmem:[%s7479_s5 + $0x48] sm:$0xff] }
 0x10f   :  { %v4506_v27 = vpack.i.bf16 %v5131_v24, %v5135_v26 }
 0x114   :  { %v212_v28 = vpop.f32.mrf.mxu1 }
 0x115   :  { %v5139_v29 = vadd.f32 %v212_v28, %v178_v22 }
 0x117   :  { %383 = vrot.lane.b32.xlu0 %v5139_v29, %s4987_s17  ;;  %4228 = vmatpush.msk.msra.mxu2 %vm276_vm3, %v5139_v29 }
 0x119   :  { %294 = vmatpush.msra.mxu2 %v5135_v26 }
 0x11b   :  { %295 = vmatpush.msra.mxu2 %v5131_v24 }
 0x11c   :  { %4229 = vmatmul.msk.f32.vlgmr.msra.gmra.mxu2 %vm215_vm4, %v93_v30 }
 0x11f   :  { %381 = vrot.lane.b32.xlu0 %v5135_v26, %s4987_s17 }
 0x124   :  { %4230 = vmatmul.msk.f32.gmra.mxu2 %vm215_vm4, %v94_v31  ;;  %v129_v31 = vld [vmem:[%s7479_s5 + $0x50] sm:$0xff] }
 0x12c   :  { %4231 = vmatmul.msk.f32.gmra.mxu2 %vm215_vm4, %v95_v32 }
 0x134   :  { %4232 = vmatmul.msk.f32.gmra.mxu2 %vm215_vm4, %v96_v33 }
 0x13c   :  { %4233 = vmatmul.msk.f32.gmra.mxu2 %vm215_vm4, %v97_v34  ;;  %v130_v34 = vld [vmem:[%s7479_s5 + $0x58] sm:$0xff] }
 0x144   :  { %4234 = vmatmul.msk.f32.gmra.mxu2 %vm215_vm4, %v98_v35 }
 0x14c   :  { %4235 = vmatmul.msk.f32.gmra.mxu2 %vm215_vm4, %v99_v36 }
 0x154   :  { %4236 = vmatmul.msk.f32.gmra.mxu2 %vm215_vm4, %v100_v37  ;;  %v131_v37 = vld [vmem:[%s7479_s5 + $0x60] sm:$0xff] }
 0x15c   :  { %4237 = vmatmul.msk.f32.gmra.mxu2 %vm215_vm4, %v101_v38 }
 0x164   :  { %4238 = vmatmul.msk.f32.gmra.mxu2 %vm215_vm4, %v102_v39 }
 0x16c   :  { %4239 = vmatmul.msk.f32.gmra.mxu2 %vm215_vm4, %v103_v40  ;;  %v139_v40 = vld [vmem:[%s7480_s6] sm:$0xff] }
 0x174   :  { %4240 = vmatmul.msk.f32.gmra.mxu2 %vm215_vm4, %v104_v41 }
 0x179   :  { %v380_v45 = vpop.permute.xlu1 %379 }
 0x17c   :  { %4241 = vmatmul.msk.f32.gmra.mxu2 %vm215_vm4, %v105_v42 }
 0x184   :  { %4242 = vmatmul.msk.f32.gmra.mxu2 %vm215_vm4, %v106_v55  ;;  %v112_v55 = vld [vmem:[%s7478_s3 + $0x98] sm:$0xff] }
 0x189   :  { %v384_v43 = vpop.permute.xlu0 %383 }
 0x18a   :  { %4249 = vmatpush.xpose.msk.msra.mxu3 %vm179_vm2, %v384_v43 }
 0x18c   :  { %4243 = vmatmul.msk.f32.gmra.mxu2 %vm215_vm4, %v107_v59  ;;  %v133_v59 = vld [vmem:[%s7479_s5 + $0x70] sm:$0xff] }
 0x191   :  { %v382_v44 = vpop.permute.xlu0 %381 }
 0x192   :  { %4250 = vmatpush.xpose.msk.msra.mxu3 %vm179_vm2, %v382_v44  ;;  %v140_v44 = vld [vmem:[%s7480_s6 + $0x8] sm:$0xff] }
 0x194   :  { %4244 = vmatmul.msk.f32.gmra.mxu2 %vm215_vm4, %v108_v63  ;;  %v143_v63 = vld [vmem:[%s7480_s6 + $0x20] sm:$0xff] }
 0x196   :  { %4251 = vmatpush.xpose.msk.msra.mxu3 %vm179_vm2, %v380_v45 }
 0x19c   :  { %4245 = vmatmul.msk.f32.gmra.mxu2 %vm215_vm4, %v109_v5 }
 0x19f   :  { %v297_v47 = vpop.f32.mrf.mxu2 }
 0x1a0   :  { %v357_v48 = vmul.f32 %v297_v47, %v119_v46 }
 0x1a2   :  { %4252 = vmatmul.msk.f32.vlgmr.msra.gmra.mxu3 %vm179_vm2, %v357_v48  ;;  %v141_v48 = vld [vmem:[%s7480_s6 + $0x10] sm:$0xff] }
 0x1a4   :  { %4246 = vmatmul.msk.f32.gmra.mxu2 %vm215_vm4, %v110_v18 }
 0x1a7   :  { %v300_v50 = vpop.f32.mrf.mxu2 }
 0x1a8   :  { %v358_v51 = vmul.f32 %v300_v50, %v120_v49 }
 0x1aa   :  { %4253 = vmatmul.msk.f32.gmra.mxu3 %vm179_vm2, %v358_v51  ;;  %v132_v51 = vld [vmem:[%s7479_s5 + $0x68] sm:$0xff] }
 0x1ac   :  { %4247 = vmatmul.msk.f32.gmra.mxu2 %vm215_vm4, %v111_v23 }
 0x1af   :  { %v303_v53 = vpop.f32.mrf.mxu2 }
 0x1b0   :  { %v359_v54 = vmul.f32 %v303_v53, %v121_v52 }
 0x1b2   :  { %4254 = vmatmul.msk.f32.gmra.mxu3 %vm179_vm2, %v359_v54 }
 0x1b4   :  { %4248 = vmatmul.msk.f32.gmra.mxu2 %vm215_vm4, %v112_v55  ;;  %v151_v55 = vld [vmem:[%s7480_s6 + $0x60] sm:$0xff] }
 0x1b7   :  { %v306_v57 = vpop.f32.mrf.mxu2 }
 0x1b8   :  { %v360_v58 = vmul.f32 %v306_v57, %v122_v56  ;;  %v142_v56 = vld [vmem:[%s7480_s6 + $0x18] sm:$0xff] }
 0x1ba   :  { %4255 = vmatmul.msk.f32.gmra.mxu3 %vm179_vm2, %v360_v58 }
 0x1bf   :  { %v309_v61 = vpop.f32.mrf.mxu2 }
 0x1c0   :  { %v361_v62 = vmul.f32 %v309_v61, %v123_v60 }
 0x1c2   :  { %4256 = vmatmul.msk.f32.gmra.mxu3 %vm179_vm2, %v361_v62 }
 0x1c7   :  { %v312_v1 = vpop.f32.mrf.mxu2 }
 0x1c8   :  { %v362_v2 = vmul.f32 %v312_v1, %v124_v0 }
 0x1ca   :  { %4257 = vmatmul.msk.f32.gmra.mxu3 %vm179_vm2, %v362_v2  ;;  %v134_v2 = vld [vmem:[%s7479_s5 + $0x78] sm:$0xff] }
 0x1cf   :  { %v315_v8 = vpop.f32.mrf.mxu2 }
 0x1d0   :  { %v363_v12 = vmul.f32 %v315_v8, %v125_v7 }
 0x1d2   :  { %4258 = vmatmul.msk.f32.gmra.mxu3 %vm179_vm2, %v363_v12  ;;  %v144_v12 = vld [vmem:[%s7480_s6 + $0x28] sm:$0xff] }
 0x1d7   :  { %v318_v15 = vpop.f32.mrf.mxu2 }
 0x1d8   :  { %v364_v16 = vmul.f32 %v318_v15, %v126_v13 }
 0x1da   :  { %4259 = vmatmul.msk.f32.gmra.mxu3 %vm179_vm2, %v364_v16  ;;  %v135_v16 = vld [vmem:[%s7479_s5 + $0x80] sm:$0xff] }
 0x1df   :  { %v321_v21 = vpop.f32.mrf.mxu2 }
 0x1e0   :  { %v365_v22 = vmul.f32 %v321_v21, %v127_v19 }
 0x1e2   :  { %4260 = vmatmul.msk.f32.gmra.mxu3 %vm179_vm2, %v365_v22  ;;  %v145_v22 = vld [vmem:[%s7480_s6 + $0x30] sm:$0xff] }
 0x1e7   :  { %v324_v28 = vpop.f32.mrf.mxu2 }
 0x1e8   :  { %v366_v30 = vmul.f32 %v324_v28, %v128_v25 }
 0x1ea   :  { %4261 = vmatmul.msk.f32.gmra.mxu3 %vm179_vm2, %v366_v30  ;;  %v146_v30 = vld [vmem:[%s7480_s6 + $0x38] sm:$0xff] }
 0x1ef   :  { %v327_v32 = vpop.f32.mrf.mxu2 }
 0x1f0   :  { %v367_v33 = vmul.f32 %v327_v32, %v129_v31 }
 0x1f2   :  { %4262 = vmatmul.msk.f32.gmra.mxu3 %vm179_vm2, %v367_v33  ;;  %v136_v33 = vld [vmem:[%s7479_s5 + $0x88] sm:$0xff] }
 0x1f7   :  { %v330_v35 = vpop.f32.mrf.mxu2 }
 0x1f8   :  { %v368_v36 = vmul.f32 %v330_v35, %v130_v34 }
 0x1fa   :  { %4263 = vmatmul.msk.f32.gmra.mxu3 %vm179_vm2, %v368_v36  ;;  %v147_v36 = vld [vmem:[%s7480_s6 + $0x40] sm:$0xff] }
 0x1ff   :  { %v333_v38 = vpop.f32.mrf.mxu2 }
 0x200   :  { %v369_v39 = vmul.f32 %v333_v38, %v131_v37 }
 0x202   :  { %4264 = vmatmul.msk.f32.gmra.mxu3 %vm179_vm2, %v369_v39  ;;  %v137_v39 = vld [vmem:[%s7479_s5 + $0x90] sm:$0xff] }
 0x207   :  { %v336_v52 = vpop.f32.mrf.mxu2 }
 0x208   :  { %v370_v53 = vmul.f32 %v336_v52, %v132_v51 }
 0x20a   :  { %4265 = vmatmul.msk.f32.gmra.mxu3 %vm179_vm2, %v370_v53 }
 0x20f   :  { %v339_v60 = vpop.f32.mrf.mxu2 }
 0x210   :  { %v371_v61 = vmul.f32 %v339_v60, %v133_v59 }
 0x212   :  { %4266 = vmatmul.msk.f32.gmra.mxu3 %vm179_vm2, %v371_v61 }
 0x217   :  { %v342_v5 = vpop.f32.mrf.mxu2 }
 0x218   :  { %v372_v7 = vmul.f32 %v342_v5, %v134_v2 }
 0x21a   :  { %4267 = vmatmul.msk.f32.gmra.mxu3 %vm179_vm2, %v372_v7 }
 0x21f   :  { %v345_v18 = vpop.f32.mrf.mxu2 }
 0x220   :  { %v373_v19 = vmul.f32 %v345_v18, %v135_v16 }
 0x222   :  { %4268 = vmatmul.msk.f32.gmra.mxu3 %vm179_vm2, %v373_v19 }
 0x225   :  { %v468_v41 = vpop.f32.mrf.mxu3 }
 0x226   :  { %v5283_v42 = vadd.f32 %v468_v41, %v139_v40 }
 0x227   :  { %v348_v34 = vpop.f32.mrf.mxu2 }
 0x228   :  { %v528_v43 = vsel %vm215_vm4, %v5283_v42, -inf  ;;  %v374_v35 = vmul.f32 %v348_v34, %v136_v33 }
 0x229   :  { %529 = vmax.xlane.f32.xlu1 %v528_v43 }
 0x22a   :  { %4269 = vmatmul.msk.f32.gmra.mxu3 %vm179_vm2, %v374_v35 }
 0x22d   :  { %v471_v45 = vpop.f32.mrf.mxu3 }
 0x22e   :  { %v5290_v46 = vadd.f32 %v471_v45, %v140_v44  ;;  %v148_v44 = vld [vmem:[%s7480_s6 + $0x48] sm:$0xff] }
 0x22f   :  { %v351_v40 = vpop.f32.mrf.mxu2 }
 0x230   :  { %v531_v47 = vsel %vm215_vm4, %v5290_v46, -inf  ;;  %v375_v43 = vmul.f32 %v351_v40, %v137_v39 }
 0x231   :  { %532 = vmax.xlane.f32.xlu2 %v531_v47 }
 0x232   :  { %4270 = vmatmul.msk.f32.gmra.mxu3 %vm179_vm2, %v375_v43 }
 0x235   :  { %v474_v49 = vpop.f32.mrf.mxu3 }
 0x236   :  { %v5297_v50 = vadd.f32 %v474_v49, %v141_v48  ;;  %v149_v49 = vld [vmem:[%s7480_s6 + $0x50] sm:$0xff] }
 0x237   :  { %v354_v33 = vpop.f32.mrf.mxu2 }
 0x238   :  { %v534_v54 = vsel %vm215_vm4, %v5297_v50, -inf }
 0x239   :  { %535 = vmax.xlane.f32.xlu2 %v534_v54 }
 0x23d   :  { %v477_v57 = vpop.f32.mrf.mxu3 }
 0x23e   :  { %v5312_v58 = vadd.f32 %v477_v57, %v142_v56 }
 0x240   :  { %v537_v62 = vsel %vm215_vm4, %v5312_v58, -inf }
 0x241   :  { %538 = vmax.xlane.f32.xlu0 %v537_v62 }
 0x245   :  { %v480_v0 = vpop.f32.mrf.mxu3 }
 0x246   :  { %v5323_v1 = vadd.f32 %v480_v0, %v143_v63 }
 0x248   :  { %v540_v8 = vsel %vm215_vm4, %v5323_v1, -inf }
 0x249   :  { %541 = vmax.xlane.f32.xlu2 %v540_v8 }
 0x24d   :  { %v483_v13 = vpop.f32.mrf.mxu3 }
 0x24e   :  { %v5334_v15 = vadd.f32 %v483_v13, %v144_v12 }
 0x250   :  { %v543_v21 = vsel %vm215_vm4, %v5334_v15, -inf }
 0x251   :  { %544 = vmax.xlane.f32.xlu2 %v543_v21 }
 0x255   :  { %1012 = vrot.lane.b32.xlu0 %v5139_v29, %s4988_s0  ;;  %v486_v23 = vpop.f32.mrf.mxu3 }
 0x256   :  { %v5347_v25 = vadd.f32 %v486_v23, %v145_v22 }
 0x258   :  { %v546_v28 = vsel %vm215_vm4, %v5347_v25, -inf }
 0x259   :  { %547 = vmax.xlane.f32.xlu2 %v546_v28 }
 0x25d   :  { %v489_v31 = vpop.f32.mrf.mxu3 }
 0x25e   :  { %v5354_v32 = vadd.f32 %v489_v31, %v146_v30  ;;  %v138_v31 = vld [vmem:[%s7479_s5 + $0x98] sm:$0xff] }
 0x25f   :  { %v376_v34 = vmul.f32 %v354_v33, %v138_v31 }
 0x260   :  { %v549_v29 = vsel %vm215_vm4, %v5354_v32, -inf }
 0x261   :  { %550 = vmax.xlane.f32.xlu2 %v549_v29  ;;  %4271 = vmatmul.msk.f32.gmra.mxu3 %vm179_vm2, %v376_v34 }
 0x265   :  { %v492_v37 = vpop.f32.mrf.mxu3 }
 0x266   :  { %v5365_v38 = vadd.f32 %v492_v37, %v147_v36 }
 0x268   :  { %v552_v41 = vsel %vm215_vm4, %v5365_v38, -inf }
 0x269   :  { %553 = vmax.xlane.f32.xlu2 %v552_v41 }
 0x26d   :  { %v495_v45 = vpop.f32.mrf.mxu3 }
 0x26e   :  { %v5376_v47 = vadd.f32 %v495_v45, %v148_v44 }
 0x270   :  { %v555_v48 = vsel %vm215_vm4, %v5376_v47, -inf }
 0x271   :  { %556 = vmax.xlane.f32.xlu1 %v555_v48 }
 0x275   :  { %v498_v51 = vpop.f32.mrf.mxu3 }
 0x276   :  { %v5383_v52 = vadd.f32 %v498_v51, %v149_v49  ;;  %v152_v49 = vld [vmem:[%s7480_s6 + $0x68] sm:$0xff] }
 0x278   :  { %v558_v53 = vsel %vm215_vm4, %v5383_v52, -inf }
 0x27d   :  { %v5387_v54 = vpop.f32.mrf.mxu3 }
 0x27f   :  { %559 = vmax.xlane.f32.xlu0 %v558_v53 }
 0x285   :  { %v504_v56 = vpop.f32.mrf.mxu3 }
 0x286   :  { %v5392_v57 = vadd.f32 %v504_v56, %v151_v55 }
 0x288   :  { %v564_v59 = vsel %vm215_vm4, %v5392_v57, -inf }
 0x289   :  { %565 = vmax.xlane.f32.xlu1 %v564_v59 }
 0x28d   :  { %v507_v41 = vpop.f32.mrf.mxu3 }
 0x28e   :  { %v5444_v51 = vadd.f32 %v507_v41, %v152_v49 }
 0x295   :  { %v510_v53 = vpop.f32.mrf.mxu3 }
 0x29c   :  { %v530_v60 = vpop.xlane.xlu1 %529 }
 0x29d   :  { %v588_v61 = vsub.f32 %v5283_v42, %v530_v60 }
 0x29f   :  { %v608_v62 = vmul.f32 1.442695, %v588_v61  ;;  %v153_v61 = vld [vmem:[%s7480_s6 + $0x70] sm:$0xff] }
 0x2a1   :  { %4554 = vpow2.f32 %v608_v62 }
 0x2a4   :  { %v533_v63 = vpop.xlane.xlu2 %532 }
 0x2a5   :  { %v589_v0 = vsub.f32 %v5290_v46, %v533_v63  ;;  %v5459_v63 = vadd.f32 %v510_v53, %v153_v61 }
 0x2a7   :  { %v5398_v2 = vpop.eup %4554  ;;  %v610_v5 = vmul.f32 1.442695, %v589_v0 }
 0x2a8   :  { %v648_v7 = vsel %vm215_vm4, %v5398_v2, 0.0 }
 0x2a9   :  { %4556 = vpow2.f32 %v610_v5  ;;  %649 = vadd.xlane.f32.xlu2 %v648_v7 }
 0x2ac   :  { %v536_v8 = vpop.xlane.xlu2 %535 }
 0x2ad   :  { %v590_v12 = vsub.f32 %v5297_v50, %v536_v8  ;;  %v513_v8 = vpop.f32.mrf.mxu3 }
 0x2af   :  { %v5403_v13 = vpop.eup %4556  ;;  %v612_v16 = vmul.f32 1.442695, %v590_v12  ;;  %v570_v12 = vsel %vm215_vm4, %v5459_v63, -inf }
 0x2b0   :  { %v651_v42 = vsel %vm215_vm4, %v5403_v13, 0.0 }
 0x2b1   :  { %4558 = vpow2.f32 %v612_v16  ;;  %652 = vadd.xlane.f32.xlu1 %v651_v42 }
 0x2b4   :  { %v539_v46 = vpop.xlane.xlu0 %538 }
 0x2b5   :  { %v591_v18 = vsub.f32 %v5312_v58, %v539_v46 }
 0x2b7   :  { %v5408_v19 = vpop.eup %4558  ;;  %v614_v21 = vmul.f32 1.442695, %v591_v18  ;;  %v154_v18 = vld [vmem:[%s7480_s6 + $0x78] sm:$0xff] }
 0x2b8   :  { %v654_v22 = vsel %vm215_vm4, %v5408_v19, 0.0 }
 0x2b9   :  { %4560 = vpow2.f32 %v614_v21  ;;  %655 = vadd.xlane.f32.xlu1 %v654_v22 }
 0x2bc   :  { %v542_v50 = vpop.xlane.xlu2 %541 }
 0x2bd   :  { %v592_v23 = vsub.f32 %v5323_v1, %v542_v50  ;;  %v155_v50 = vld [vmem:[%s7480_s6 + $0x80] sm:$0xff] }
 0x2bf   :  { %v5413_v28 = vpop.eup %4560  ;;  %v616_v30 = vmul.f32 1.442695, %v592_v23  ;;  %v516_v23 = vpop.f32.mrf.mxu3 }
 0x2c0   :  { %v657_v58 = vsel %vm215_vm4, %v5413_v28, 0.0  ;;  %v5487_v33 = vadd.f32 %v516_v23, %v155_v50 }
 0x2c1   :  { %4562 = vpow2.f32 %v616_v30  ;;  %4507 = vrot.lane.b32.xlu2 %v4506_v27, %s4988_s0  ;;  %658 = vadd.xlane.f32.xlu1 %v657_v58 }
 0x2c4   :  { %v545_v1 = vpop.xlane.xlu2 %544 }
 0x2c5   :  { %v593_v29 = vsub.f32 %v5334_v15, %v545_v1  ;;  %v576_v1 = vsel %vm215_vm4, %v5487_v33, -inf }
 0x2c7   :  { %v5426_v35 = vpop.eup %4562  ;;  %v618_v36 = vmul.f32 1.442695, %v593_v29  ;;  %v1013_v37 = vpop.permute.xlu0 %1012 }
 0x2c8   :  { %4272 = vmatpush.msk.msrb.mxu0 %vm276_vm3, %v1013_v37  ;;  %v660_v39 = vsel %vm215_vm4, %v5426_v35, 0.0 }
 0x2c9   :  { %4564 = vpow2.f32 %v618_v36  ;;  %661 = vadd.xlane.f32.xlu1 %v660_v39  ;;  %v5495_v39 = vpop.f32.mrf.mxu3 }
 0x2cc   :  { %v548_v40 = vpop.xlane.xlu2 %547 }
 0x2cd   :  { %v594_v24 = vsub.f32 %v5347_v25, %v548_v40 }
 0x2cf   :  { %v5432_v26 = vpop.eup %4564  ;;  %v620_v27 = vmul.f32 1.442695, %v594_v24 }
 0x2d0   :  { %v663_v15 = vsel %vm215_vm4, %v5432_v26, 0.0 }
 0x2d1   :  { %4566 = vpow2.f32 %v620_v27  ;;  %664 = vadd.xlane.f32.xlu1 %v663_v15  ;;  %v157_v27 = vld [vmem:[%s7480_s6 + $0x90] sm:$0xff]  ;;  %v522_v15 = vpop.f32.mrf.mxu3 }
 0x2d4   :  { %v551_v43 = vpop.xlane.xlu2 %550 }
 0x2d5   :  { %v595_v44 = vsub.f32 %v5354_v32, %v551_v43  ;;  %v567_v32 = vsel %vm215_vm4, %v5444_v51, -inf }
 0x2d7   :  { %v5437_v45 = vpop.eup %4566  ;;  %v622_v48 = vmul.f32 1.442695, %v595_v44 }
 0x2d8   :  { %v666_v25 = vsel %vm215_vm4, %v5437_v45, 0.0 }
 0x2d9   :  { %4568 = vpow2.f32 %v622_v48  ;;  %667 = vadd.xlane.f32.xlu1 %v666_v25 }
 0x2dc   :  { %v554_v55 = vpop.xlane.xlu2 %553 }
 0x2dd   :  { %v596_v56 = vsub.f32 %v5365_v38, %v554_v55  ;;  %v150_v38 = vld [vmem:[%s7480_s6 + $0x58] sm:$0xff] }
 0x2de   :  { %v5462_v5 = vadd.f32 %v5387_v54, %v150_v38  ;;  %v5476_v54 = vadd.f32 %v513_v8, %v154_v18 }
 0x2df   :  { %v5449_v59 = vpop.eup %4568  ;;  %v624_v60 = vmul.f32 1.442695, %v596_v56 }
 0x2e0   :  { %v669_v62 = vsel %vm215_vm4, %v5449_v59, 0.0  ;;  %v573_v22 = vsel %vm215_vm4, %v5476_v54, -inf }
 0x2e1   :  { %4570 = vpow2.f32 %v624_v60  ;;  %670 = vadd.xlane.f32.xlu0 %v669_v62  ;;  %568 = vmax.xlane.f32.xlu1 %v567_v32 }
 0x2e4   :  { %v557_v0 = vpop.xlane.xlu1 %556 }
 0x2e5   :  { %v597_v7 = vsub.f32 %v5376_v47, %v557_v0  ;;  %v561_v47 = vsel %vm215_vm4, %v5462_v5, -inf }
 0x2e7   :  { %v5467_v16 = vpop.eup %4570  ;;  %v626_v42 = vmul.f32 1.442695, %v597_v7 }
 0x2e8   :  { %v672_v46 = vsel %vm215_vm4, %v5467_v16, 0.0 }
 0x2e9   :  { %4572 = vpow2.f32 %v626_v42  ;;  %673 = vadd.xlane.f32.xlu0 %v672_v46  ;;  %571 = vmax.xlane.f32.xlu1 %v570_v12 }
 0x2ea   :  { %562 = vmax.xlane.f32.xlu2 %v561_v47 }
 0x2ef   :  { %v5478_v21 = vpop.eup %4572 }
 0x2f0   :  { %v675_v30 = vsel %vm215_vm4, %v5478_v21, 0.0 }
 0x2f1   :  { %676 = vadd.xlane.f32.xlu1 %v675_v30 }
 0x2f2   :  { %v560_v31 = vpop.xlane.xlu0 %559  ;;  %574 = vmax.xlane.f32.xlu2 %v573_v22 }
 0x2f3   :  { %v598_v58 = vsub.f32 %v5383_v52, %v560_v31 }
 0x2f5   :  { %v628_v34 = vmul.f32 1.442695, %v598_v58 }
 0x2f7   :  { %4574 = vpow2.f32 %v628_v34 }
 0x2f9   :  { %577 = vmax.xlane.f32.xlu1 %v576_v1 }
 0x2fc   :  { %v566_v29 = vpop.xlane.xlu1 %565 }
 0x2fd   :  { %v5492_v36 = vpop.eup %4574  ;;  %v600_v37 = vsub.f32 %v5392_v57, %v566_v29  ;;  %v5506_v57 = vadd.f32 %v522_v15, %v157_v27 }
 0x2fe   :  { %v678_v40 = vsel %vm215_vm4, %v5492_v36, 0.0 }
 0x2ff   :  { %v632_v24 = vmul.f32 1.442695, %v600_v37  ;;  %679 = vadd.xlane.f32.xlu0 %v678_v40  ;;  %v582_v43 = vsel %vm215_vm4, %v5506_v57, -inf }
 0x301   :  { %4576 = vpow2.f32 %v632_v24 }
 0x307   :  { %v5499_v52 = vpop.eup %4576 }
 0x308   :  { %v684_v41 = vsel %vm215_vm4, %v5499_v52, 0.0 }
 0x309   :  { %685 = vadd.xlane.f32.xlu0 %v684_v41 }
 0x311   :  { %583 = vmax.xlane.f32.xlu0 %v582_v43 }
 0x31c   :  { %v650_v44 = vpop.xlane.xlu2 %649 }
 0x31d   :  { %4578 = vrcp.f32 %v650_v44  ;;  %v719_v32 = vand.u32 2147483648, %v650_v44  ;;  %v717_v62 = vand.u32 2147483647, %v650_v44  ;;  %vm713_vm6 = vweird.f32 %v650_v44 }
 0x31f   :  { %v720_v7 = vor.u32 1.1754944e-38, %v719_v32  ;;  %vm718_vm8 = vcmp.eq.f32.partialorder %v717_v62, 8.507059e+37 }
 0x323   :  { %v4579_v48 = vpop.eup %4578 }
 0x324   :  { %v709_v49 = vmul.f32 %v4579_v48, %v650_v44  ;;  %v4508_v25 = vpop.permute.xlu2 %4507  ;;  %v653_v53 = vpop.xlane.xlu1 %652  ;;  %vm714_vm5 = vweird.f32 %v4579_v48 }
 0x325   :  { %4580 = vrcp.f32 %v653_v53  ;;  %v4509_v55 = vunpack.i.l.bf16 %v4508_v25  ;;  %v4510_v60 = vunpack.i.h.bf16 %v4508_v25  ;;  %vm715_vm7 = vmor %vm713_vm6, %vm714_vm5  ;;  %v734_v22 = vand.u32 2147483648, %v653_v53 }
 0x326   :  { %v710_v56 = vsub.f32 1.0, %v709_v49  ;;  %v732_v23 = vand.u32 2147483647, %v653_v53  ;;  %vm728_vm10 = vweird.f32 %v653_v53 }
 0x327   :  { %1092 = vmatpush.msrb.mxu0 %v4509_v55  ;;  %v735_v58 = vor.u32 1.1754944e-38, %v734_v22 }
 0x328   :  { %v711_v61 = vmul.f32 %v4579_v48, %v710_v56  ;;  %vm733_vm12 = vcmp.eq.f32.partialorder %v732_v23, 8.507059e+37 }
 0x329   :  { %1093 = vmatpush.msrb.mxu0 %v4510_v60 }
 0x32a   :  { %v712_v38 = vadd.f32 %v4579_v48, %v711_v61 }
 0x32b   :  { %v4581_v0 = vpop.eup %4580 }
 0x32c   :  { %v724_v8 = vmul.f32 %v4581_v0, %v653_v53  ;;  %v656_v12 = vpop.xlane.xlu1 %655  ;;  %v716_v42 = vsel %vm715_vm7, %v4579_v48, %v712_v38  ;;  %vm729_vm9 = vweird.f32 %v4581_v0 }
 0x32d   :  { %4582 = vrcp.f32 %v656_v12  ;;  %v721_v46 = vsel %vm718_vm8, %v720_v7, %v716_v42  ;;  %vm730_vm11 = vmor %vm728_vm10, %vm729_vm9  ;;  %v749_v24 = vand.u32 2147483648, %v656_v12  ;;  %v747_v15 = vand.u32 2147483647, %v656_v12 }
 0x32e   :  { %v725_v18 = vsub.f32 1.0, %v724_v8  ;;  %v722_v47 = vmul.f32 %v5398_v2, %v721_v46  ;;  %vm743_vm14 = vweird.f32 %v656_v12 }
 0x32f   :  { %v750_v44 = vor.u32 1.1754944e-38, %v749_v24  ;;  %vm748_vm0 = vcmp.eq.f32.partialorder %v747_v15, 8.507059e+37 }
 0x330   :  { %4273 = vmatmul.msk.f32.vlgmr.msrb.gmra.mxu0 %vm215_vm4, %v722_v47  ;;  %v726_v50 = vmul.f32 %v4581_v0, %v725_v18 }
 0x332   :  { %v727_v30 = vadd.f32 %v4581_v0, %v726_v50 }
 0x333   :  { %v4583_v31 = vpop.eup %4582 }
 0x334   :  { %v739_v34 = vmul.f32 %v4583_v31, %v656_v12  ;;  %v659_v1 = vpop.xlane.xlu1 %658  ;;  %v731_v29 = vsel %vm730_vm11, %v4581_v0, %v727_v30  ;;  %vm744_vm13 = vweird.f32 %v4583_v31 }
 0x335   :  { %4584 = vrcp.f32 %v659_v1  ;;  %v736_v37 = vsel %vm733_vm12, %v735_v58, %v731_v29  ;;  %vm745_vm15 = vmor %vm743_vm14, %vm744_vm13  ;;  %v764_v56 = vand.u32 2147483648, %v659_v1  ;;  %v762_v60 = vand.u32 2147483647, %v659_v1 }
 0x336   :  { %v740_v40 = vsub.f32 1.0, %v739_v34  ;;  %v737_v2 = vmul.f32 %v5403_v13, %v736_v37  ;;  %vm758_vm5 = vweird.f32 %v659_v1 }
 0x337   :  { %v765_v38 = vor.u32 1.1754944e-38, %v764_v56  ;;  %vm763_vm7 = vcmp.eq.f32.partialorder %v762_v60, 8.507059e+37 }
 0x338   :  { %4274 = vmatmul.msk.f32.gmra.mxu0 %vm215_vm4, %v737_v2  ;;  %v741_v27 = vmul.f32 %v4583_v31, %v740_v40 }
 0x33a   :  { %v742_v41 = vadd.f32 %v4583_v31, %v741_v27 }
 0x33b   :  { %v4585_v43 = vpop.eup %4584 }
 0x33c   :  { %v754_v48 = vmul.f32 %v4585_v43, %v659_v1  ;;  %v662_v49 = vpop.xlane.xlu1 %661  ;;  %v746_v25 = vsel %vm745_vm15, %v4583_v31, %v742_v41  ;;  %vm759_vm1 = vweird.f32 %v4585_v43 }
 0x33d   :  { %4586 = vrcp.f32 %v662_v49  ;;  %v751_v53 = vsel %vm748_vm0, %v750_v44, %v746_v25  ;;  %vm760_vm6 = vmor %vm758_vm5, %vm759_vm1  ;;  %v779_v46 = vand.u32 2147483648, %v662_v49  ;;  %v777_v47 = vand.u32 2147483647, %v662_v49 }
 0x33e   :  { %v755_v55 = vsub.f32 1.0, %v754_v48  ;;  %v752_v13 = vmul.f32 %v5408_v19, %v751_v53  ;;  %vm773_vm9 = vweird.f32 %v662_v49 }
 0x33f   :  { %v780_v23 = vor.u32 1.1754944e-38, %v779_v46  ;;  %vm778_vm11 = vcmp.eq.f32.partialorder %v777_v47, 8.507059e+37  ;;  %v158_v46 = vld [vmem:[%s7480_s6 + $0x98] sm:$0xff] }
 0x340   :  { %4275 = vmatmul.msk.f32.gmra.mxu0 %vm215_vm4, %v752_v13  ;;  %v756_v32 = vmul.f32 %v4585_v43, %v755_v55 }
 0x342   :  { %v757_v61 = vadd.f32 %v4585_v43, %v756_v32 }
 0x343   :  { %v4587_v62 = vpop.eup %4586 }
 0x344   :  { %v769_v0 = vmul.f32 %v4587_v62, %v662_v49  ;;  %v665_v7 = vpop.xlane.xlu1 %664  ;;  %v761_v8 = vsel %vm760_vm6, %v4585_v43, %v757_v61  ;;  %vm774_vm8 = vweird.f32 %v4587_v62 }
 0x345   :  { %4588 = vrcp.f32 %v665_v7  ;;  %v766_v12 = vsel %vm763_vm7, %v765_v38, %v761_v8  ;;  %vm775_vm10 = vmor %vm773_vm9, %vm774_vm8  ;;  %v794_v29 = vand.u32 2147483648, %v665_v7  ;;  %v792_v40 = vand.u32 2147483647, %v665_v7 }
 0x346   :  { %v770_v42 = vsub.f32 1.0, %v769_v0  ;;  %v767_v19 = vmul.f32 %v5413_v28, %v766_v12  ;;  %vm788_vm13 = vweird.f32 %v665_v7 }
 0x347   :  { %v795_v27 = vor.u32 1.1754944e-38, %v794_v29  ;;  %vm793_vm15 = vcmp.eq.f32.partialorder %v792_v40, 8.507059e+37 }
 0x348   :  { %v771_v18 = vmul.f32 %v4587_v62, %v770_v42  ;;  %4276 = vmatmul.msk.f32.gmra.mxu0 %vm215_vm4, %v767_v19 }
 0x34a   :  { %v772_v22 = vadd.f32 %v4587_v62, %v771_v18  ;;  %v525_v18 = vpop.f32.mrf.mxu3 }
 0x34b   :  { %v4589_v50 = vpop.eup %4588 }
 0x34c   :  { %v784_v30 = vmul.f32 %v4589_v50, %v665_v7  ;;  %v668_v31 = vpop.xlane.xlu1 %667  ;;  %v776_v58 = vsel %vm775_vm10, %v4587_v62, %v772_v22  ;;  %vm789_vm12 = vweird.f32 %v4589_v50 }
 0x34d   :  { %4590 = vrcp.f32 %v668_v31  ;;  %v781_v34 = vsel %vm778_vm11, %v780_v23, %v776_v58  ;;  %vm790_vm14 = vmor %vm788_vm13, %vm789_vm12  ;;  %v809_v53 = vand.u32 2147483648, %v668_v31  ;;  %v807_v56 = vand.u32 2147483647, %v668_v31 }
 0x34e   :  { %v785_v1 = vsub.f32 1.0, %v784_v30  ;;  %v782_v28 = vmul.f32 %v5426_v35, %v781_v34  ;;  %vm803_vm1 = vweird.f32 %v668_v31 }
 0x34f   :  { %v810_v61 = vor.u32 1.1754944e-38, %v809_v53  ;;  %vm808_vm6 = vcmp.eq.f32.partialorder %v807_v56, 8.507059e+37 }
 0x350   :  { %v786_v37 = vmul.f32 %v4589_v50, %v785_v1  ;;  %4277 = vmatmul.msk.f32.gmra.mxu0 %vm215_vm4, %v782_v28 }
 0x352   :  { %v787_v2 = vadd.f32 %v4589_v50, %v786_v37 }
 0x353   :  { %v4591_v24 = vpop.eup %4590 }
 0x354   :  { %v799_v15 = vmul.f32 %v4591_v24, %v668_v31  ;;  %v671_v41 = vpop.xlane.xlu0 %670  ;;  %v569_v43 = vpop.xlane.xlu1 %568  ;;  %v791_v44 = vsel %vm790_vm14, %v4589_v50, %v787_v2  ;;  %vm804_vm0 = vweird.f32 %v4591_v24 }
 0x355   :  { %4592 = vrcp.f32 %v671_v41  ;;  %v601_v48 = vsub.f32 %v5444_v51, %v569_v43  ;;  %v796_v35 = vsel %vm793_vm15, %v795_v27, %v791_v44  ;;  %vm805_vm5 = vmor %vm803_vm1, %vm804_vm0  ;;  %v822_v47 = vand.u32 2147483647, %v671_v41  ;;  %v156_v44 = vld [vmem:[%s7480_s6 + $0x88] sm:$0xff] }
 0x356   :  { %v800_v49 = vsub.f32 1.0, %v799_v15  ;;  %v797_v25 = vmul.f32 %v5432_v26, %v796_v35  ;;  %v824_v22 = vand.u32 2147483648, %v671_v41  ;;  %vm818_vm8 = vweird.f32 %v671_v41 }
 0x357   :  { %v634_v55 = vmul.f32 1.442695, %v601_v48  ;;  %vm823_vm10 = vcmp.eq.f32.partialorder %v822_v47, 8.507059e+37 }
 0x358   :  { %v801_v13 = vmul.f32 %v4591_v24, %v800_v49  ;;  %4278 = vmatmul.msk.f32.gmra.mxu0 %vm215_vm4, %v797_v25  ;;  %v825_v58 = vor.u32 1.1754944e-38, %v824_v22  ;;  %v5549_v25 = vadd.f32 %v5495_v39, %v156_v44 }
 0x359   :  { %4594 = vpow2.f32 %v634_v55 }
 0x35a   :  { %v802_v32 = vadd.f32 %v4591_v24, %v801_v13 }
 0x35b   :  { %v4593_v60 = vpop.eup %4592 }
 0x35c   :  { %v814_v62 = vmul.f32 %v4593_v60, %v671_v41  ;;  %v674_v38 = vpop.xlane.xlu0 %673  ;;  %v572_v51 = vpop.xlane.xlu1 %571  ;;  %v806_v0 = vsel %vm805_vm5, %v4591_v24, %v802_v32  ;;  %vm819_vm7 = vweird.f32 %v4593_v60 }
 0x35d   :  { %4596 = vrcp.f32 %v674_v38  ;;  %v563_v26 = vpop.xlane.xlu2 %562  ;;  %v811_v7 = vsel %vm808_vm6, %v810_v61, %v806_v0  ;;  %vm820_vm9 = vmor %vm818_vm8, %vm819_vm7  ;;  %v602_v15 = vsub.f32 %v5459_v63, %v572_v51  ;;  %v839_v41 = vand.u32 2147483648, %v674_v38 }
 0x35e   :  { %v815_v8 = vsub.f32 1.0, %v814_v62  ;;  %v599_v12 = vsub.f32 %v5462_v5, %v563_v26  ;;  %v812_v42 = vmul.f32 %v5437_v45, %v811_v7  ;;  %v5533_v45 = vadd.f32 %v525_v18, %v158_v46 }
 0x35f   :  { %v5525_v19 = vpop.eup %4594  ;;  %vm833_vm12 = vweird.f32 %v674_v38  ;;  %v636_v53 = vmul.f32 1.442695, %v602_v15  ;;  %v840_v55 = vor.u32 1.1754944e-38, %v839_v41 }
 0x360   :  { %v630_v50 = vmul.f32 1.442695, %v599_v12  ;;  %4279 = vmatmul.msk.f32.gmra.mxu0 %vm215_vm4, %v812_v42  ;;  %v687_v23 = vsel %vm215_vm4, %v5525_v19, 0.0  ;;  %v816_v30 = vmul.f32 %v4593_v60, %v815_v8  ;;  %v585_v27 = vsel %vm215_vm4, %v5533_v45, -inf }
 0x361   :  { %688 = vadd.xlane.f32.xlu1 %v687_v23 }
 0x362   :  { %4598 = vpow2.f32 %v630_v50  ;;  %v817_v5 = vadd.f32 %v4593_v60, %v816_v30 }
 0x363   :  { %v4597_v31 = vpop.eup %4596 }
 0x364   :  { %v829_v34 = vmul.f32 %v4597_v31, %v674_v38  ;;  %v677_v1 = vpop.xlane.xlu1 %676  ;;  %v821_v28 = vsel %vm820_vm9, %v4593_v60, %v817_v5  ;;  %vm834_vm11 = vweird.f32 %v4597_v31 }
 0x365   :  { %4600 = vrcp.f32 %v677_v1  ;;  %v575_v29 = vpop.xlane.xlu2 %574  ;;  %v826_v37 = vsel %vm823_vm10, %v825_v58, %v821_v28  ;;  %vm835_vm13 = vmor %vm833_vm12, %vm834_vm11  ;;  %v854_v51 = vand.u32 2147483648, %v677_v1  ;;  %v852_v7 = vand.u32 2147483647, %v677_v1 }
 0x366   :  { %v830_v40 = vsub.f32 1.0, %v829_v34  ;;  %v603_v2 = vsub.f32 %v5476_v54, %v575_v29  ;;  %v827_v24 = vmul.f32 %v5449_v59, %v826_v37  ;;  %v837_v54 = vand.u32 2147483647, %v674_v38 }
 0x367   :  { %v579_v38 = vsel %vm215_vm4, %v5549_v25, -inf  ;;  %vm848_vm0 = vweird.f32 %v677_v1  ;;  %v855_v42 = vor.u32 1.1754944e-38, %v854_v51  ;;  %vm853_vm5 = vcmp.eq.f32.partialorder %v852_v7, 8.507059e+37 }
 0x368   :  { %v5540_v43 = vpop.eup %4598  ;;  %v638_v48 = vmul.f32 1.442695, %v603_v2  ;;  %4280 = vmatmul.msk.f32.gmra.mxu0 %vm215_vm4, %v827_v24  ;;  %v831_v35 = vmul.f32 %v4597_v31, %v830_v40  ;;  %vm838_vm14 = vcmp.eq.f32.partialorder %v837_v54, 8.507059e+37 }
 0x369   :  { %586 = vmax.xlane.f32.xlu1 %v585_v27  ;;  %v681_v59 = vsel %vm215_vm4, %v5540_v43, 0.0 }
 0x36a   :  { %4602 = vpow2.f32 %v638_v48  ;;  %682 = vadd.xlane.f32.xlu2 %v681_v59  ;;  %v832_v63 = vadd.f32 %v4597_v31, %v831_v35 }
 0x36b   :  { %v4601_v49 = vpop.eup %4600  ;;  %4604 = vpow2.f32 %v636_v53 }
 0x36c   :  { %v844_v13 = vmul.f32 %v4601_v49, %v677_v1  ;;  %v836_v56 = vsel %vm835_vm13, %v4597_v31, %v832_v63  ;;  %v578_v32 = vpop.xlane.xlu1 %577  ;;  %vm849_vm15 = vweird.f32 %v4601_v49 }
 0x36d   :  { %v841_v60 = vsel %vm838_vm14, %v840_v55, %v836_v56  ;;  %v604_v26 = vsub.f32 %v5487_v33, %v578_v32  ;;  %vm850_vm1 = vmor %vm848_vm0, %vm849_vm15 }
 0x36e   :  { %v845_v61 = vsub.f32 1.0, %v844_v13  ;;  %v842_v62 = vmul.f32 %v5467_v16, %v841_v60 }
 0x36f   :  { %v640_v46 = vmul.f32 1.442695, %v604_v26 }
 0x370   :  { %v5554_v0 = vpop.eup %4602  ;;  %v846_v39 = vmul.f32 %v4601_v49, %v845_v61  ;;  %4281 = vmatmul.msk.f32.gmra.mxu0 %vm215_vm4, %v842_v62 }
 0x371   :  { %v693_v8 = vsel %vm215_vm4, %v5554_v0, 0.0  ;;  %v5560_v47 = vpop.eup %4604 }
 0x372   :  { %v680_v12 = vpop.xlane.xlu0 %679  ;;  %580 = vmax.xlane.f32.xlu2 %v579_v38  ;;  %694 = vadd.xlane.f32.xlu0 %v693_v8  ;;  %v847_v16 = vadd.f32 %v4601_v49, %v846_v39  ;;  %v690_v23 = vsel %vm215_vm4, %v5560_v47, 0.0 }
 0x373   :  { %4606 = vrcp.f32 %v680_v12  ;;  %v869_v58 = vand.u32 2147483648, %v680_v12  ;;  %v867_v28 = vand.u32 2147483647, %v680_v12  ;;  %vm863_vm7 = vweird.f32 %v680_v12 }
 0x374   :  { %v851_v18 = vsel %vm850_vm1, %v4601_v49, %v847_v16  ;;  %4608 = vpow2.f32 %v640_v46 }
 0x375   :  { %v856_v33 = vsel %vm853_vm5, %v855_v42, %v851_v18  ;;  %v870_v37 = vor.u32 1.1754944e-38, %v869_v58  ;;  %vm868_vm9 = vcmp.eq.f32.partialorder %v867_v28, 8.507059e+37 }
 0x376   :  { %v857_v22 = vmul.f32 %v5478_v21, %v856_v33 }
 0x378   :  { %4282 = vmatmul.msk.f32.gmra.mxu0 %vm215_vm4, %v857_v22 }
 0x379   :  { %v4607_v50 = vpop.eup %4606 }
 0x37a   :  { %v859_v30 = vmul.f32 %v4607_v50, %v680_v12  ;;  %691 = vadd.xlane.f32.xlu2 %v690_v23  ;;  %v5568_v34 = vpop.eup %4608  ;;  %vm864_vm6 = vweird.f32 %v4607_v50 }
 0x37b   :  { %v696_v21 = vsel %vm215_vm4, %v5568_v34, 0.0  ;;  %vm865_vm8 = vmor %vm863_vm7, %vm864_vm6 }
 0x37c   :  { %v860_v5 = vsub.f32 1.0, %v859_v30  ;;  %v5566_v31 = vpop.xlane.xlu0 %685 }
 0x37d   :  { %vm893_vm15 = vweird.f32 %v5566_v31 }
 0x37e   :  { %v861_v1 = vmul.f32 %v4607_v50, %v860_v5  ;;  %v897_v5 = vand.u32 2147483647, %v5566_v31 }
 0x380   :  { %v862_v29 = vadd.f32 %v4607_v50, %v861_v1  ;;  %vm898_vm1 = vcmp.eq.f32.partialorder %v897_v5, 8.507059e+37 }
 0x382   :  { %697 = vadd.xlane.f32.xlu2 %v696_v21  ;;  %v866_v40 = vsel %vm865_vm8, %v4607_v50, %v862_v29  ;;  %v899_v50 = vand.u32 2147483648, %v5566_v31 }
 0x383   :  { %v871_v2 = vsel %vm868_vm9, %v870_v37, %v866_v40 }
 0x384   :  { %v584_v24 = vpop.xlane.xlu0 %583  ;;  %v872_v27 = vmul.f32 %v5492_v36, %v871_v2  ;;  %v900_v29 = vor.u32 1.1754944e-38, %v899_v50 }
 0x385   :  { %v606_v15 = vsub.f32 %v5506_v57, %v584_v24 }
 0x386   :  { %4283 = vmatmul.msk.f32.gmra.mxu0 %vm215_vm4, %v872_v27 }
 0x387   :  { %v644_v41 = vmul.f32 1.442695, %v606_v15 }
 0x389   :  { %4610 = vpow2.f32 %v644_v41 }
 0x38a   :  { %4612 = vrcp.f32 %v5566_v31 }
 0x38f   :  { %v5575_v44 = vpop.eup %4610 }
 0x390   :  { %v702_v48 = vsel %vm215_vm4, %v5575_v44, 0.0  ;;  %v4613_v57 = vpop.eup %4612 }
 0x391   :  { %703 = vadd.xlane.f32.xlu0 %v702_v48  ;;  %v889_v49 = vmul.f32 %v4613_v57, %v5566_v31  ;;  %vm894_vm13 = vweird.f32 %v4613_v57 }
 0x392   :  { %vm895_vm0 = vmor %vm893_vm15, %vm894_vm13 }
 0x393   :  { %v890_v32 = vsub.f32 1.0, %v889_v49 }
 0x395   :  { %v891_v8 = vmul.f32 %v4613_v57, %v890_v32 }
 0x397   :  { %v892_v33 = vadd.f32 %v4613_v57, %v891_v8 }
 0x399   :  { %v896_v28 = vsel %vm895_vm0, %v4613_v57, %v892_v33 }
 0x39a   :  { %v901_v37 = vsel %vm898_vm1, %v900_v29, %v896_v28 }
 0x39b   :  { %v902_v15 = vmul.f32 %v5499_v52, %v901_v37 }
 0x3a5   :  { %4517 = vrot.lane.b32.xlu0 %v4516_v11, %s4989_s26  ;;  %v5696_v11 = vld [vmem:[%s7479_s5 + $0x50] sm:$0xff] }
 0x3d4   :  { %v5579_v35 = vpop.xlane.xlu1 %688 }
 0x3d5   :  { %v914_v24 = vand.u32 2147483648, %v5579_v35  ;;  %vm908_vm6 = vweird.f32 %v5579_v35  ;;  %v912_v41 = vand.u32 2147483647, %v5579_v35 }
 0x3d7   :  { %vm913_vm8 = vcmp.eq.f32.partialorder %v912_v41, 8.507059e+37 }
 0x3dc   :  { %v587_v54 = vpop.xlane.xlu1 %586 }
 0x3dd   :  { %v607_v59 = vsub.f32 %v5533_v45, %v587_v54  ;;  %v683_v36 = vpop.xlane.xlu2 %682 }
 0x3de   :  { %4614 = vrcp.f32 %v683_v36  ;;  %v884_v39 = vand.u32 2147483648, %v683_v36  ;;  %v882_v7 = vand.u32 2147483647, %v683_v36  ;;  %vm878_vm11 = vweird.f32 %v683_v36 }
 0x3df   :  { %v646_v63 = vmul.f32 1.442695, %v607_v59  ;;  %4616 = vrcp.f32 %v5579_v35 }
 0x3e0   :  { %v885_v42 = vor.u32 1.1754944e-38, %v884_v39  ;;  %vm883_vm14 = vcmp.eq.f32.partialorder %v882_v7, 8.507059e+37 }
 0x3e1   :  { %4618 = vpow2.f32 %v646_v63 }
 0x3e4   :  { %v4615_v53 = vpop.eup %4614 }
 0x3e5   :  { %v874_v55 = vmul.f32 %v4615_v53, %v683_v36  ;;  %v581_v13 = vpop.xlane.xlu2 %580  ;;  %v5585_v56 = vpop.eup %4616  ;;  %vm879_vm10 = vweird.f32 %v4615_v53  ;;  %v915_v36 = vor.u32 1.1754944e-38, %v914_v24 }
 0x3e6   :  { %v605_v60 = vsub.f32 %v5549_v25, %v581_v13  ;;  %v904_v26 = vmul.f32 %v5585_v56, %v5579_v35  ;;  %vm880_vm12 = vmor %vm878_vm11, %vm879_vm10  ;;  %v5594_v18 = vpop.xlane.xlu0 %694  ;;  %vm909_vm5 = vweird.f32 %v5585_v56 }
 0x3e7   :  { %v5588_v61 = vpop.eup %4618  ;;  %v875_v45 = vsub.f32 1.0, %v874_v55  ;;  %vm910_vm7 = vmor %vm908_vm6, %vm909_vm5  ;;  %v944_v39 = vand.u32 2147483648, %v5594_v18 }
 0x3e8   :  { %v642_v62 = vmul.f32 1.442695, %v605_v60  ;;  %v705_v51 = vsel %vm215_vm4, %v5588_v61, 0.0  ;;  %v905_v46 = vsub.f32 1.0, %v904_v26 }
 0x3e9   :  { %706 = vadd.xlane.f32.xlu2 %v705_v51  ;;  %v876_v38 = vmul.f32 %v4615_v53, %v875_v45 }
 0x3ea   :  { %4620 = vpow2.f32 %v642_v62  ;;  %v906_v1 = vmul.f32 %v5585_v56, %v905_v46 }
 0x3eb   :  { %v877_v12 = vadd.f32 %v4615_v53, %v876_v38 }
 0x3ec   :  { %v907_v31 = vadd.f32 %v5585_v56, %v906_v1 }
 0x3ed   :  { %v692_v25 = vpop.xlane.xlu2 %691  ;;  %v881_v16 = vsel %vm880_vm12, %v4615_v53, %v877_v12  ;;  %v945_v12 = vor.u32 1.1754944e-38, %v944_v39 }
 0x3ee   :  { %4622 = vrcp.f32 %v692_v25  ;;  %v886_v22 = vsel %vm883_vm14, %v885_v42, %v881_v16  ;;  %v911_v59 = vsel %vm910_vm7, %v5585_v56, %v907_v31  ;;  %v929_v55 = vand.u32 2147483648, %v692_v25  ;;  %v5618_v56 = vpop.f32.mrf.mxu0 }
 0x3ef   :  { %v887_v30 = vmul.f32 %v5540_v43, %v886_v22  ;;  %4624 = vrcp.f32 %v5594_v18  ;;  %v916_v57 = vsel %vm913_vm8, %v915_v36, %v911_v59  ;;  %vm923_vm10 = vweird.f32 %v692_v25 }
 0x3f0   :  { %v5597_v23 = vpop.eup %4620  ;;  %v917_v52 = vmul.f32 %v5525_v19, %v916_v57  ;;  %v927_v35 = vand.u32 2147483647, %v692_v25  ;;  %v930_v45 = vor.u32 1.1754944e-38, %v929_v55  ;;  %vm938_vm14 = vweird.f32 %v5594_v18 }
 0x3f1   :  { %v699_v58 = vsel %vm215_vm4, %v5597_v23, 0.0  ;;  %4284 = vmatmul.msk.f32.gmra.mxu0 %vm215_vm4, %v887_v30  ;;  %v942_v19 = vand.u32 2147483647, %v5594_v18 }
 0x3f2   :  { %700 = vadd.xlane.f32.xlu1 %v699_v58  ;;  %vm928_vm12 = vcmp.eq.f32.partialorder %v927_v35, 8.507059e+37 }
 0x3f3   :  { %vm943_vm0 = vcmp.eq.f32.partialorder %v942_v19, 8.507059e+37 }
 0x3f4   :  { %v4623_v21 = vpop.eup %4622 }
 0x3f5   :  { %v919_v43 = vmul.f32 %v4623_v21, %v692_v25  ;;  %v698_v40 = vpop.xlane.xlu2 %697  ;;  %v4625_v2 = vpop.eup %4624  ;;  %vm924_vm9 = vweird.f32 %v4623_v21 }
 0x3f6   :  { %4626 = vrcp.f32 %v698_v40  ;;  %v934_v48 = vmul.f32 %v4625_v2, %v5594_v18  ;;  %vm925_vm11 = vmor %vm923_vm10, %vm924_vm9  ;;  %vm939_vm13 = vweird.f32 %v4625_v2  ;;  %v5625_v42 = vpop.f32.mrf.mxu0  ;;  %v959_v46 = vand.u32 2147483648, %v698_v40 }
 0x3f7   :  { %v920_v27 = vsub.f32 1.0, %v919_v43  ;;  %vm940_vm15 = vmor %vm938_vm14, %vm939_vm13  ;;  %vm953_vm5 = vweird.f32 %v698_v40  ;;  %v957_v33 = vand.u32 2147483647, %v698_v40 }
 0x3f8   :  { %v935_v63 = vsub.f32 1.0, %v934_v48  ;;  %v960_v22 = vor.u32 1.1754944e-38, %v959_v46 }
 0x3f9   :  { %v921_v54 = vmul.f32 %v4623_v21, %v920_v27  ;;  %4285 = vmatmul.msk.f32.gmra.mxu0 %vm215_vm4, %v902_v15  ;;  %vm958_vm7 = vcmp.eq.f32.partialorder %v957_v33, 8.507059e+37 }
 0x3fa   :  { %v936_v60 = vmul.f32 %v4625_v2, %v935_v63 }
 0x3fb   :  { %v922_v49 = vadd.f32 %v4623_v21, %v921_v54 }
 0x3fc   :  { %v4627_v53 = vpop.eup %4626  ;;  %v937_v38 = vadd.f32 %v4625_v2, %v936_v60 }
 0x3fd   :  { %v949_v13 = vmul.f32 %v4627_v53, %v698_v40  ;;  %v926_v32 = vsel %vm925_vm11, %v4623_v21, %v922_v49  ;;  %vm954_vm1 = vweird.f32 %v4627_v53 }
 0x3fe   :  { %v931_v62 = vsel %vm928_vm12, %v930_v45, %v926_v32  ;;  %v941_v8 = vsel %vm940_vm15, %v4625_v2, %v937_v38  ;;  %vm955_vm6 = vmor %vm953_vm5, %vm954_vm1  ;;  %v5630_v5 = vpop.f32.mrf.mxu0 }
 0x3ff   :  { %v950_v51 = vsub.f32 1.0, %v949_v13  ;;  %v932_v26 = vmul.f32 %v5560_v47, %v931_v62  ;;  %v946_v25 = vsel %vm943_vm0, %v945_v12, %v941_v8 }
 0x400   :  { %v947_v47 = vmul.f32 %v5554_v0, %v946_v25 }
 0x401   :  { %4286 = vmatmul.msk.f32.gmra.mxu0 %vm215_vm4, %v917_v52  ;;  %v951_v7 = vmul.f32 %v4627_v53, %v950_v51 }
 0x403   :  { %v952_v16 = vadd.f32 %v4627_v53, %v951_v7 }
 0x404   :  { %v704_v43 = vpop.xlane.xlu0 %703 }
 0x405   :  { %v956_v18 = vsel %vm955_vm6, %v4627_v53, %v952_v16  ;;  %4628 = vrcp.f32 %v704_v43  ;;  %v989_v60 = vand.u32 2147483648, %v704_v43  ;;  %vm983_vm13 = vweird.f32 %v704_v43 }
 0x406   :  { %v961_v50 = vsel %vm958_vm7, %v960_v22, %v956_v18  ;;  %v5633_v58 = vpop.f32.mrf.mxu0  ;;  %v987_v38 = vand.u32 2147483647, %v704_v43  ;;  %vm1297_vm7 = vcmask 257024  }
 0x407   :  { %v962_v30 = vmul.f32 %v5568_v34, %v961_v50  ;;  %v990_v19 = vor.u32 1.1754944e-38, %v989_v60  ;;  %v5788_v60 = vld [vmem:[%s7479_s5 + $0x90] sm:$0xff] }
 0x408   :  { %vm988_vm15 = vcmp.eq.f32.partialorder %v987_v38, 8.507059e+37  ;;  %v5800_v38 = vld [vmem:[%s7479_s5 + $0x80] sm:$0xff] }
 0x409   :  { %4287 = vmatmul.msk.f32.gmra.mxu0 %vm215_vm4, %v932_v26 }
 0x40b   :  { %v4629_v34 = vpop.eup %4628  ;;  %4512 = vrot.lane.b32.xlu1 %v4511_v6, %s4989_s26 }
 0x40c   :  { %v979_v24 = vmul.f32 %v4629_v34, %v704_v43  ;;  %vm984_vm11 = vweird.f32 %v4629_v34 }
 0x40d   :  { %vm985_vm14 = vmor %vm983_vm13, %vm984_vm11 }
 0x40e   :  { %v5635_v1 = vpop.f32.mrf.mxu0  ;;  %v980_v15 = vsub.f32 1.0, %v979_v24 }
 0x410   :  { %v981_v36 = vmul.f32 %v4629_v34, %v980_v15 }
 0x411   :  { %4288 = vmatmul.msk.f32.gmra.mxu0 %vm215_vm4, %v947_v47 }
 0x412   :  { %v982_v32 = vadd.f32 %v4629_v34, %v981_v36 }
 0x414   :  { %v986_v26 = vsel %vm985_vm14, %v4629_v34, %v982_v32  ;;  %v5678_v34 = vld [vmem:[%s7479_s5 + $0x68] sm:$0xff] }
 0x415   :  { %v991_v7 = vsel %vm988_vm15, %v990_v19, %v986_v26  ;;  %v114_v26 = vld [vmem:[%s7481_s4 + $0x8] sm:$0xff]  ;;  %v116_v19 = vld [vmem:[%s7481_s4 + $0x18] sm:$0xff] }
 0x416   :  { %v5637_v28 = vpop.f32.mrf.mxu0  ;;  %v992_v16 = vmul.f32 %v5575_v44, %v991_v7  ;;  %v118_v7 = vld [vmem:[%s7481_s4 + $0x28] sm:$0xf] }
 0x419   :  { %4289 = vmatmul.msk.f32.gmra.mxu0 %vm215_vm4, %v962_v30  ;;  %v5658_v30 = vld [vmem:[%s7479_s5 + $0x78] sm:$0xff] }
 0x41e   :  { %v5639_v0 = vpop.f32.mrf.mxu0 }
 0x426   :  { %v5641_v29 = vpop.f32.mrf.mxu0 }
 0x42e   :  { %v5643_v21 = vpop.f32.mrf.mxu0 }
 0x436   :  { %v5645_v37 = vpop.f32.mrf.mxu0 }
 0x43e   :  { %v5647_v2 = vpop.f32.mrf.mxu0 }
 0x45c   :  { %v707_v40 = vpop.xlane.xlu2 %706 }
 0x45d   :  { %v1004_v12 = vand.u32 2147483648, %v707_v40  ;;  %vm998_vm1 = vweird.f32 %v707_v40  ;;  %v1002_v46 = vand.u32 2147483647, %v707_v40 }
 0x45f   :  { %v1005_v47 = vor.u32 1.1754944e-38, %v1004_v12  ;;  %vm1003_vm6 = vcmp.eq.f32.partialorder %v1002_v46, 8.507059e+37 }
 0x465   :  { %v701_v31 = vpop.xlane.xlu1 %700 }
 0x466   :  { %4630 = vrcp.f32 %v701_v31  ;;  %v974_v57 = vand.u32 2147483648, %v701_v31  ;;  %v972_v53 = vand.u32 2147483647, %v701_v31  ;;  %vm968_vm9 = vweird.f32 %v701_v31 }
 0x467   :  { %4632 = vrcp.f32 %v707_v40 }
 0x468   :  { %v975_v52 = vor.u32 1.1754944e-38, %v974_v57  ;;  %vm973_vm12 = vcmp.eq.f32.partialorder %v972_v53, 8.507059e+37  ;;  %v115_v53 = vld [vmem:[%s7481_s4 + $0x10] sm:$0xff] }
 0x46c   :  { %v4631_v27 = vpop.eup %4630 }
 0x46d   :  { %v964_v41 = vmul.f32 %v4631_v27, %v701_v31  ;;  %v4633_v48 = vpop.eup %4632  ;;  %vm969_vm8 = vweird.f32 %v4631_v27  ;;  %v5703_v31 = vld [vmem:[%s7479_s5 + $0x48] sm:$0xff] }
 0x46e   :  { %v1128_v59 = vpop.f32.mrf.mxu0  ;;  %v994_v63 = vmul.f32 %v4633_v48, %v707_v40  ;;  %vm970_vm10 = vmor %vm968_vm9, %vm969_vm8  ;;  %vm999_vm0 = vweird.f32 %v4633_v48  ;;  %v1165_v40 = vmul.f32 %v5696_v11, %v5647_v2  ;;  %v1164_v24 = vmul.f32 %v5703_v31, %v5645_v37  ;;  %v5717_v2 = vld [vmem:[%s7479_s5 + $0x38] sm:$0xff]  ;;  %v5724_v37 = vld [vmem:[%s7479_s5 + $0x30] sm:$0xff] }
 0x46f   :  { %v965_v54 = vsub.f32 1.0, %v964_v41  ;;  %vm1000_vm5 = vmor %vm998_vm1, %vm999_vm0  ;;  %v1166_v10 = vmul.f32 %v5690_v9, %v1128_v59  ;;  %v1162_v41 = vmul.f32 %v5717_v2, %v5641_v29  ;;  %v5738_v29 = vld [vmem:[%s7479_s5 + $0x20] sm:$0xff] }
 0x470   :  { %v995_v35 = vsub.f32 1.0, %v994_v63  ;;  %v1159_v59 = vmul.f32 %v5738_v29, %v5635_v1  ;;  %v5759_v1 = vld [vmem:[%s7479_s5 + $0x8] sm:$0xff] }
 0x471   :  { %v966_v49 = vmul.f32 %v4631_v27, %v965_v54  ;;  %v1156_v63 = vmul.f32 %v5759_v1, %v5625_v42  ;;  %v117_v42 = vld [vmem:[%s7481_s4 + $0x20] sm:$0xf] }
 0x472   :  { %v996_v39 = vmul.f32 %v4633_v48, %v995_v35 }
 0x473   :  { %v967_v55 = vadd.f32 %v4631_v27, %v966_v49 }
 0x474   :  { %v997_v8 = vadd.f32 %v4633_v48, %v996_v39 }
 0x475   :  { %v971_v13 = vsel %vm970_vm10, %v4631_v27, %v967_v55  ;;  %v5710_v27 = vld [vmem:[%s7479_s5 + $0x40] sm:$0xff] }
 0x476   :  { %v976_v45 = vsel %vm973_vm12, %v975_v52, %v971_v13  ;;  %v1131_v62 = vpop.f32.mrf.mxu0  ;;  %v1163_v15 = vmul.f32 %v5710_v27, %v5643_v21  ;;  %v5731_v21 = vld [vmem:[%s7479_s5 + $0x28] sm:$0xff]  ;;  %v5782_v13 = vld [vmem:[%s7479_s5 + $0x98] sm:$0xff] }
 0x477   :  { %v977_v51 = vmul.f32 %v5597_v23, %v976_v45  ;;  %v1001_v23 = vsel %vm1000_vm5, %v4633_v48, %v997_v8  ;;  %v1167_v6 = vmul.f32 %v5684_v4, %v1131_v62  ;;  %v1161_v48 = vmul.f32 %v5724_v37, %v5639_v0  ;;  %v5745_v0 = vld [vmem:[%s7479_s5 + $0x18] sm:$0xff]  ;;  %v5794_v62 = vld [vmem:[%s7479_s5 + $0x88] sm:$0xff] }
 0x478   :  { %v1006_v33 = vsel %vm1003_vm6, %v1005_v47, %v1001_v23  ;;  %v1160_v54 = vmul.f32 %v5731_v21, %v5637_v28  ;;  %v1158_v36 = vmul.f32 %v5745_v0, %v5633_v58  ;;  %v5752_v28 = vld [vmem:[%s7479_s5 + $0x10] sm:$0xff]  ;;  %v5766_v58 = vld [vmem:[%s7479_s5] sm:$0xff]  ;;  %vm1413_vm5 = vcmask 523264  }
 0x479   :  { %4290 = vmatmul.msk.f32.gmra.mxu0 %vm215_vm4, %v977_v51  ;;  %v1007_v22 = vmul.f32 %v5588_v61, %v1006_v33  ;;  %v5672_v61 = vld [vmem:[%s7479_s5 + $0x70] sm:$0xff]  ;;  %v1157_v57 = vmul.f32 %v5752_v28, %v5630_v5  ;;  %v1155_v49 = vmul.f32 %v5766_v58, %v5618_v56  ;;  %v113_v5 = vld [vmem:[%s7481_s4] sm:$0xff] }
 0x47d   :  { %v4513_v8 = vpop.permute.xlu1 %4512 }
 0x47e   :  { %v1134_v25 = vpop.f32.mrf.mxu0  ;;  %v4515_v12 = vunpack.i.h.bf16 %v4513_v8 }
 0x47f   :  { %v1168_v3 = vmul.f32 %v5678_v34, %v1134_v25  ;;  %v4514_v25 = vunpack.i.l.bf16 %v4513_v8 }
 0x481   :  { %4291 = vmatmul.msk.f32.gmra.mxu0 %vm215_vm4, %v992_v16  ;;  %v4518_v16 = vpop.permute.xlu0 %4517 }
 0x482   :  { %v4520_v46 = vunpack.i.h.bf16 %v4518_v16  ;;  %v4519_v23 = vunpack.i.l.bf16 %v4518_v16 }
 0x486   :  { %v1137_v18 = vpop.f32.mrf.mxu0 }
 0x487   :  { %v1169_v43 = vmul.f32 %v5672_v61, %v1137_v18 }
 0x489   :  { %4292 = vmatmul.msk.f32.gmra.mxu0 %vm215_vm4, %v1007_v22 }
 0x48e   :  { %v1140_v50 = vpop.f32.mrf.mxu0 }
 0x48f   :  { %v1170_v44 = vmul.f32 %v5658_v30, %v1140_v50 }
 0x491   :  { %1184 = vmatpush.msrb.mxu1 %v1170_v44 }
 0x493   :  { %1185 = vmatpush.msrb.mxu1 %v1169_v43 }
 0x495   :  { %1186 = vmatpush.msrb.mxu1 %v1168_v3 }
 0x496   :  { %v1143_v55 = vpop.f32.mrf.mxu0 }
 0x497   :  { %1187 = vmatpush.msrb.mxu1 %v1167_v6  ;;  %v1171_v39 = vmul.f32 %v5800_v38, %v1143_v55 }
 0x499   :  { %1188 = vmatpush.msrb.mxu1 %v1166_v10  ;;  %v5821_v10 = vld [vmem:[%s7477_s10] sm:$0xff] }
 0x49b   :  { %1189 = vmatpush.msrb.mxu1 %v1165_v40  ;;  %v1236_v40 = vperm.slane %v5821_v10, 1 }
 0x49d   :  { %1190 = vmatpush.msrb.mxu1 %v1164_v24 }
 0x49f   :  { %1191 = vmatpush.msrb.mxu1 %v1163_v15 }
 0x4a1   :  { %1192 = vmatpush.msrb.mxu1 %v1162_v41 }
 0x4a3   :  { %1193 = vmatpush.msrb.mxu1 %v1161_v48 }
 0x4a5   :  { %1194 = vmatpush.msrb.mxu1 %v1160_v54 }
 0x4a7   :  { %1195 = vmatpush.msrb.mxu1 %v1159_v59 }
 0x4a9   :  { %1196 = vmatpush.msrb.mxu1 %v1158_v36 }
 0x4ab   :  { %1197 = vmatpush.msrb.mxu1 %v1157_v57 }
 0x4ad   :  { %1198 = vmatpush.msrb.mxu1 %v1156_v63 }
 0x4af   :  { %1199 = vmatpush.msrb.mxu1 %v1155_v49 }
 0x4b0   :  { %1200 = vmatmul.f32.vlgmr.msrb.gmra.mxu1 %v113_v5 }
 0x4b8   :  { %1203 = vmatmul.f32.gmra.mxu1 %v115_v53 }
 0x4c0   :  { %1206 = vmatmul.f32.gmra.mxu1 %v117_v42  ;;  %v4990_v42 = vmov 32.0  }
 0x4c1   :  { %4634 = vrcp.f32 %v4990_v42 }
 0x4f6   :  { %v1146_v52 = vpop.f32.mrf.mxu0 }
 0x4f7   :  { %v1172_v51 = vmul.f32 %v5794_v62, %v1146_v52 }
 0x4fe   :  { %v1149_v35 = vpop.f32.mrf.mxu0 }
 0x4ff   :  { %v1173_v45 = vmul.f32 %v5788_v60, %v1149_v35 }
 0x506   :  { %v1152_v56 = vpop.f32.mrf.mxu0 }
 0x507   :  { %v1174_v32 = vmul.f32 %v5782_v13, %v1152_v56 }
 0x509   :  { %1222 = vmatpush.msra.mxu1 %v1174_v32 }
 0x50b   :  { %1223 = vmatpush.msra.mxu1 %v1173_v45 }
 0x50d   :  { %1224 = vmatpush.msra.mxu1 %v1172_v51 }
 0x50f   :  { %1225 = vmatpush.msra.mxu1 %v1171_v39 }
 0x510   :  { %4293 = vmatmul.msk.f32.vlgmr.msra.gmra.mxu1 %vm179_vm2, %v114_v26 }
 0x511   :  { %1274 = vmatpush.msrb.mxu1 %v4514_v25 }
 0x513   :  { %1275 = vmatpush.msrb.mxu1 %v4515_v12 }
 0x515   :  { %1276 = vmatpush.msrb.mxu1 %v4519_v23 }
 0x517   :  { %1277 = vmatpush.msrb.mxu1 %v4520_v46 }
 0x518   :  { %4294 = vmatmul.msk.f32.gmra.mxu1 %vm179_vm2, %v116_v19 }
 0x520   :  { %4295 = vmatmul.msk.f32.gmra.mxu1 %vm179_vm2, %v118_v7 }
 0x52d   :  { %v1201_v47 = vpop.f32.mrf.mxu1 }
 0x535   :  { %v1204_v33 = vpop.f32.mrf.mxu1 }
 0x53d   :  { %v1207_v18 = vpop.f32.mrf.mxu1 }
 0x58d   :  { %v1227_v22 = vpop.f32.mrf.mxu1 }
 0x58e   :  { %v1228_v50 = vadd.f32 %v1227_v22, %v1201_v47  ;;  %v165_v22 = vld [vmem:[%s7474_s8 + $0x18] sm:$0xff] }
 0x590   :  { %4296 = vmatmul.msk.f32.vlgmr.msrb.gmra.mxu1 %vm179_vm2, %v1228_v50  ;;  %v163_v50 = vld [vmem:[%s7474_s8 + $0x8] sm:$0xff] }
 0x595   :  { %v1230_v44 = vpop.f32.mrf.mxu1 }
 0x596   :  { %v1231_v43 = vadd.f32 %v1230_v44, %v1204_v33  ;;  %v169_v33 = vld [vmem:[%s7474_s8 + $0x38] sm:$0xff] }
 0x597   :  { %1395 = vmatpush.msra.mxu1 %v169_v33 }
 0x598   :  { %4297 = vmatmul.msk.f32.gmra.mxu1 %vm179_vm2, %v1231_v43 }
 0x59d   :  { %v1233_v3 = vpop.f32.mrf.mxu1 }
 0x59e   :  { %v1234_v6 = vadd.f32 %v1233_v3, %v1207_v18  ;;  %v167_v18 = vld [vmem:[%s7474_s8 + $0x28] sm:$0xff] }
 0x59f   :  { %1396 = vmatpush.msra.mxu1 %v167_v18 }
 0x5a0   :  { %4298 = vmatmul.msk.f32.gmra.mxu1 %vm179_vm2, %v1234_v6 }
 0x5a1   :  { %1397 = vmatpush.msra.mxu1 %v165_v22 }
 0x5a3   :  { %1398 = vmatpush.msra.mxu1 %v163_v50 }
 0x60d   :  { %v1279_v24 = vpop.f32.mrf.mxu1 }
 0x60e   :  { %v1280_v15 = vadd.f32 %v1279_v24, %v1236_v40 }
 0x610   :  { %v1288_v41 = vadd.f32 %v1280_v15, %v5110_v14  ;;  %v4635_v14 = vpop.eup %4634 }
 0x611   :  { %v1302_v55 = vmul.f32 32.0, %v4635_v14  ;;  %vm1306_vm8 = vweird.f32 %v4635_v14 }
 0x612   :  { %v1291_v48 = vsel %vm179_vm2, %v1288_v41, 0.0 }
 0x613   :  { %1292 = vadd.xlane.f32.xlu2 %v1291_v48  ;;  %v1303_v52 = vsub.f32 1.0, %v1302_v55  ;;  %v177_v48 = vld [vmem:[%s7482_s9 + $0x38] sm:$0xff] }
 0x614   :  { %1431 = vmatpush.msrb.mxu1 %v177_v48  ;;  %v173_v55 = vld [vmem:[%s7482_s9 + $0x18] sm:$0xff] }
 0x615   :  { %v1282_v54 = vpop.f32.mrf.mxu1  ;;  %v1304_v35 = vmul.f32 %v4635_v14, %v1303_v52 }
 0x616   :  { %v1283_v59 = vadd.f32 %v1282_v54, %v1236_v40  ;;  %v176_v54 = vld [vmem:[%s7482_s9 + $0x30] sm:$0xff] }
 0x617   :  { %v1305_v56 = vadd.f32 %v4635_v14, %v1304_v35  ;;  %1432 = vmatpush.msrb.mxu1 %v176_v54 }
 0x618   :  { %v1289_v36 = vadd.f32 %v1283_v59, %v5117_v17 }
 0x619   :  { %v5830_v17 = vsel %vm1306_vm8, %v4635_v14, %v1305_v56  ;;  %v1365_v56 = vperm.slane %v5821_v10, 2 }
 0x61a   :  { %v1294_v57 = vsel %vm179_vm2, %v1289_v36, 0.0 }
 0x61b   :  { %1295 = vadd.xlane.f32.xlu2 %v1294_v57 }
 0x61d   :  { %v1285_v63 = vpop.f32.mrf.mxu1 }
 0x61e   :  { %v1286_v49 = vadd.f32 %v1285_v63, %v1236_v40 }
 0x620   :  { %v1290_v5 = vadd.f32 %v1286_v49, %v5124_v20 }
 0x622   :  { %v1298_v53 = vsel %vm1297_vm7, %v1290_v5, 0.0 }
 0x623   :  { %1299 = vadd.xlane.f32.xlu2 %v1298_v53 }
 0x686   :  { %v1293_v32 = vpop.xlane.xlu2 %1292 }
 0x687   :  { %v1308_v45 = vmul.f32 %v5830_v17, %v1293_v32 }
 0x689   :  { %v1311_v51 = vsub.f32 %v1288_v41, %v1308_v45 }
 0x68b   :  { %v1314_v39 = vmul.f32 %v1311_v51, %v1311_v51 }
 0x68d   :  { %v1317_v20 = vsel %vm179_vm2, %v1314_v39, 0.0 }
 0x68e   :  { %1318 = vadd.xlane.f32.xlu1 %v1317_v20  ;;  %v1296_v26 = vpop.xlane.xlu2 %1295  ;;  %v1369_v20 = vperm.slane %v5821_v10, 3 }
 0x68f   :  { %v1309_v19 = vmul.f32 %v5830_v17, %v1296_v26 }
 0x691   :  { %v5835_v7 = vsub.f32 %v1289_v36, %v1309_v19  ;;  %v175_v36 = vld [vmem:[%s7482_s9 + $0x28] sm:$0xff] }
 0x692   :  { %1433 = vmatpush.msrb.mxu1 %v175_v36 }
 0x693   :  { %v1315_v8 = vmul.f32 %v5835_v7, %v5835_v7 }
 0x695   :  { %v1320_v12 = vsel %vm179_vm2, %v1315_v8, 0.0 }
 0x696   :  { %1321 = vadd.xlane.f32.xlu0 %v1320_v12  ;;  %v1300_v25 = vpop.xlane.xlu2 %1299 }
 0x697   :  { %v1310_v16 = vmul.f32 %v5830_v17, %v1300_v25 }
 0x699   :  { %v5841_v46 = vsub.f32 %v1290_v5, %v1310_v16  ;;  %v174_v5 = vld [vmem:[%s7482_s9 + $0x20] sm:$0xff] }
 0x69a   :  { %1434 = vmatpush.msrb.mxu1 %v174_v5 }
 0x69b   :  { %v1316_v23 = vmul.f32 %v5841_v46, %v5841_v46 }
 0x69c   :  { %1435 = vmatpush.msrb.mxu1 %v173_v55 }
 0x69d   :  { %v1323_v47 = vsel %vm1297_vm7, %v1316_v23, 0.0 }
 0x69e   :  { %1324 = vadd.xlane.f32.xlu2 %v1323_v47 }
 0x701   :  { %v1319_v44 = vpop.xlane.xlu1 %1318 }
 0x702   :  { %v1326_v43 = vmul.f32 %v1319_v44, %v5830_v17 }
 0x704   :  { %v1329_v3 = vadd.f32 1e-05, %v1326_v43 }
 0x706   :  { %4636 = vrsqrt.f32 %v1329_v3  ;;  %vm1338_vm10 = vweird.f32 %v1329_v3 }
 0x709   :  { %v1322_v6 = vpop.xlane.xlu0 %1321 }
 0x70a   :  { %v1327_v40 = vmul.f32 %v1322_v6, %v5830_v17 }
 0x70c   :  { %v4637_v24 = vpop.eup %4636  ;;  %v1330_v15 = vadd.f32 1e-05, %v1327_v40 }
 0x70d   :  { %v1333_v41 = vmul.f32 %v4637_v24, %v1329_v3  ;;  %vm1339_vm9 = vweird.f32 %v4637_v24 }
 0x70e   :  { %4638 = vrsqrt.f32 %v1330_v15  ;;  %vm1340_vm11 = vmor %vm1338_vm10, %vm1339_vm9  ;;  %vm1348_vm13 = vweird.f32 %v1330_v15 }
 0x70f   :  { %v1334_v59 = vmul.f32 %v4637_v24, %v1333_v41  ;;  %v170_v41 = vld [vmem:[%s7482_s9] sm:$0xff] }
 0x711   :  { %v1335_v57 = vmul.f32 0.5, %v1334_v59  ;;  %v1325_v63 = vpop.xlane.xlu2 %1324 }
 0x712   :  { %v1328_v49 = vmul.f32 %v1325_v63, %v5830_v17 }
 0x713   :  { %v1336_v53 = vsub.f32 1.5, %v1335_v57 }
 0x714   :  { %v4639_v42 = vpop.eup %4638  ;;  %v1331_v14 = vadd.f32 1e-05, %v1328_v49 }
 0x715   :  { %v1337_v52 = vmul.f32 %v4637_v24, %v1336_v53  ;;  %v1343_v35 = vmul.f32 %v4639_v42, %v1330_v15  ;;  %vm1349_vm12 = vweird.f32 %v4639_v42  ;;  %v171_v15 = vld [vmem:[%s7482_s9 + $0x8] sm:$0xff] }
 0x716   :  { %4640 = vrsqrt.f32 %v1331_v14  ;;  %vm1350_vm14 = vmor %vm1348_vm13, %vm1349_vm12  ;;  %vm1358_vm0 = vweird.f32 %v1331_v14 }
 0x717   :  { %v1341_v32 = vsel %vm1340_vm11, %v4637_v24, %v1337_v52  ;;  %v1344_v45 = vmul.f32 %v4639_v42, %v1343_v35 }
 0x718   :  { %v1362_v39 = vmul.f32 %v1341_v32, %v1311_v51 }
 0x719   :  { %v1345_v26 = vmul.f32 0.5, %v1344_v45 }
 0x71a   :  { %v1366_v19 = vmul.f32 %v1365_v56, %v1362_v39 }
 0x71b   :  { %v1346_v8 = vsub.f32 1.5, %v1345_v26 }
 0x71c   :  { %v4641_v12 = vpop.eup %4640  ;;  %v1370_v25 = vadd.f32 %v1369_v20, %v1366_v19 }
 0x71d   :  { %v1347_v16 = vmul.f32 %v4639_v42, %v1346_v8  ;;  %v1353_v23 = vmul.f32 %v4641_v12, %v1331_v14  ;;  %vm1359_vm15 = vweird.f32 %v4641_v12 }
 0x71e   :  { %4299 = vmatmul.msk.f32.vlgmr.msra.gmra.mxu1 %vm179_vm2, %v1370_v25  ;;  %vm1360_vm1 = vmor %vm1358_vm0, %vm1359_vm15 }
 0x71f   :  { %v1351_v47 = vsel %vm1350_vm14, %v4639_v42, %v1347_v16  ;;  %v1354_v33 = vmul.f32 %v4641_v12, %v1353_v23  ;;  %v1412_v42 = vperm.slane %v5821_v10, 5 }
 0x720   :  { %v1363_v18 = vmul.f32 %v1351_v47, %v5835_v7  ;;  %v172_v7 = vld [vmem:[%s7482_s9 + $0x10] sm:$0xff] }
 0x721   :  { %v1355_v22 = vmul.f32 0.5, %v1354_v33  ;;  %1436 = vmatpush.msrb.mxu1 %v172_v7  ;;  %v5919_v7 = vld [vmem:[%s7474_s8 + $0x60] sm:$0xff] }
 0x722   :  { %v1367_v51 = vmul.f32 %v1365_v56, %v1363_v18 }
 0x723   :  { %v1356_v50 = vsub.f32 1.5, %v1355_v22  ;;  %1437 = vmatpush.msrb.mxu1 %v171_v15  ;;  %v5925_v15 = vld [vmem:[%s7474_s8 + $0x50] sm:$0xff] }
 0x724   :  { %v1371_v44 = vadd.f32 %v1369_v20, %v1367_v51 }
 0x725   :  { %v1357_v43 = vmul.f32 %v4641_v12, %v1356_v50  ;;  %1438 = vmatpush.msrb.mxu1 %v170_v41  ;;  %v5931_v41 = vld [vmem:[%s7474_s8 + $0x40] sm:$0xff] }
 0x726   :  { %4300 = vmatmul.msk.f32.gmra.mxu1 %vm179_vm2, %v1371_v44 }
 0x727   :  { %v1361_v3 = vsel %vm1360_vm1, %v4641_v12, %v1357_v43 }
 0x728   :  { %v1364_v6 = vmul.f32 %v1361_v3, %v5841_v46  ;;  %v1373_v46 = vperm.slane %v5821_v10, 4 }
 0x72a   :  { %v1368_v40 = vmul.f32 %v1365_v56, %v1364_v6 }
 0x72c   :  { %v1372_v24 = vadd.f32 %v1369_v20, %v1368_v40 }
 0x72e   :  { %4301 = vmatmul.msk.f32.gmra.mxu1 %vm179_vm2, %v1372_v24 }
 0x79b   :  { %v1400_v48 = vpop.f32.mrf.mxu1 }
 0x79c   :  { %v1401_v54 = vadd.f32 %v1400_v48, %v1373_v46 }
 0x79e   :  { %v1409_v59 = vmax.f32 %v1401_v54, 0.0 }
 0x7a0   :  { %4302 = vmatmul.msk.f32.vlgmr.msrb.gmra.mxu1 %vm1413_vm5, %v1409_v59 }
 0x7a3   :  { %v1403_v36 = vpop.f32.mrf.mxu1 }
 0x7a4   :  { %v1404_v57 = vadd.f32 %v1403_v36, %v1373_v46  ;;  %v4531_v36 = vpack.i.bf16 %v5931_v41, %v5925_v15 }
 0x7a6   :  { %v1410_v63 = vmax.f32 %v1404_v57, 0.0 }
 0x7a8   :  { %4303 = vmatmul.msk.f32.gmra.mxu1 %vm1413_vm5, %v1410_v63 }
 0x7ab   :  { %v1406_v49 = vpop.f32.mrf.mxu1 }
 0x7ac   :  { %v1407_v5 = vadd.f32 %v1406_v49, %v1373_v46 }
 0x7ae   :  { %v1411_v53 = vmax.f32 %v1407_v5, 0.0 }
 0x7b0   :  { %4304 = vmatmul.msk.f32.gmra.mxu1 %vm1413_vm5, %v1411_v53 }
 0x81d   :  { %v1440_v14 = vpop.f32.mrf.mxu1 }
 0x81e   :  { %v1441_v55 = vadd.f32 %v1440_v14, %v1412_v42 }
 0x820   :  { %v1449_v52 = vadd.f32 %v1441_v55, %v1370_v25 }
 0x822   :  { %v1452_v35 = vsel %vm179_vm2, %v1449_v52, 0.0 }
 0x823   :  { %1453 = vadd.xlane.f32.xlu2 %v1452_v35 }
 0x825   :  { %v1443_v56 = vpop.f32.mrf.mxu1 }
 0x826   :  { %v1444_v32 = vadd.f32 %v1443_v56, %v1412_v42 }
 0x828   :  { %v1450_v45 = vadd.f32 %v1444_v32, %v1371_v44 }
 0x82a   :  { %v1455_v39 = vsel %vm179_vm2, %v1450_v45, 0.0 }
 0x82b   :  { %1456 = vadd.xlane.f32.xlu2 %v1455_v39 }
 0x82d   :  { %v1446_v20 = vpop.f32.mrf.mxu1 }
 0x82e   :  { %v1447_v26 = vadd.f32 %v1446_v20, %v1412_v42  ;;  %v1518_v20 = vperm.slane %v5821_v10, 6 }
 0x830   :  { %v1451_v19 = vadd.f32 %v1447_v26, %v1372_v24  ;;  %v5913_v24 = vld [vmem:[%s7474_s8 + $0x70] sm:$0xff] }
 0x831   :  { %1566 = vmatpush.msra.mxu1 %v5913_v24  ;;  %v4526_v59 = vpack.i.bf16 %v5919_v7, %v5913_v24 }
 0x832   :  { %v1458_v8 = vsel %vm1297_vm7, %v1451_v19, 0.0 }
 0x833   :  { %1459 = vadd.xlane.f32.xlu2 %v1458_v8  ;;  %1567 = vmatpush.msra.mxu1 %v5919_v7 }
 0x835   :  { %1568 = vmatpush.msra.mxu1 %v5925_v15 }
 0x837   :  { %1569 = vmatpush.msra.mxu1 %v5931_v41 }
 0x896   :  { %v1454_v12 = vpop.xlane.xlu2 %1453 }
 0x897   :  { %v1461_v16 = vmul.f32 %v1454_v12, %v5830_v17  ;;  %v1522_v12 = vperm.slane %v5821_v10, 7 }
 0x899   :  { %v1464_v23 = vsub.f32 %v1449_v52, %v1461_v16 }
 0x89b   :  { %v1467_v25 = vmul.f32 %v1464_v23, %v1464_v23 }
 0x89d   :  { %v1470_v47 = vsel %vm179_vm2, %v1467_v25, 0.0 }
 0x89e   :  { %v1457_v33 = vpop.xlane.xlu2 %1456  ;;  %1471 = vadd.xlane.f32.xlu2 %v1470_v47 }
 0x89f   :  { %v1462_v18 = vmul.f32 %v1457_v33, %v5830_v17 }
 0x8a1   :  { %v1465_v22 = vsub.f32 %v1450_v45, %v1462_v18 }
 0x8a3   :  { %v1468_v51 = vmul.f32 %v1465_v22, %v1465_v22 }
 0x8a5   :  { %v1473_v50 = vsel %vm179_vm2, %v1468_v51, 0.0 }
 0x8a6   :  { %1474 = vadd.xlane.f32.xlu1 %v1473_v50  ;;  %v1460_v44 = vpop.xlane.xlu2 %1459 }
 0x8a7   :  { %v1463_v43 = vmul.f32 %v1460_v44, %v5830_v17 }
 0x8a9   :  { %v5905_v3 = vsub.f32 %v1451_v19, %v1463_v43 }
 0x8ab   :  { %v1469_v6 = vmul.f32 %v5905_v3, %v5905_v3 }
 0x8ad   :  { %v1476_v40 = vsel %vm1297_vm7, %v1469_v6, 0.0 }
 0x8ae   :  { %1477 = vadd.xlane.f32.xlu0 %v1476_v40 }
 0x911   :  { %v1472_v46 = vpop.xlane.xlu2 %1471 }
 0x912   :  { %v1479_v48 = vmul.f32 %v1472_v46, %v5830_v17 }
 0x914   :  { %v1482_v54 = vadd.f32 1e-05, %v1479_v48 }
 0x916   :  { %4642 = vrsqrt.f32 %v1482_v54  ;;  %vm1491_vm8 = vweird.f32 %v1482_v54 }
 0x919   :  { %v1475_v57 = vpop.xlane.xlu1 %1474 }
 0x91a   :  { %v1480_v63 = vmul.f32 %v1475_v57, %v5830_v17 }
 0x91c   :  { %v4643_v49 = vpop.eup %4642  ;;  %v1483_v5 = vadd.f32 1e-05, %v1480_v63 }
 0x91d   :  { %v1486_v53 = vmul.f32 %v4643_v49, %v1482_v54  ;;  %vm1492_vm6 = vweird.f32 %v4643_v49 }
 0x91e   :  { %4644 = vrsqrt.f32 %v1483_v5  ;;  %vm1493_vm9 = vmor %vm1491_vm8, %vm1492_vm6  ;;  %vm1501_vm11 = vweird.f32 %v1483_v5 }
 0x91f   :  { %v1487_v42 = vmul.f32 %v4643_v49, %v1486_v53 }
 0x921   :  { %v1488_v14 = vmul.f32 0.5, %v1487_v42  ;;  %v1478_v55 = vpop.xlane.xlu0 %1477 }
 0x922   :  { %v1481_v52 = vmul.f32 %v1478_v55, %v5830_v17 }
 0x923   :  { %v1489_v35 = vsub.f32 1.5, %v1488_v14 }
 0x924   :  { %v4645_v56 = vpop.eup %4644  ;;  %v1484_v32 = vadd.f32 1e-05, %v1481_v52 }
 0x925   :  { %v1490_v45 = vmul.f32 %v4643_v49, %v1489_v35  ;;  %v1496_v39 = vmul.f32 %v4645_v56, %v1483_v5  ;;  %vm1502_vm10 = vweird.f32 %v4645_v56 }
 0x926   :  { %4646 = vrsqrt.f32 %v1484_v32  ;;  %vm1503_vm12 = vmor %vm1501_vm11, %vm1502_vm10  ;;  %vm1511_vm14 = vweird.f32 %v1484_v32 }
 0x927   :  { %v1494_v26 = vsel %vm1493_vm9, %v4643_v49, %v1490_v45  ;;  %v1497_v19 = vmul.f32 %v4645_v56, %v1496_v39  ;;  %v4855_v45 = vld [vmem:[%s7478_s3 + $0x10] sm:$0xff]  ;;  %v4856_v39 = vld [vmem:[%s7478_s3 + $0x18] sm:$0xff] }
 0x928   :  { %v1515_v8 = vmul.f32 %v1494_v26, %v1464_v23  ;;  %v4858_v26 = vld [vmem:[%s7478_s3 + $0x28] sm:$0xff] }
 0x929   :  { %v1498_v16 = vmul.f32 0.5, %v1497_v19  ;;  %v4859_v19 = vld [vmem:[%s7478_s3 + $0x30] sm:$0xff] }
 0x92a   :  { %v1519_v25 = vmul.f32 %v1518_v20, %v1515_v8  ;;  %v4860_v8 = vld [vmem:[%s7478_s3 + $0x38] sm:$0xff] }
 0x92b   :  { %v1499_v47 = vsub.f32 1.5, %v1498_v16  ;;  %v4862_v16 = vld [vmem:[%s7478_s3 + $0x48] sm:$0xff] }
 0x92c   :  { %v4647_v33 = vpop.eup %4646  ;;  %v5943_v18 = vadd.f32 %v1522_v12, %v1519_v25  ;;  %v4863_v25 = vld [vmem:[%s7478_s3 + $0x50] sm:$0xff] }
 0x92d   :  { %v1500_v51 = vmul.f32 %v4645_v56, %v1499_v47  ;;  %v1506_v50 = vmul.f32 %v4647_v33, %v1484_v32  ;;  %vm1512_vm13 = vweird.f32 %v4647_v33  ;;  %v4854_v32 = vld [vmem:[%s7478_s3 + $0x8] sm:$0xff] }
 0x92e   :  { %4321 = vmatmul.msk.f32.vlgmr.msra.gmra.mxu1 %vm179_vm2, %v5943_v18  ;;  %vm1513_vm15 = vmor %vm1511_vm14, %vm1512_vm13 }
 0x92f   :  { %v1504_v44 = vsel %vm1503_vm12, %v4645_v56, %v1500_v51  ;;  %v1507_v43 = vmul.f32 %v4647_v33, %v1506_v50  ;;  %v4853_v56 = vld [vmem:[%s7478_s3] sm:$0xff] }
 0x930   :  { %v1516_v6 = vmul.f32 %v1504_v44, %v1465_v22  ;;  %v160_v22 = vld [vmem:[%s7477_s10 + $0x8] sm:$0xff]  ;;  %v4865_v51 = vld [vmem:[%s7478_s3 + $0x60] sm:$0xff] }
 0x931   :  { %v1508_v23 = vmul.f32 0.5, %v1507_v43  ;;  %v1544_v5 = vperm.slane %v160_v22, 0  ;;  %v4866_v44 = vld [vmem:[%s7478_s3 + $0x68] sm:$0xff]  ;;  %v4871_v22 = vld [vmem:[%s7478_s3 + $0x90] sm:$0xff] }
 0x932   :  { %v1520_v40 = vmul.f32 %v1518_v20, %v1516_v6  ;;  %v4867_v6 = vld [vmem:[%s7478_s3 + $0x70] sm:$0xff] }
 0x933   :  { %v1509_v10 = vsub.f32 1.5, %v1508_v23  ;;  %v4868_v23 = vld [vmem:[%s7478_s3 + $0x78] sm:$0xff] }
 0x934   :  { %v5947_v46 = vadd.f32 %v1522_v12, %v1520_v40  ;;  %v4869_v40 = vld [vmem:[%s7478_s3 + $0x80] sm:$0xff] }
 0x935   :  { %v1510_v48 = vmul.f32 %v4647_v33, %v1509_v10 }
 0x936   :  { %4322 = vmatmul.msk.f32.gmra.mxu1 %vm179_vm2, %v5947_v46 }
 0x937   :  { %v1514_v54 = vsel %vm1513_vm15, %v4647_v33, %v1510_v48  ;;  %v4864_v33 = vld [vmem:[%s7478_s3 + $0x58] sm:$0xff] }
 0x938   :  { %v1517_v57 = vmul.f32 %v1514_v54, %v5905_v3  ;;  %v4870_v54 = vld [vmem:[%s7478_s3 + $0x88] sm:$0xff] }
 0x93a   :  { %v1521_v63 = vmul.f32 %v1518_v20, %v1517_v57  ;;  %v4857_v20 = vld [vmem:[%s7478_s3 + $0x20] sm:$0xff] }
 0x93c   :  { %v5952_v49 = vadd.f32 %v1522_v12, %v1521_v63  ;;  %v4861_v12 = vld [vmem:[%s7478_s3 + $0x40] sm:$0xff] }
 0x93e   :  { %4323 = vmatmul.msk.f32.gmra.mxu1 %vm179_vm2, %v5952_v49 }
 0x9ab   :  { %v1571_v53 = vpop.f32.mrf.mxu1 }
 0x9ac   :  { %v5959_v42 = vadd.f32 %v1571_v53, %v1544_v5  ;;  %v4872_v53 = vld [vmem:[%s7478_s3 + $0x98] sm:$0xff] }
 0x9ae   :  { %1682 = vrot.lane.b32.xlu0 %v5959_v42, %s4987_s17 }
 0x9b3   :  { %v1574_v14 = vpop.f32.mrf.mxu1 }
 0x9b4   :  { %v5963_v55 = vadd.f32 %v1574_v14, %v1544_v5 }
 0x9b6   :  { %1684 = vrot.lane.b32.xlu1 %v5963_v55, %s4987_s17  ;;  %v4521_v3 = vpack.i.bf16 %v5959_v42, %v5963_v55 }
 0x9bb   :  { %v1577_v52 = vpop.f32.mrf.mxu1 }
 0x9bc   :  { %v5969_v35 = vadd.f32 %v1577_v52, %v1544_v5 }
 0x9be   :  { %1686 = vrot.lane.b32.xlu2 %v5969_v35, %s4987_s17  ;;  %4324 = vmatpush.msk.msrb.mxu2 %vm276_vm3, %v5969_v35 }
 0x9c0   :  { %1597 = vmatpush.msrb.mxu2 %v5963_v55 }
 0x9c2   :  { %1598 = vmatpush.msrb.mxu2 %v5959_v42 }
 0x9c3   :  { %4325 = vmatmul.msk.f32.vlgmr.msrb.gmra.mxu2 %vm215_vm4, %v4853_v56 }
 0x9cb   :  { %4326 = vmatmul.msk.f32.gmra.mxu2 %vm215_vm4, %v4854_v32 }
 0x9d3   :  { %4327 = vmatmul.msk.f32.gmra.mxu2 %vm215_vm4, %v4855_v45 }
 0x9db   :  { %4328 = vmatmul.msk.f32.gmra.mxu2 %vm215_vm4, %v4856_v39 }
 0x9e3   :  { %4329 = vmatmul.msk.f32.gmra.mxu2 %vm215_vm4, %v4857_v20 }
 0x9eb   :  { %4330 = vmatmul.msk.f32.gmra.mxu2 %vm215_vm4, %v4858_v26 }
 0x9f3   :  { %4331 = vmatmul.msk.f32.gmra.mxu2 %vm215_vm4, %v4859_v19 }
 0x9fb   :  { %4332 = vmatmul.msk.f32.gmra.mxu2 %vm215_vm4, %v4860_v8 }
 0xa03   :  { %4333 = vmatmul.msk.f32.gmra.mxu2 %vm215_vm4, %v4861_v12 }
 0xa0b   :  { %4334 = vmatmul.msk.f32.gmra.mxu2 %vm215_vm4, %v4862_v16 }
 0xa13   :  { %4335 = vmatmul.msk.f32.gmra.mxu2 %vm215_vm4, %v4863_v25 }
 0xa18   :  { %v1687_v47 = vpop.permute.xlu2 %1686 }
 0xa19   :  { %4345 = vmatpush.xpose.msk.msrb.mxu3 %vm179_vm2, %v1687_v47 }
 0xa1b   :  { %4336 = vmatmul.msk.f32.gmra.mxu2 %vm215_vm4, %v4864_v33 }
 0xa20   :  { %v1683_v43 = vpop.permute.xlu0 %1682 }
 0xa23   :  { %4337 = vmatmul.msk.f32.gmra.mxu2 %vm215_vm4, %v4865_v51 }
 0xa28   :  { %v1685_v50 = vpop.permute.xlu1 %1684 }
 0xa29   :  { %4346 = vmatpush.xpose.msk.msrb.mxu3 %vm179_vm2, %v1685_v50 }
 0xa2b   :  { %4338 = vmatmul.msk.f32.gmra.mxu2 %vm215_vm4, %v4866_v44 }
 0xa2d   :  { %4347 = vmatpush.xpose.msk.msrb.mxu3 %vm179_vm2, %v1683_v43 }
 0xa33   :  { %4339 = vmatmul.msk.f32.gmra.mxu2 %vm215_vm4, %v4867_v6 }
 0xa3b   :  { %4340 = vmatmul.msk.f32.gmra.mxu2 %vm215_vm4, %v4868_v23 }
 0xa43   :  { %4341 = vmatmul.msk.f32.gmra.mxu2 %vm215_vm4, %v4869_v40 }
 0xa46   :  { %v1600_v10 = vpop.f32.mrf.mxu2 }
 0xa47   :  { %v1660_v48 = vmul.f32 %v5766_v58, %v1600_v10 }
 0xa49   :  { %4348 = vmatmul.msk.f32.vlgmr.msrb.gmra.mxu3 %vm179_vm2, %v1660_v48  ;;  %v4876_v48 = vld [vmem:[%s7480_s6 + $0x18] sm:$0xff] }
 0xa4b   :  { %4342 = vmatmul.msk.f32.gmra.mxu2 %vm215_vm4, %v4870_v54 }
 0xa4e   :  { %v1603_v57 = vpop.f32.mrf.mxu2 }
 0xa4f   :  { %v1661_v63 = vmul.f32 %v5759_v1, %v1603_v57 }
 0xa51   :  { %4349 = vmatmul.msk.f32.gmra.mxu3 %vm179_vm2, %v1661_v63 }
 0xa53   :  { %4343 = vmatmul.msk.f32.gmra.mxu2 %vm215_vm4, %v4871_v22 }
 0xa56   :  { %v1606_v58 = vpop.f32.mrf.mxu2 }
 0xa57   :  { %v1662_v5 = vmul.f32 %v5752_v28, %v1606_v58 }
 0xa59   :  { %4350 = vmatmul.msk.f32.gmra.mxu3 %vm179_vm2, %v1662_v5 }
 0xa5b   :  { %4344 = vmatmul.msk.f32.gmra.mxu2 %vm215_vm4, %v4872_v53 }
 0xa5e   :  { %v1609_v1 = vpop.f32.mrf.mxu2 }
 0xa5f   :  { %v1663_v14 = vmul.f32 %v5745_v0, %v1609_v1 }
 0xa61   :  { %4351 = vmatmul.msk.f32.gmra.mxu3 %vm179_vm2, %v1663_v14 }
 0xa66   :  { %v1612_v52 = vpop.f32.mrf.mxu2 }
 0xa67   :  { %v1664_v56 = vmul.f32 %v5738_v29, %v1612_v52 }
 0xa69   :  { %4352 = vmatmul.msk.f32.gmra.mxu3 %vm179_vm2, %v1664_v56 }
 0xa6e   :  { %v1615_v32 = vpop.f32.mrf.mxu2 }
 0xa6f   :  { %v1665_v28 = vmul.f32 %v5731_v21, %v1615_v32 }
 0xa71   :  { %4353 = vmatmul.msk.f32.gmra.mxu3 %vm179_vm2, %v1665_v28 }
 0xa76   :  { %v1618_v45 = vpop.f32.mrf.mxu2 }
 0xa77   :  { %v1666_v39 = vmul.f32 %v5724_v37, %v1618_v45 }
 0xa79   :  { %4354 = vmatmul.msk.f32.gmra.mxu3 %vm179_vm2, %v1666_v39 }
 0xa7e   :  { %v1621_v20 = vpop.f32.mrf.mxu2 }
 0xa7f   :  { %v1667_v0 = vmul.f32 %v5717_v2, %v1621_v20 }
 0xa81   :  { %4355 = vmatmul.msk.f32.gmra.mxu3 %vm179_vm2, %v1667_v0 }
 0xa86   :  { %v1624_v26 = vpop.f32.mrf.mxu2 }
 0xa87   :  { %v1668_v29 = vmul.f32 %v5710_v27, %v1624_v26  ;;  %v4873_v27 = vld [vmem:[%s7480_s6] sm:$0xff] }
 0xa89   :  { %4356 = vmatmul.msk.f32.gmra.mxu3 %vm179_vm2, %v1668_v29  ;;  %v4880_v29 = vld [vmem:[%s7480_s6 + $0x38] sm:$0xff] }
 0xa8e   :  { %v1627_v19 = vpop.f32.mrf.mxu2 }
 0xa8f   :  { %v1669_v21 = vmul.f32 %v5703_v31, %v1627_v19 }
 0xa91   :  { %4357 = vmatmul.msk.f32.gmra.mxu3 %vm179_vm2, %v1669_v21 }
 0xa96   :  { %v1630_v8 = vpop.f32.mrf.mxu2 }
 0xa97   :  { %v1670_v37 = vmul.f32 %v5696_v11, %v1630_v8  ;;  %v4881_v8 = vld [vmem:[%s7480_s6 + $0x40] sm:$0xff] }
 0xa99   :  { %4358 = vmatmul.msk.f32.gmra.mxu3 %vm179_vm2, %v1670_v37 }
 0xa9e   :  { %v1633_v12 = vpop.f32.mrf.mxu2 }
 0xa9f   :  { %v1671_v2 = vmul.f32 %v5690_v9, %v1633_v12  ;;  %v4874_v9 = vld [vmem:[%s7480_s6 + $0x8] sm:$0xff] }
 0xaa1   :  { %4359 = vmatmul.msk.f32.gmra.mxu3 %vm179_vm2, %v1671_v2 }
 0xaa6   :  { %v1636_v31 = vpop.f32.mrf.mxu2 }
 0xaa7   :  { %v1672_v47 = vmul.f32 %v5684_v4, %v1636_v31  ;;  %v4875_v4 = vld [vmem:[%s7480_s6 + $0x10] sm:$0xff] }
 0xaa9   :  { %4360 = vmatmul.msk.f32.gmra.mxu3 %vm179_vm2, %v1672_v47 }
 0xaae   :  { %v1639_v23 = vpop.f32.mrf.mxu2 }
 0xaaf   :  { %v1673_v40 = vmul.f32 %v5678_v34, %v1639_v23  ;;  %v4877_v34 = vld [vmem:[%s7480_s6 + $0x20] sm:$0xff] }
 0xab1   :  { %4361 = vmatmul.msk.f32.gmra.mxu3 %vm179_vm2, %v1673_v40 }
 0xab6   :  { %v1642_v63 = vpop.f32.mrf.mxu2 }
 0xab7   :  { %v1674_v22 = vmul.f32 %v5672_v61, %v1642_v63  ;;  %v4878_v61 = vld [vmem:[%s7480_s6 + $0x28] sm:$0xff] }
 0xab9   :  { %4362 = vmatmul.msk.f32.gmra.mxu3 %vm179_vm2, %v1674_v22 }
 0xabe   :  { %v1645_v1 = vpop.f32.mrf.mxu2 }
 0xabf   :  { %v1675_v14 = vmul.f32 %v5658_v30, %v1645_v1  ;;  %v4879_v30 = vld [vmem:[%s7480_s6 + $0x30] sm:$0xff] }
 0xac1   :  { %4363 = vmatmul.msk.f32.gmra.mxu3 %vm179_vm2, %v1675_v14 }
 0xac6   :  { %v1648_v28 = vpop.f32.mrf.mxu2 }
 0xac7   :  { %v1676_v45 = vmul.f32 %v5800_v38, %v1648_v28 }
 0xac9   :  { %4364 = vmatmul.msk.f32.gmra.mxu3 %vm179_vm2, %v1676_v45 }
 0xacc   :  { %v1771_v16 = vpop.f32.mrf.mxu3 }
 0xacd   :  { %v6087_v25 = vadd.f32 %v4873_v27, %v1771_v16  ;;  %v4882_v16 = vld [vmem:[%s7480_s6 + $0x48] sm:$0xff] }
 0xace   :  { %v1651_v23 = vpop.f32.mrf.mxu2 }
 0xacf   :  { %v1831_v11 = vsel %vm215_vm4, %v6087_v25, -inf  ;;  %v1677_v40 = vmul.f32 %v5794_v62, %v1651_v23 }
 0xad0   :  { %1832 = vmax.xlane.f32.xlu2 %v1831_v11 }
 0xad1   :  { %4365 = vmatmul.msk.f32.gmra.mxu3 %vm179_vm2, %v1677_v40  ;;  %v4886_v40 = vld [vmem:[%s7480_s6 + $0x68] sm:$0xff] }
 0xad4   :  { %v1774_v33 = vpop.f32.mrf.mxu3 }
 0xad5   :  { %v6096_v51 = vadd.f32 %v4874_v9, %v1774_v33 }
 0xad7   :  { %v1834_v50 = vsel %vm215_vm4, %v6096_v51, -inf }
 0xad8   :  { %1835 = vmax.xlane.f32.xlu0 %v1834_v50 }
 0xadc   :  { %v1777_v44 = vpop.f32.mrf.mxu3 }
 0xadd   :  { %v6103_v43 = vadd.f32 %v4875_v4, %v1777_v44 }
 0xadf   :  { %v1837_v6 = vsel %vm215_vm4, %v6103_v43, -inf }
 0xae0   :  { %1838 = vmax.xlane.f32.xlu1 %v1837_v6 }
 0xae4   :  { %v1780_v10 = vpop.f32.mrf.mxu3 }
 0xae5   :  { %v6112_v54 = vadd.f32 %v4876_v48, %v1780_v10 }
 0xae7   :  { %v1840_v57 = vsel %vm215_vm4, %v6112_v54, -inf }
 0xae8   :  { %1841 = vmax.xlane.f32.xlu2 %v1840_v57 }
 0xaec   :  { %v1783_v58 = vpop.f32.mrf.mxu3 }
 0xaed   :  { %v6121_v5 = vadd.f32 %v4877_v34, %v1783_v58 }
 0xaef   :  { %v1843_v53 = vsel %vm215_vm4, %v6121_v5, -inf }
 0xaf0   :  { %1844 = vmax.xlane.f32.xlu0 %v1843_v53 }
 0xaf4   :  { %v1786_v52 = vpop.f32.mrf.mxu3 }
 0xaf5   :  { %v6130_v56 = vadd.f32 %v4878_v61, %v1786_v52  ;;  %v1654_v61 = vpop.f32.mrf.mxu2 }
 0xaf6   :  { %v1678_v28 = vmul.f32 %v5788_v60, %v1654_v61  ;;  %v4884_v60 = vld [vmem:[%s7480_s6 + $0x60] sm:$0xff] }
 0xaf7   :  { %v1846_v32 = vsel %vm215_vm4, %v6130_v56, -inf }
 0xaf8   :  { %1847 = vmax.xlane.f32.xlu1 %v1846_v32  ;;  %v4883_v32 = vld [vmem:[%s7480_s6 + $0x58] sm:$0xff]  ;;  %4366 = vmatmul.msk.f32.gmra.mxu3 %vm179_vm2, %v1678_v28 }
 0xafc   :  { %v1789_v39 = vpop.f32.mrf.mxu3 }
 0xafd   :  { %v6139_v20 = vadd.f32 %v4879_v30, %v1789_v39 }
 0xaff   :  { %v1849_v0 = vsel %vm215_vm4, %v6139_v20, -inf }
 0xb00   :  { %1850 = vmax.xlane.f32.xlu2 %v1849_v0  ;;  %v1657_v0 = vpop.f32.mrf.mxu2 }
 0xb04   :  { %v1792_v26 = vpop.f32.mrf.mxu3 }
 0xb05   :  { %v6146_v19 = vadd.f32 %v4880_v29, %v1792_v26  ;;  %v1679_v29 = vmul.f32 %v5782_v13, %v1657_v0 }
 0xb07   :  { %v1852_v38 = vsel %vm215_vm4, %v6146_v19, -inf  ;;  %4367 = vmatmul.msk.f32.gmra.mxu3 %vm179_vm2, %v1679_v29 }
 0xb08   :  { %1853 = vmax.xlane.f32.xlu1 %v1852_v38 }
 0xb0c   :  { %v1795_v21 = vpop.f32.mrf.mxu3 }
 0xb0d   :  { %v6153_v37 = vadd.f32 %v4881_v8, %v1795_v21 }
 0xb0f   :  { %v1855_v12 = vsel %vm215_vm4, %v6153_v37, -inf }
 0xb10   :  { %1856 = vmax.xlane.f32.xlu0 %v1855_v12 }
 0xb14   :  { %v1798_v2 = vpop.f32.mrf.mxu3 }
 0xb15   :  { %v6160_v27 = vadd.f32 %v4882_v16, %v1798_v2 }
 0xb17   :  { %v1858_v31 = vsel %vm215_vm4, %v6160_v27, -inf }
 0xb18   :  { %1859 = vmax.xlane.f32.xlu2 %v1858_v31 }
 0xb1c   :  { %v1801_v57 = vpop.f32.mrf.mxu3 }
 0xb21   :  { %2315 = vrot.lane.b32.xlu1 %v5969_v35, %s4988_s0 }
 0xb24   :  { %v1804_v1 = vpop.f32.mrf.mxu3 }
 0xb2c   :  { %v1807_v39 = vpop.f32.mrf.mxu3 }
 0xb2d   :  { %v6210_v26 = vadd.f32 %v4884_v60, %v1807_v39 }
 0xb34   :  { %v1810_v13 = vpop.f32.mrf.mxu3 }
 0xb43   :  { %v1833_v47 = vpop.xlane.xlu2 %1832 }
 0xb44   :  { %v1891_v11 = vsub.f32 %v6087_v25, %v1833_v47 }
 0xb46   :  { %v1911_v33 = vmul.f32 1.442695, %v1891_v11 }
 0xb48   :  { %4648 = vpow2.f32 %v1911_v33 }
 0xb4b   :  { %v1836_v9 = vpop.xlane.xlu0 %1835 }
 0xb4c   :  { %v1892_v50 = vsub.f32 %v6096_v51, %v1836_v9 }
 0xb4e   :  { %v6168_v44 = vpop.eup %4648  ;;  %v1913_v4 = vmul.f32 1.442695, %v1892_v50 }
 0xb4f   :  { %v1951_v6 = vsel %vm215_vm4, %v6168_v44, 0.0 }
 0xb50   :  { %4650 = vpow2.f32 %v1913_v4  ;;  %1952 = vadd.xlane.f32.xlu0 %v1951_v6  ;;  %v4885_v6 = vld [vmem:[%s7480_s6 + $0x50] sm:$0xff] }
 0xb51   :  { %v6230_v23 = vadd.f32 %v4885_v6, %v1801_v57 }
 0xb53   :  { %v1839_v35 = vpop.xlane.xlu1 %1838 }
 0xb54   :  { %v1893_v25 = vsub.f32 %v6103_v43, %v1839_v35 }
 0xb56   :  { %v6175_v10 = vpop.eup %4650  ;;  %v1915_v48 = vmul.f32 1.442695, %v1893_v25  ;;  %v1861_v25 = vsel %vm215_vm4, %v6230_v23, -inf }
 0xb57   :  { %v1954_v51 = vsel %vm215_vm4, %v6175_v10, 0.0 }
 0xb58   :  { %4652 = vpow2.f32 %v1915_v48  ;;  %1955 = vadd.xlane.f32.xlu2 %v1954_v51 }
 0xb5b   :  { %v1842_v63 = vpop.xlane.xlu2 %1841 }
 0xb5c   :  { %v1894_v22 = vsub.f32 %v6112_v54, %v1842_v63 }
 0xb5e   :  { %v6180_v58 = vpop.eup %4652  ;;  %v1917_v62 = vmul.f32 1.442695, %v1894_v22  ;;  %v4887_v22 = vld [vmem:[%s7480_s6 + $0x70] sm:$0xff] }
 0xb5f   :  { %v1957_v34 = vsel %vm215_vm4, %v6180_v58, 0.0 }
 0xb60   :  { %4654 = vpow2.f32 %v1917_v62  ;;  %1958 = vadd.xlane.f32.xlu2 %v1957_v34 }
 0xb63   :  { %v1845_v43 = vpop.xlane.xlu0 %1844 }
 0xb64   :  { %v1895_v53 = vsub.f32 %v6121_v5, %v1845_v43  ;;  %4522 = vrot.lane.b32.xlu0 %v4521_v3, %s4988_s0  ;;  %v6196_v5 = vadd.f32 %v4883_v32, %v1804_v1 }
 0xb66   :  { %v6189_v14 = vpop.eup %4654  ;;  %v1919_v54 = vmul.f32 1.442695, %v1895_v53  ;;  %v1864_v55 = vsel %vm215_vm4, %v6196_v5, -inf }
 0xb67   :  { %v1960_v52 = vsel %vm215_vm4, %v6189_v14, 0.0 }
 0xb68   :  { %4656 = vpow2.f32 %v1919_v54  ;;  %1961 = vadd.xlane.f32.xlu2 %v1960_v52  ;;  %v4888_v52 = vld [vmem:[%s7480_s6 + $0x78] sm:$0xff] }
 0xb6b   :  { %v1848_v42 = vpop.xlane.xlu1 %1847 }
 0xb6c   :  { %v1896_v45 = vsub.f32 %v6130_v56, %v1848_v42  ;;  %v1867_v56 = vsel %vm215_vm4, %v6210_v26, -inf }
 0xb6e   :  { %v6202_v3 = vpop.eup %4656  ;;  %v1921_v38 = vmul.f32 1.442695, %v1896_v45  ;;  %v4889_v45 = vld [vmem:[%s7480_s6 + $0x80] sm:$0xff] }
 0xb6f   :  { %v1963_v30 = vsel %vm215_vm4, %v6202_v3, 0.0 }
 0xb70   :  { %1964 = vadd.xlane.f32.xlu1 %v1963_v30  ;;  %1865 = vmax.xlane.f32.xlu2 %v1864_v55  ;;  %4658 = vpow2.f32 %v1921_v38 }
 0xb73   :  { %v1851_v21 = vpop.xlane.xlu2 %1850 }
 0xb74   :  { %v1897_v8 = vsub.f32 %v6139_v20, %v1851_v21 }
 0xb76   :  { %v1923_v12 = vmul.f32 1.442695, %v1897_v8  ;;  %v6217_v2 = vpop.eup %4658 }
 0xb77   :  { %v1966_v16 = vsel %vm215_vm4, %v6217_v2, 0.0 }
 0xb78   :  { %1868 = vmax.xlane.f32.xlu2 %v1867_v56  ;;  %4660 = vpow2.f32 %v1923_v12 }
 0xb7b   :  { %v1854_v31 = vpop.xlane.xlu1 %1853 }
 0xb7c   :  { %v1898_v33 = vsub.f32 %v6146_v19, %v1854_v31  ;;  %v6235_v19 = vadd.f32 %v4886_v40, %v1810_v13 }
 0xb7e   :  { %v6221_v11 = vpop.eup %4660  ;;  %v1925_v4 = vmul.f32 1.442695, %v1898_v33  ;;  %v1870_v48 = vsel %vm215_vm4, %v6235_v19, -inf }
 0xb7f   :  { %v1969_v20 = vsel %vm215_vm4, %v6221_v11, 0.0 }
 0xb80   :  { %1967 = vadd.xlane.f32.xlu2 %v1966_v16 }
 0xb83   :  { %v1857_v47 = vpop.xlane.xlu0 %1856 }
 0xb84   :  { %v1899_v9 = vsub.f32 %v6153_v37, %v1857_v47  ;;  %v1813_v37 = vpop.f32.mrf.mxu3 }
 0xb85   :  { %v6249_v62 = vadd.f32 %v4887_v22, %v1813_v37 }
 0xb86   :  { %v1927_v50 = vmul.f32 1.442695, %v1899_v9 }
 0xb87   :  { %v1873_v54 = vsel %vm215_vm4, %v6249_v62, -inf }
 0xb88   :  { %4662 = vpow2.f32 %v1927_v50  ;;  %1970 = vadd.xlane.f32.xlu2 %v1969_v20 }
 0xb89   :  { %4664 = vpow2.f32 %v1925_v4 }
 0xb8b   :  { %v1860_v35 = vpop.xlane.xlu2 %1859 }
 0xb8c   :  { %v1900_v57 = vsub.f32 %v6160_v27, %v1860_v35  ;;  %v1816_v1 = vpop.f32.mrf.mxu3 }
 0xb8d   :  { %v6261_v61 = vadd.f32 %v4888_v52, %v1816_v1 }
 0xb8e   :  { %v6241_v51 = vpop.eup %4662  ;;  %1862 = vmax.xlane.f32.xlu0 %v1861_v25  ;;  %v1929_v43 = vmul.f32 1.442695, %v1900_v57 }
 0xb8f   :  { %v1975_v63 = vsel %vm215_vm4, %v6241_v51, 0.0  ;;  %v6251_v34 = vpop.eup %4664  ;;  %v1876_v32 = vsel %vm215_vm4, %v6261_v61, -inf }
 0xb90   :  { %1976 = vadd.xlane.f32.xlu1 %v1975_v63  ;;  %1871 = vmax.xlane.f32.xlu2 %v1870_v48  ;;  %v1972_v27 = vsel %vm215_vm4, %v6251_v34, 0.0  ;;  %4666 = vpow2.f32 %v1929_v43 }
 0xb93   :  { %v2316_v53 = vpop.permute.xlu1 %2315 }
 0xb94   :  { %4368 = vmatpush.msk.msrb.mxu1 %vm276_vm3, %v2316_v53  ;;  %v1819_v42 = vpop.f32.mrf.mxu3 }
 0xb95   :  { %v6272_v39 = vadd.f32 %v4889_v45, %v1819_v42 }
 0xb96   :  { %1973 = vadd.xlane.f32.xlu0 %v1972_v27  ;;  %v6265_v28 = vpop.eup %4666 }
 0xb97   :  { %v1978_v55 = vsel %vm215_vm4, %v6265_v28, 0.0  ;;  %v1879_v30 = vsel %vm215_vm4, %v6272_v39, -inf }
 0xb98   :  { %1874 = vmax.xlane.f32.xlu2 %v1873_v54 }
 0xb9e   :  { %1877 = vmax.xlane.f32.xlu0 %v1876_v32 }
 0xba0   :  { %1979 = vadd.xlane.f32.xlu2 %v1978_v55 }
 0xba8   :  { %1880 = vmax.xlane.f32.xlu2 %v1879_v30 }
 0xbc3   :  { %v1953_v0 = vpop.xlane.xlu0 %1952 }
 0xbc4   :  { %4668 = vrcp.f32 %v1953_v0  ;;  %v2022_v12 = vand.u32 2147483648, %v1953_v0  ;;  %vm2016_vm1 = vweird.f32 %v1953_v0  ;;  %v2020_v13 = vand.u32 2147483647, %v1953_v0 }
 0xbc6   :  { %v2023_v9 = vor.u32 1.1754944e-38, %v2022_v12  ;;  %vm2021_vm8 = vcmp.eq.f32.partialorder %v2020_v13, 8.507059e+37 }
 0xbca   :  { %v4669_v60 = vpop.eup %4668 }
 0xbcb   :  { %v2012_v29 = vmul.f32 %v4669_v60, %v1953_v0  ;;  %v1956_v38 = vpop.xlane.xlu2 %1955  ;;  %vm2017_vm0 = vweird.f32 %v4669_v60 }
 0xbcc   :  { %4670 = vrcp.f32 %v1956_v38  ;;  %vm2018_vm6 = vmor %vm2016_vm1, %vm2017_vm0  ;;  %v2037_v37 = vand.u32 2147483648, %v1956_v38  ;;  %vm2031_vm10 = vweird.f32 %v1956_v38  ;;  %v2035_v63 = vand.u32 2147483647, %v1956_v38 }
 0xbcd   :  { %v2013_v21 = vsub.f32 1.0, %v2012_v29 }
 0xbce   :  { %v2038_v1 = vor.u32 1.1754944e-38, %v2037_v37  ;;  %vm2036_vm12 = vcmp.eq.f32.partialorder %v2035_v63, 8.507059e+37  ;;  %v1822_v37 = vpop.f32.mrf.mxu3  ;;  %v4890_v63 = vld [vmem:[%s7480_s6 + $0x88] sm:$0xff] }
 0xbcf   :  { %v2014_v56 = vmul.f32 %v4669_v60, %v2013_v21 }
 0xbd1   :  { %v2015_v8 = vadd.f32 %v4669_v60, %v2014_v56 }
 0xbd2   :  { %v4671_v16 = vpop.eup %4670 }
 0xbd3   :  { %v2027_v31 = vmul.f32 %v4671_v16, %v1956_v38  ;;  %v1959_v47 = vpop.xlane.xlu2 %1958  ;;  %v2019_v33 = vsel %vm2018_vm6, %v4669_v60, %v2015_v8  ;;  %vm2032_vm9 = vweird.f32 %v4671_v16 }
 0xbd4   :  { %4672 = vrcp.f32 %v1959_v47  ;;  %v2024_v4 = vsel %vm2021_vm8, %v2023_v9, %v2019_v33  ;;  %vm2033_vm11 = vmor %vm2031_vm10, %vm2032_vm9  ;;  %v2052_v32 = vand.u32 2147483648, %v1959_v47  ;;  %vm2046_vm14 = vweird.f32 %v1959_v47 }
 0xbd5   :  { %v2028_v50 = vsub.f32 1.0, %v2027_v31  ;;  %v2025_v57 = vmul.f32 %v6168_v44, %v2024_v4  ;;  %v2050_v45 = vand.u32 2147483647, %v1959_v47 }
 0xbd6   :  { %v4523_v20 = vpop.permute.xlu0 %4522  ;;  %v2053_v38 = vor.u32 1.1754944e-38, %v2052_v32 }
 0xbd7   :  { %v2029_v6 = vmul.f32 %v4671_v16, %v2028_v50  ;;  %v4524_v40 = vunpack.i.l.bf16 %v4523_v20  ;;  %v4525_v35 = vunpack.i.h.bf16 %v4523_v20  ;;  %vm2051_vm0 = vcmp.eq.f32.partialorder %v2050_v45, 8.507059e+37 }
 0xbd9   :  { %2395 = vmatpush.msrb.mxu1 %v4524_v40  ;;  %v2030_v25 = vadd.f32 %v4671_v16, %v2029_v6 }
 0xbda   :  { %v4673_v48 = vpop.eup %4672 }
 0xbdb   :  { %v2042_v22 = vmul.f32 %v4673_v48, %v1959_v47  ;;  %2396 = vmatpush.msrb.mxu1 %v4525_v35  ;;  %v1962_v43 = vpop.xlane.xlu2 %1961  ;;  %v2034_v53 = vsel %vm2033_vm11, %v4671_v16, %v2030_v25  ;;  %vm2047_vm13 = vweird.f32 %v4673_v48 }
 0xbdc   :  { %4674 = vrcp.f32 %v1962_v43  ;;  %4369 = vmatmul.msk.f32.vlgmr.msrb.gmra.mxu1 %vm215_vm4, %v2025_v57  ;;  %v2039_v52 = vsel %vm2036_vm12, %v2038_v1, %v2034_v53  ;;  %vm2048_vm15 = vmor %vm2046_vm14, %vm2047_vm13  ;;  %vm2061_vm6 = vweird.f32 %v1962_v43  ;;  %v2065_v47 = vand.u32 2147483647, %v1962_v43 }
 0xbdd   :  { %v2043_v27 = vsub.f32 1.0, %v2042_v22  ;;  %v2040_v44 = vmul.f32 %v6175_v10, %v2039_v52  ;;  %v2067_v10 = vand.u32 2147483648, %v1962_v43  ;;  %v6290_v22 = vadd.f32 %v4890_v63, %v1822_v37 }
 0xbde   :  { %vm2066_vm9 = vcmp.eq.f32.partialorder %v2065_v47, 8.507059e+37 }
 0xbdf   :  { %v2044_v54 = vmul.f32 %v4673_v48, %v2043_v27 }
 0xbe1   :  { %v2045_v42 = vadd.f32 %v4673_v48, %v2044_v54  ;;  %v1882_v54 = vsel %vm215_vm4, %v6290_v22, -inf }
 0xbe2   :  { %v4675_v55 = vpop.eup %4674 }
 0xbe3   :  { %v2057_v30 = vmul.f32 %v4675_v55, %v1962_v43  ;;  %v1965_v0 = vpop.xlane.xlu1 %1964  ;;  %v1866_v60 = vpop.xlane.xlu2 %1865  ;;  %v2049_v29 = vsel %vm2048_vm15, %v4673_v48, %v2045_v42  ;;  %vm2062_vm1 = vweird.f32 %v4675_v55 }
 0xbe4   :  { %4676 = vrcp.f32 %v1965_v0  ;;  %4370 = vmatmul.msk.f32.gmra.mxu1 %vm215_vm4, %v2040_v44  ;;  %v1902_v56 = vsub.f32 %v6196_v5, %v1866_v60  ;;  %v2054_v16 = vsel %vm2051_vm0, %v2053_v38, %v2049_v29  ;;  %vm2063_vm8 = vmor %vm2061_vm6, %vm2062_vm1  ;;  %v2068_v5 = vor.u32 1.1754944e-38, %v2067_v10 }
 0xbe5   :  { %v2058_v21 = vsub.f32 1.0, %v2057_v30  ;;  %v2055_v33 = vmul.f32 %v6180_v58, %v2054_v16  ;;  %v2082_v58 = vand.u32 2147483648, %v1965_v0  ;;  %vm2076_vm11 = vweird.f32 %v1965_v0 }
 0xbe6   :  { %v1933_v12 = vmul.f32 1.442695, %v1902_v56  ;;  %v2080_v57 = vand.u32 2147483647, %v1965_v0 }
 0xbe7   :  { %v2059_v8 = vmul.f32 %v4675_v55, %v2058_v21  ;;  %v2083_v27 = vor.u32 1.1754944e-38, %v2082_v58 }
 0xbe8   :  { %4678 = vpow2.f32 %v1933_v12  ;;  %vm2081_vm13 = vcmp.eq.f32.partialorder %v2080_v57, 8.507059e+37 }
 0xbe9   :  { %v2060_v13 = vadd.f32 %v4675_v55, %v2059_v8 }
 0xbea   :  { %v4677_v31 = vpop.eup %4676 }
 0xbeb   :  { %v2072_v9 = vmul.f32 %v4677_v31, %v1965_v0  ;;  %v1869_v50 = vpop.xlane.xlu2 %1868  ;;  %v2064_v20 = vsel %vm2063_vm8, %v4675_v55, %v2060_v13  ;;  %vm2077_vm10 = vweird.f32 %v4677_v31 }
 0xbec   :  { %4371 = vmatmul.msk.f32.gmra.mxu1 %vm215_vm4, %v2055_v33  ;;  %v2069_v35 = vsel %vm2066_vm9, %v2068_v5, %v2064_v20  ;;  %vm2078_vm12 = vmor %vm2076_vm11, %vm2077_vm10  ;;  %v1903_v21 = vsub.f32 %v6210_v26, %v1869_v50 }
 0xbed   :  { %v2073_v4 = vsub.f32 1.0, %v2072_v9  ;;  %v2070_v43 = vmul.f32 %v6189_v14, %v2069_v35  ;;  %v1825_v9 = vpop.f32.mrf.mxu3 }
 0xbee   :  { %v6283_v6 = vpop.eup %4678  ;;  %v1935_v20 = vmul.f32 1.442695, %v1903_v21 }
 0xbef   :  { %v2074_v40 = vmul.f32 %v4677_v31, %v2073_v4  ;;  %v1984_v25 = vsel %vm215_vm4, %v6283_v6, 0.0 }
 0xbf0   :  { %1985 = vadd.xlane.f32.xlu0 %v1984_v25 }
 0xbf1   :  { %v2075_v48 = vadd.f32 %v4677_v31, %v2074_v40 }
 0xbf3   :  { %v1968_v53 = vpop.xlane.xlu2 %1967  ;;  %v2079_v1 = vsel %vm2078_vm12, %v4677_v31, %v2075_v48 }
 0xbf4   :  { %4680 = vrcp.f32 %v1968_v53  ;;  %4372 = vmatmul.msk.f32.gmra.mxu1 %vm215_vm4, %v2070_v43  ;;  %v2084_v52 = vsel %vm2081_vm13, %v2083_v27, %v2079_v1  ;;  %v2097_v30 = vand.u32 2147483648, %v1968_v53  ;;  %v2095_v0 = vand.u32 2147483647, %v1968_v53 }
 0xbf5   :  { %v2085_v42 = vmul.f32 %v6202_v3, %v2084_v52  ;;  %vm2091_vm15 = vweird.f32 %v1968_v53 }
 0xbf6   :  { %v2098_v3 = vor.u32 1.1754944e-38, %v2097_v30  ;;  %vm2096_vm1 = vcmp.eq.f32.partialorder %v2095_v0, 8.507059e+37 }
 0xbf8   :  { %1883 = vmax.xlane.f32.xlu0 %v1882_v54  ;;  %v1828_v54 = vpop.f32.mrf.mxu3 }
 0xbfa   :  { %v4681_v32 = vpop.eup %4680 }
 0xbfb   :  { %v2087_v55 = vmul.f32 %v4681_v32, %v1968_v53  ;;  %v1971_v44 = vpop.xlane.xlu2 %1970  ;;  %vm2092_vm14 = vweird.f32 %v4681_v32 }
 0xbfc   :  { %4682 = vrcp.f32 %v1971_v44  ;;  %4373 = vmatmul.msk.f32.gmra.mxu1 %vm215_vm4, %v2085_v42  ;;  %vm2093_vm0 = vmor %vm2091_vm15, %vm2092_vm14  ;;  %v2112_v26 = vand.u32 2147483648, %v1971_v44  ;;  %v2110_v5 = vand.u32 2147483647, %v1971_v44  ;;  %vm2106_vm8 = vweird.f32 %v1971_v44 }
 0xbfd   :  { %v2088_v14 = vsub.f32 1.0, %v2087_v55 }
 0xbfe   :  { %vm2111_vm10 = vcmp.eq.f32.partialorder %v2110_v5, 8.507059e+37 }
 0xbff   :  { %v2089_v45 = vmul.f32 %v4681_v32, %v2088_v14 }
 0xc01   :  { %v2090_v60 = vadd.f32 %v4681_v32, %v2089_v45  ;;  %v1863_v29 = vpop.xlane.xlu0 %1862 }
 0xc02   :  { %v4683_v38 = vpop.eup %4682  ;;  %v1901_v56 = vsub.f32 %v6230_v23, %v1863_v29 }
 0xc03   :  { %v2102_v8 = vmul.f32 %v4683_v38, %v1971_v44  ;;  %v6300_v12 = vpop.xlane.xlu1 %1976  ;;  %v1872_v16 = vpop.xlane.xlu2 %1871  ;;  %v2094_v13 = vsel %vm2093_vm0, %v4681_v32, %v2090_v60  ;;  %vm2107_vm6 = vweird.f32 %v4683_v38 }
 0xc04   :  { %v1931_v10 = vmul.f32 1.442695, %v1901_v56  ;;  %4684 = vrcp.f32 %v6300_v12  ;;  %v1904_v47 = vsub.f32 %v6235_v19, %v1872_v16  ;;  %v2099_v33 = vsel %vm2096_vm1, %v2098_v3, %v2094_v13  ;;  %vm2108_vm9 = vmor %vm2106_vm8, %vm2107_vm6 }
 0xc05   :  { %v2103_v31 = vsub.f32 1.0, %v2102_v8  ;;  %v2100_v23 = vmul.f32 %v6217_v2, %v2099_v33  ;;  %v2113_v19 = vor.u32 1.1754944e-38, %v2112_v26  ;;  %v4892_v8 = vld [vmem:[%s7480_s6 + $0x90] sm:$0xff]  ;;  %v2142_v26 = vand.u32 2147483648, %v6300_v12 }
 0xc06   :  { %4686 = vpow2.f32 %v1931_v10  ;;  %v1937_v4 = vmul.f32 1.442695, %v1904_v47  ;;  %v6337_v16 = vadd.f32 %v4892_v8, %v1825_v9  ;;  %vm2136_vm0 = vweird.f32 %v6300_v12 }
 0xc07   :  { %v2104_v50 = vmul.f32 %v4683_v38, %v2103_v31  ;;  %4374 = vmatmul.msk.f32.gmra.mxu1 %vm215_vm4, %v2100_v23  ;;  %v2140_v5 = vand.u32 2147483647, %v6300_v12 }
 0xc08   :  { %4688 = vpow2.f32 %v1937_v4 }
 0xc09   :  { %v2105_v40 = vadd.f32 %v4683_v38, %v2104_v50  ;;  %v1974_v37 = vpop.xlane.xlu0 %1973  ;;  %v1885_v50 = vsel %vm215_vm4, %v6337_v16, -inf  ;;  %vm2141_vm6 = vcmp.eq.f32.partialorder %v2140_v5, 8.507059e+37 }
 0xc0a   :  { %v6306_v35 = vpop.eup %4684  ;;  %4690 = vrcp.f32 %v1974_v37  ;;  %v2127_v0 = vand.u32 2147483648, %v1974_v37  ;;  %v2125_v56 = vand.u32 2147483647, %v1974_v37  ;;  %vm2121_vm12 = vweird.f32 %v1974_v37 }
 0xc0b   :  { %4692 = vpow2.f32 %v1935_v20  ;;  %v1875_v25 = vpop.xlane.xlu2 %1874  ;;  %v2109_v48 = vsel %vm2108_vm9, %v4683_v38, %v2105_v40  ;;  %v2132_v63 = vmul.f32 %v6306_v35, %v6300_v12  ;;  %vm2137_vm14 = vweird.f32 %v6306_v35 }
 0xc0c   :  { %v6308_v2 = vpop.eup %4686  ;;  %v1905_v58 = vsub.f32 %v6249_v62, %v1875_v25  ;;  %v2114_v57 = vsel %vm2111_vm10, %v2113_v19, %v2109_v48  ;;  %v2128_v31 = vor.u32 1.1754944e-38, %v2127_v0  ;;  %vm2126_vm15 = vcmp.eq.f32.partialorder %v2125_v56, 8.507059e+37  ;;  %vm2138_vm1 = vmor %vm2136_vm0, %vm2137_vm14 }
 0xc0d   :  { %v1981_v43 = vsel %vm215_vm4, %v6308_v2, 0.0  ;;  %v2115_v53 = vmul.f32 %v6221_v11, %v2114_v57  ;;  %v2133_v42 = vsub.f32 1.0, %v2132_v63  ;;  %v4891_v11 = vld [vmem:[%s7480_s6 + $0x98] sm:$0xff] }
 0xc0e   :  { %v1939_v1 = vmul.f32 1.442695, %v1905_v58  ;;  %1982 = vadd.xlane.f32.xlu1 %v1981_v43  ;;  %v6316_v27 = vpop.eup %4688  ;;  %v6326_v14 = vadd.f32 %v4891_v11, %v1828_v54  ;;  %v2143_v58 = vor.u32 1.1754944e-38, %v2142_v26 }
 0xc0f   :  { %4375 = vmatmul.msk.f32.gmra.mxu1 %vm215_vm4, %v2115_v53  ;;  %v1990_v62 = vsel %vm215_vm4, %v6316_v27, 0.0  ;;  %v2134_v38 = vmul.f32 %v6306_v35, %v2133_v42 }
 0xc10   :  { %v4691_v52 = vpop.eup %4690  ;;  %4694 = vpow2.f32 %v1939_v1  ;;  %1991 = vadd.xlane.f32.xlu2 %v1990_v62 }
 0xc11   :  { %v6321_v32 = vpop.eup %4692  ;;  %v2117_v55 = vmul.f32 %v4691_v52, %v1974_v37  ;;  %v1878_v44 = vpop.xlane.xlu0 %1877  ;;  %vm2122_vm11 = vweird.f32 %v4691_v52  ;;  %v2135_v33 = vadd.f32 %v6306_v35, %v2134_v38 }
 0xc12   :  { %v1906_v60 = vsub.f32 %v6261_v61, %v1878_v44  ;;  %v1987_v29 = vsel %vm215_vm4, %v6321_v32, 0.0  ;;  %v1888_v61 = vsel %vm215_vm4, %v6326_v14, -inf  ;;  %vm2123_vm13 = vmor %vm2121_vm12, %vm2122_vm11 }
 0xc13   :  { %v2118_v45 = vsub.f32 1.0, %v2117_v55  ;;  %v1980_v30 = vpop.xlane.xlu2 %1979  ;;  %v2139_v48 = vsel %vm2138_vm1, %v6306_v35, %v2135_v33 }
 0xc14   :  { %4696 = vrcp.f32 %v1980_v30  ;;  %v1941_v47 = vmul.f32 1.442695, %v1906_v60  ;;  %v2144_v12 = vsel %vm2141_vm6, %v2143_v58, %v2139_v48  ;;  %vm2151_vm9 = vweird.f32 %v1980_v30 }
 0xc15   :  { %v2119_v21 = vmul.f32 %v4691_v52, %v2118_v45  ;;  %v2155_v1 = vand.u32 2147483647, %v1980_v30 }
 0xc16   :  { %v6332_v3 = vpop.eup %4694  ;;  %1988 = vadd.xlane.f32.xlu1 %v1987_v29  ;;  %4698 = vpow2.f32 %v1941_v47 }
 0xc17   :  { %v2120_v13 = vadd.f32 %v4691_v52, %v2119_v21  ;;  %v1993_v10 = vsel %vm215_vm4, %v6332_v3, 0.0  ;;  %vm2156_vm11 = vcmp.eq.f32.partialorder %v2155_v1, 8.507059e+37 }
 0xc18   :  { %1994 = vadd.xlane.f32.xlu0 %v1993_v10  ;;  %1889 = vmax.xlane.f32.xlu2 %v1888_v61 }
 0xc19   :  { %v2124_v9 = vsel %vm2123_vm13, %v4691_v52, %v2120_v13 }
 0xc1a   :  { %v4697_v20 = vpop.eup %4696  ;;  %v2129_v23 = vsel %vm2126_vm15, %v2128_v31, %v2124_v9 }
 0xc1b   :  { %v2147_v4 = vmul.f32 %v4697_v20, %v1980_v30  ;;  %v1881_v40 = vpop.xlane.xlu2 %1880  ;;  %v2130_v37 = vmul.f32 %v6251_v34, %v2129_v23  ;;  %vm2152_vm8 = vweird.f32 %v4697_v20  ;;  %v2157_v34 = vand.u32 2147483648, %v1980_v30 }
 0xc1c   :  { %v1907_v19 = vsub.f32 %v6272_v39, %v1881_v40  ;;  %v6354_v53 = vpop.eup %4698  ;;  %v2145_v39 = vmul.f32 %v6241_v51, %v2144_v12  ;;  %vm2153_vm10 = vmor %vm2151_vm9, %vm2152_vm8 }
 0xc1d   :  { %v2148_v25 = vsub.f32 1.0, %v2147_v4  ;;  %4376 = vmatmul.msk.f32.gmra.mxu1 %vm215_vm4, %v2130_v37  ;;  %v1996_v35 = vsel %vm215_vm4, %v6354_v53, 0.0  ;;  %v2158_v62 = vor.u32 1.1754944e-38, %v2157_v34 }
 0xc1e   :  { %v1943_v57 = vmul.f32 1.442695, %v1907_v19  ;;  %1886 = vmax.xlane.f32.xlu1 %v1885_v50 }
 0xc1f   :  { %v2149_v63 = vmul.f32 %v4697_v20, %v2148_v25 }
 0xc20   :  { %4700 = vpow2.f32 %v1943_v57 }
 0xc21   :  { %v2150_v43 = vadd.f32 %v4697_v20, %v2149_v63 }
 0xc23   :  { %v2154_v54 = vsel %vm2153_vm10, %v4697_v20, %v2150_v43 }
 0xc24   :  { %v2159_v55 = vsel %vm2156_vm11, %v2158_v62, %v2154_v54 }
 0xc25   :  { %4377 = vmatmul.msk.f32.gmra.mxu1 %vm215_vm4, %v2145_v39  ;;  %v2160_v44 = vmul.f32 %v6265_v28, %v2159_v55 }
 0xc26   :  { %v6360_v52 = vpop.eup %4700  ;;  %1997 = vadd.xlane.f32.xlu1 %v1996_v35 }
 0xc27   :  { %v1999_v42 = vsel %vm215_vm4, %v6360_v52, 0.0 }
 0xc28   :  { %2000 = vadd.xlane.f32.xlu0 %v1999_v42 }
 0xc2d   :  { %4378 = vmatmul.msk.f32.gmra.mxu1 %vm215_vm4, %v2160_v44 }
 0xc63   :  { %v1986_v51 = vpop.xlane.xlu0 %1985 }
 0xc64   :  { %v2187_v48 = vand.u32 2147483648, %v1986_v51  ;;  %vm2181_vm1 = vweird.f32 %v1986_v51  ;;  %v2185_v63 = vand.u32 2147483647, %v1986_v51 }
 0xc66   :  { %v2188_v1 = vor.u32 1.1754944e-38, %v2187_v48  ;;  %vm2186_vm8 = vcmp.eq.f32.partialorder %v2185_v63, 8.507059e+37  ;;  %v6430_v63 = vpop.f32.mrf.mxu1 }
 0xc6b   :  { %v1884_v11 = vpop.xlane.xlu0 %1883 }
 0xc6c   :  { %v1908_v45 = vsub.f32 %v6290_v22, %v1884_v11 }
 0xc6e   :  { %v1945_v30 = vmul.f32 1.442695, %v1908_v45 }
 0xc70   :  { %4702 = vpow2.f32 %v1945_v30 }
 0xc71   :  { %4704 = vrcp.f32 %v1986_v51 }
 0xc76   :  { %v6367_v0 = vpop.eup %4702 }
 0xc77   :  { %v2002_v60 = vsel %vm215_vm4, %v6367_v0, 0.0  ;;  %v4705_v38 = vpop.eup %4704 }
 0xc78   :  { %2003 = vadd.xlane.f32.xlu2 %v2002_v60  ;;  %v2177_v28 = vmul.f32 %v4705_v38, %v1986_v51  ;;  %vm2182_vm14 = vweird.f32 %v4705_v38 }
 0xc79   :  { %vm2183_vm6 = vmor %vm2181_vm1, %vm2182_vm14 }
 0xc7a   :  { %v2178_v8 = vsub.f32 1.0, %v2177_v28 }
 0xc7c   :  { %v2179_v47 = vmul.f32 %v4705_v38, %v2178_v8 }
 0xc7e   :  { %v2180_v4 = vadd.f32 %v4705_v38, %v2179_v47 }
 0xc81   :  { %v1983_v29 = vpop.xlane.xlu1 %1982 }
 0xc82   :  { %4706 = vrcp.f32 %v1983_v29  ;;  %v2172_v10 = vand.u32 2147483648, %v1983_v29  ;;  %v2170_v9 = vand.u32 2147483647, %v1983_v29  ;;  %vm2166_vm13 = vweird.f32 %v1983_v29 }
 0xc83   :  { %v6371_v21 = vpop.xlane.xlu2 %1991 }
 0xc84   :  { %v2173_v50 = vor.u32 1.1754944e-38, %v2172_v10  ;;  %vm2171_vm0 = vcmp.eq.f32.partialorder %v2170_v9, 8.507059e+37  ;;  %vm2211_vm14 = vweird.f32 %v6371_v21 }
 0xc88   :  { %v4707_v56 = vpop.eup %4706 }
 0xc89   :  { %v2162_v61 = vmul.f32 %v4707_v56, %v1983_v29  ;;  %v6373_v13 = vpop.xlane.xlu1 %1988  ;;  %vm2167_vm12 = vweird.f32 %v4707_v56 }
 0xc8a   :  { %4708 = vrcp.f32 %v6373_v13  ;;  %vm2168_vm15 = vmor %vm2166_vm13, %vm2167_vm12  ;;  %v2202_v55 = vand.u32 2147483648, %v6373_v13  ;;  %vm2196_vm10 = vweird.f32 %v6373_v13  ;;  %v2200_v44 = vand.u32 2147483647, %v6373_v13 }
 0xc8b   :  { %v2163_v22 = vsub.f32 1.0, %v2162_v61  ;;  %4710 = vrcp.f32 %v6371_v21  ;;  %v1890_v31 = vpop.xlane.xlu2 %1889  ;;  %v6379_v37 = vpop.xlane.xlu0 %1994 }
 0xc8c   :  { %v1910_v20 = vsub.f32 %v6326_v14, %v1890_v31  ;;  %vm2201_vm12 = vcmp.eq.f32.partialorder %v2200_v44, 8.507059e+37 }
 0xc8d   :  { %v2164_v33 = vmul.f32 %v4707_v56, %v2163_v22  ;;  %v2215_v22 = vand.u32 2147483647, %v6371_v21 }
 0xc8e   :  { %v1949_v5 = vmul.f32 1.442695, %v1910_v20 }
 0xc8f   :  { %v2165_v26 = vadd.f32 %v4707_v56, %v2164_v33 }
 0xc90   :  { %v4709_v23 = vpop.eup %4708  ;;  %4527 = vrot.lane.b32.xlu2 %v4526_v59, %s4989_s26  ;;  %4712 = vpow2.f32 %v1949_v5  ;;  %v2184_v59 = vsel %vm2183_vm6, %v4705_v38, %v2180_v4  ;;  %v2203_v38 = vor.u32 1.1754944e-38, %v2202_v55  ;;  %vm2226_vm6 = vweird.f32 %v6379_v37 }
 0xc91   :  { %v2192_v40 = vmul.f32 %v4709_v23, %v6373_v13  ;;  %v1887_v19 = vpop.xlane.xlu1 %1886  ;;  %v2169_v25 = vsel %vm2168_vm15, %v4707_v56, %v2165_v26  ;;  %v6385_v14 = vpop.eup %4710  ;;  %4714 = vrcp.f32 %v6379_v37  ;;  %v2189_v39 = vsel %vm2186_vm8, %v2188_v1, %v2184_v59 }
 0xc92   :  { %v1909_v58 = vsub.f32 %v6337_v16, %v1887_v19  ;;  %v2174_v57 = vsel %vm2171_vm0, %v2173_v50, %v2169_v25  ;;  %v2207_v24 = vmul.f32 %v6385_v14, %v6371_v21  ;;  %vm2197_vm9 = vweird.f32 %v4709_v23 }
 0xc93   :  { %v2193_v12 = vsub.f32 1.0, %v2192_v40  ;;  %v2175_v43 = vmul.f32 %v6308_v2, %v2174_v57  ;;  %v2190_v51 = vmul.f32 %v6283_v6, %v2189_v39  ;;  %vm2198_vm11 = vmor %vm2196_vm10, %vm2197_vm9  ;;  %vm2212_vm13 = vweird.f32 %v6385_v14 }
 0xc94   :  { %v1947_v34 = vmul.f32 1.442695, %v1909_v58  ;;  %v2208_v35 = vsub.f32 1.0, %v2207_v24  ;;  %v2217_v13 = vand.u32 2147483648, %v6371_v21  ;;  %vm2213_vm15 = vmor %vm2211_vm14, %vm2212_vm13  ;;  %vm2216_vm0 = vcmp.eq.f32.partialorder %v2215_v22, 8.507059e+37 }
 0xc95   :  { %v2194_v7 = vmul.f32 %v4709_v23, %v2193_v12  ;;  %4379 = vmatmul.msk.f32.gmra.mxu1 %vm215_vm4, %v2175_v43  ;;  %v2232_v21 = vand.u32 2147483648, %v6379_v37 }
 0xc96   :  { %4716 = vpow2.f32 %v1947_v34  ;;  %v6394_v16 = vpop.eup %4712  ;;  %v2209_v45 = vmul.f32 %v6385_v14, %v2208_v35  ;;  %v2218_v9 = vor.u32 1.1754944e-38, %v2217_v13  ;;  %v6439_v35 = vpop.f32.mrf.mxu1 }
 0xc97   :  { %v2195_v2 = vadd.f32 %v4709_v23, %v2194_v7  ;;  %v2008_v54 = vsel %vm215_vm4, %v6394_v16, 0.0  ;;  %v4715_v42 = vpop.eup %4714  ;;  %v2233_v25 = vor.u32 1.1754944e-38, %v2232_v21 }
 0xc98   :  { %2009 = vadd.xlane.f32.xlu0 %v2008_v54  ;;  %v2222_v30 = vmul.f32 %v4715_v42, %v6379_v37  ;;  %v2210_v6 = vadd.f32 %v6385_v14, %v2209_v45  ;;  %vm2227_vm1 = vweird.f32 %v4715_v42 }
 0xc99   :  { %v6398_v62 = vpop.xlane.xlu1 %1997  ;;  %v2199_v29 = vsel %vm2198_vm11, %v4709_v23, %v2195_v2  ;;  %vm2228_vm8 = vmor %vm2226_vm6, %vm2227_vm1 }
 0xc9a   :  { %4718 = vrcp.f32 %v6398_v62  ;;  %v2204_v28 = vsel %vm2201_vm12, %v2203_v38, %v2199_v29  ;;  %v2223_v56 = vsub.f32 1.0, %v2222_v30  ;;  %v2214_v33 = vsel %vm2213_vm15, %v6385_v14, %v2210_v6 }
 0xc9b   :  { %v2001_v8 = vpop.xlane.xlu0 %2000  ;;  %v2205_v10 = vmul.f32 %v6321_v32, %v2204_v28  ;;  %v2219_v20 = vsel %vm2216_vm0, %v2218_v9, %v2214_v33  ;;  %v2230_v32 = vand.u32 2147483647, %v6379_v37  ;;  %v2247_v57 = vand.u32 2147483648, %v6398_v62 }
 0xc9c   :  { %v6404_v11 = vpop.eup %4716  ;;  %4720 = vrcp.f32 %v2001_v8  ;;  %v2224_v31 = vmul.f32 %v4715_v42, %v2223_v56  ;;  %v2220_v5 = vmul.f32 %v6316_v27, %v2219_v20  ;;  %vm2241_vm11 = vweird.f32 %v6398_v62 }
 0xc9d   :  { %4380 = vmatmul.msk.f32.gmra.mxu1 %vm215_vm4, %v2190_v51  ;;  %v2005_v60 = vsel %vm215_vm4, %v6404_v11, 0.0  ;;  %vm2231_vm9 = vcmp.eq.f32.partialorder %v2230_v32, 8.507059e+37  ;;  %v2245_v37 = vand.u32 2147483647, %v6398_v62  ;;  %v2248_v34 = vor.u32 1.1754944e-38, %v2247_v57 }
 0xc9e   :  { %2006 = vadd.xlane.f32.xlu1 %v2005_v60  ;;  %v2225_v26 = vadd.f32 %v4715_v42, %v2224_v31  ;;  %v2262_v59 = vand.u32 2147483648, %v2001_v8  ;;  %vm2256_vm15 = vweird.f32 %v2001_v8  ;;  %v6443_v41 = vpop.f32.mrf.mxu1 }
 0xc9f   :  { %vm2246_vm13 = vcmp.eq.f32.partialorder %v2245_v37, 8.507059e+37 }
 0xca0   :  { %v4719_v61 = vpop.eup %4718  ;;  %v2229_v19 = vsel %vm2228_vm8, %v4715_v42, %v2225_v26  ;;  %v2263_v2 = vor.u32 1.1754944e-38, %v2262_v59 }
 0xca1   :  { %v2237_v47 = vmul.f32 %v4719_v61, %v6398_v62  ;;  %v2234_v14 = vsel %vm2231_vm9, %v2233_v25, %v2229_v19  ;;  %vm2242_vm10 = vweird.f32 %v4719_v61 }
 0xca2   :  { %v4721_v50 = vpop.eup %4720  ;;  %v2235_v27 = vmul.f32 %v6332_v3, %v2234_v14  ;;  %vm2243_vm12 = vmor %vm2241_vm11, %vm2242_vm10  ;;  %v2260_v3 = vand.u32 2147483647, %v2001_v8 }
 0xca3   :  { %v2238_v23 = vsub.f32 1.0, %v2237_v47  ;;  %v2252_v40 = vmul.f32 %v4721_v50, %v2001_v8  ;;  %vm2257_vm14 = vweird.f32 %v4721_v50 }
 0xca4   :  { %vm2258_vm0 = vmor %vm2256_vm15, %vm2257_vm14  ;;  %vm2261_vm1 = vcmp.eq.f32.partialorder %v2260_v3, 8.507059e+37  ;;  %v6466_v3 = vld [vmem:[%s7479_s5 + $0x78] sm:$0xff] }
 0xca5   :  { %4381 = vmatmul.msk.f32.gmra.mxu1 %vm215_vm4, %v2205_v10  ;;  %v2239_v4 = vmul.f32 %v4719_v61, %v2238_v23  ;;  %v2253_v58 = vsub.f32 1.0, %v2252_v40 }
 0xca7   :  { %v2240_v48 = vadd.f32 %v4719_v61, %v2239_v4  ;;  %v2254_v12 = vmul.f32 %v4721_v50, %v2253_v58 }
 0xca9   :  { %v2244_v43 = vsel %vm2243_vm12, %v4719_v61, %v2240_v48  ;;  %v2255_v7 = vadd.f32 %v4721_v50, %v2254_v12 }
 0xcaa   :  { %v2249_v24 = vsel %vm2246_vm13, %v2248_v34, %v2244_v43 }
 0xcab   :  { %v2250_v1 = vmul.f32 %v6354_v53, %v2249_v24  ;;  %v2259_v39 = vsel %vm2258_vm0, %v4721_v50, %v2255_v7 }
 0xcac   :  { %v2264_v54 = vsel %vm2261_vm1, %v2263_v2, %v2259_v39 }
 0xcad   :  { %4382 = vmatmul.msk.f32.gmra.mxu1 %vm215_vm4, %v2220_v5  ;;  %v2265_v15 = vmul.f32 %v6360_v52, %v2264_v54  ;;  %v6484_v54 = vld [vmem:[%s7479_s5 + $0x60] sm:$0xff] }
 0xcb5   :  { %4383 = vmatmul.msk.f32.gmra.mxu1 %vm215_vm4, %v2235_v27 }
 0xcb7   :  { %4532 = vrot.lane.b32.xlu1 %v4531_v36, %s4989_s26  ;;  %v6445_v36 = vpop.f32.mrf.mxu1 }
 0xcbd   :  { %4384 = vmatmul.msk.f32.gmra.mxu1 %vm215_vm4, %v2250_v1  ;;  %v6472_v1 = vld [vmem:[%s7479_s5 + $0x70] sm:$0xff] }
 0xcbf   :  { %v6447_v62 = vpop.f32.mrf.mxu1 }
 0xcc5   :  { %4385 = vmatmul.msk.f32.gmra.mxu1 %vm215_vm4, %v2265_v15 }
 0xcc7   :  { %v6449_v53 = vpop.f32.mrf.mxu1 }
 0xccf   :  { %v6451_v55 = vpop.f32.mrf.mxu1 }
 0xcd7   :  { %v6453_v45 = vpop.f32.mrf.mxu1 }
 0xcdf   :  { %v6456_v61 = vpop.f32.mrf.mxu1 }
 0xce7   :  { %v2425_v13 = vpop.f32.mrf.mxu1 }
 0xceb   :  { %v2004_v42 = vpop.xlane.xlu2 %2003 }
 0xcec   :  { %4722 = vrcp.f32 %v2004_v42  ;;  %v2277_v52 = vand.u32 2147483648, %v2004_v42  ;;  %v2275_v29 = vand.u32 2147483647, %v2004_v42  ;;  %vm2271_vm8 = vweird.f32 %v2004_v42 }
 0xcee   :  { %v2278_v28 = vor.u32 1.1754944e-38, %v2277_v52  ;;  %vm2276_vm10 = vcmp.eq.f32.partialorder %v2275_v29, 8.507059e+37  ;;  %v6502_v52 = vld [vmem:[%s7479_s5 + $0x48] sm:$0xff]  ;;  %v6508_v29 = vld [vmem:[%s7479_s5 + $0x40] sm:$0xff] }
 0xcf2   :  { %v4723_v44 = vpop.eup %4722 }
 0xcf3   :  { %v2267_v51 = vmul.f32 %v4723_v44, %v2004_v42  ;;  %vm2272_vm6 = vweird.f32 %v4723_v44  ;;  %v6490_v42 = vld [vmem:[%s7479_s5 + $0x58] sm:$0xff] }
 0xcf4   :  { %vm2273_vm9 = vmor %vm2271_vm8, %vm2272_vm6 }
 0xcf5   :  { %v2268_v30 = vsub.f32 1.0, %v2267_v51  ;;  %v6496_v51 = vld [vmem:[%s7479_s5 + $0x50] sm:$0xff] }
 0xcf7   :  { %v2269_v60 = vmul.f32 %v4723_v44, %v2268_v30 }
 0xcf9   :  { %v2270_v38 = vadd.f32 %v4723_v44, %v2269_v60  ;;  %v2467_v60 = vmul.f32 %v6502_v52, %v2425_v13 }
 0xcfb   :  { %v2274_v6 = vsel %vm2273_vm9, %v4723_v44, %v2270_v38  ;;  %v2466_v38 = vmul.f32 %v6508_v29, %v6456_v61  ;;  %v6529_v61 = vld [vmem:[%s7479_s5 + $0x28] sm:$0xff] }
 0xcfc   :  { %v2279_v56 = vsel %vm2276_vm10, %v2278_v28, %v2274_v6  ;;  %v6515_v28 = vld [vmem:[%s7479_s5 + $0x38] sm:$0xff]  ;;  %v2463_v13 = vmul.f32 %v6529_v61, %v6449_v53  ;;  %v6550_v53 = vld [vmem:[%s7479_s5 + $0x10] sm:$0xff] }
 0xcfd   :  { %v2280_v8 = vmul.f32 %v6367_v0, %v2279_v56  ;;  %v2465_v6 = vmul.f32 %v6515_v28, %v6453_v45  ;;  %v6522_v56 = vld [vmem:[%s7479_s5 + $0x30] sm:$0xff]  ;;  %v6536_v45 = vld [vmem:[%s7479_s5 + $0x20] sm:$0xff] }
 0xcff   :  { %4386 = vmatmul.msk.f32.gmra.mxu1 %vm215_vm4, %v2280_v8  ;;  %v2464_v8 = vmul.f32 %v6522_v56, %v6451_v55  ;;  %v6543_v55 = vld [vmem:[%s7479_s5 + $0x18] sm:$0xff] }
 0xd0b   :  { %v2010_v22 = vpop.xlane.xlu0 %2009 }
 0xd0c   :  { %4724 = vrcp.f32 %v2010_v22  ;;  %v2307_v14 = vand.u32 2147483648, %v2010_v22  ;;  %vm2301_vm0 = vweird.f32 %v2010_v22  ;;  %v2305_v57 = vand.u32 2147483647, %v2010_v22 }
 0xd0e   :  { %v2308_v12 = vor.u32 1.1754944e-38, %v2307_v14  ;;  %vm2306_vm6 = vcmp.eq.f32.partialorder %v2305_v57, 8.507059e+37  ;;  %v4917_v14 = vld [vmem:[%s7481_s4 + $0x18] sm:$0xff] }
 0xd11   :  { %v2007_v10 = vpop.xlane.xlu1 %2006 }
 0xd12   :  { %4726 = vrcp.f32 %v2007_v10  ;;  %v2428_v31 = vpop.f32.mrf.mxu1  ;;  %v4725_v47 = vpop.eup %4724  ;;  %v2292_v21 = vand.u32 2147483648, %v2007_v10  ;;  %v2290_v5 = vand.u32 2147483647, %v2007_v10  ;;  %vm2286_vm12 = vweird.f32 %v2007_v10 }
 0xd13   :  { %v2297_v33 = vmul.f32 %v4725_v47, %v2010_v22  ;;  %vm2302_vm14 = vweird.f32 %v4725_v47  ;;  %v2468_v30 = vmul.f32 %v6496_v51, %v2428_v31  ;;  %v2462_v22 = vmul.f32 %v6536_v45, %v6447_v62  ;;  %v6557_v62 = vld [vmem:[%s7479_s5 + $0x8] sm:$0xff] }
 0xd14   :  { %v2293_v40 = vor.u32 1.1754944e-38, %v2292_v21  ;;  %vm2291_vm15 = vcmp.eq.f32.partialorder %v2290_v5, 8.507059e+37  ;;  %vm2303_vm1 = vmor %vm2301_vm0, %vm2302_vm14  ;;  %v2460_v31 = vmul.f32 %v6550_v53, %v6443_v41  ;;  %v4909_v41 = vld [vmem:[%s7481_s4] sm:$0xff]  ;;  %v6592_v5 = vld [vmem:[%s7479_s5 + $0x88] sm:$0xff] }
 0xd15   :  { %v2298_v20 = vsub.f32 1.0, %v2297_v33 }
 0xd17   :  { %v2299_v32 = vmul.f32 %v4725_v47, %v2298_v20 }
 0xd18   :  { %v4727_v9 = vpop.eup %4726 }
 0xd19   :  { %v2282_v26 = vmul.f32 %v4727_v9, %v2007_v10  ;;  %vm2287_vm11 = vweird.f32 %v4727_v9  ;;  %v2300_v19 = vadd.f32 %v4725_v47, %v2299_v32  ;;  %v2461_v10 = vmul.f32 %v6543_v55, %v6445_v36  ;;  %v6564_v36 = vld [vmem:[%s7479_s5] sm:$0xff]  ;;  %v6586_v32 = vld [vmem:[%s7479_s5 + $0x90] sm:$0xff] }
 0xd1a   :  { %v2431_v23 = vpop.f32.mrf.mxu1  ;;  %vm2288_vm13 = vmor %vm2286_vm12, %vm2287_vm11  ;;  %v2458_v33 = vmul.f32 %v6564_v36, %v6430_v63 }
 0xd1b   :  { %v2283_v50 = vsub.f32 1.0, %v2282_v26  ;;  %v2304_v27 = vsel %vm2303_vm1, %v4725_v47, %v2300_v19  ;;  %v2469_v44 = vmul.f32 %v6490_v42, %v2431_v23  ;;  %v2459_v47 = vmul.f32 %v6557_v62, %v6439_v35  ;;  %v4910_v35 = vld [vmem:[%s7481_s4 + $0x10] sm:$0xff] }
 0xd1c   :  { %v2309_v43 = vsel %vm2306_vm6, %v2308_v12, %v2304_v27 }
 0xd1d   :  { %v2284_v0 = vmul.f32 %v4727_v9, %v2283_v50  ;;  %v2310_v24 = vmul.f32 %v6394_v16, %v2309_v43  ;;  %v6478_v16 = vld [vmem:[%s7479_s5 + $0x68] sm:$0xff]  ;;  %v6580_v50 = vld [vmem:[%s7479_s5 + $0x98] sm:$0xff] }
 0xd1f   :  { %v2285_v4 = vadd.f32 %v4727_v9, %v2284_v0 }
 0xd21   :  { %v2289_v25 = vsel %vm2288_vm13, %v4727_v9, %v2285_v4  ;;  %v4911_v9 = vld [vmem:[%s7481_s4 + $0x20] sm:$0xf] }
 0xd22   :  { %v2434_v48 = vpop.f32.mrf.mxu1  ;;  %v2294_v58 = vsel %vm2291_vm15, %v2293_v40, %v2289_v25  ;;  %v6598_v40 = vld [vmem:[%s7479_s5 + $0x80] sm:$0xff]  ;;  %v4916_v25 = vld [vmem:[%s7481_s4 + $0x8] sm:$0xff] }
 0xd23   :  { %v2295_v37 = vmul.f32 %v6404_v11, %v2294_v58  ;;  %v2470_v15 = vmul.f32 %v6484_v54, %v2434_v48  ;;  %v4528_v48 = vpop.permute.xlu2 %4527 }
 0xd24   :  { %v4529_v58 = vunpack.i.l.bf16 %v4528_v48  ;;  %v4530_v57 = vunpack.i.h.bf16 %v4528_v48 }
 0xd25   :  { %4387 = vmatmul.msk.f32.gmra.mxu1 %vm215_vm4, %v2295_v37  ;;  %v4918_v37 = vld [vmem:[%s7481_s4 + $0x28] sm:$0xf] }
 0xd29   :  { %v4533_v27 = vpop.permute.xlu1 %4532 }
 0xd2a   :  { %v2437_v34 = vpop.f32.mrf.mxu1  ;;  %v4535_v12 = vunpack.i.h.bf16 %v4533_v27  ;;  %v4534_v43 = vunpack.i.l.bf16 %v4533_v27  ;;  %v4308_v27 = vld [vmem:[%s7474_s8 + $0x58] sm:$0xff] }
 0xd2b   :  { %v2471_v2 = vmul.f32 %v6478_v16, %v2437_v34 }
 0xd2d   :  { %4388 = vmatmul.msk.f32.gmra.mxu1 %vm215_vm4, %v2310_v24 }
 0xd32   :  { %v2440_v7 = vpop.f32.mrf.mxu1 }
 0xd33   :  { %v2472_v39 = vmul.f32 %v6472_v1, %v2440_v7 }
 0xd3a   :  { %v2443_v59 = vpop.f32.mrf.mxu1 }
 0xd3b   :  { %v2473_v11 = vmul.f32 %v6466_v3, %v2443_v59 }
 0xd3d   :  { %2478 = vmatpush.msra.mxu0 %v2473_v11 }
 0xd3f   :  { %2479 = vmatpush.msra.mxu0 %v2472_v39 }
 0xd41   :  { %2480 = vmatpush.msra.mxu0 %v2471_v2 }
 0xd42   :  { %v2446_v20 = vpop.f32.mrf.mxu1 }
 0xd43   :  { %2481 = vmatpush.msra.mxu0 %v2470_v15  ;;  %v2474_v19 = vmul.f32 %v6598_v40, %v2446_v20 }
 0xd45   :  { %2482 = vmatpush.msra.mxu0 %v2469_v44 }
 0xd47   :  { %2483 = vmatpush.msra.mxu0 %v2468_v30  ;;  %v6619_v30 = vld [vmem:[%s7477_s10 + $0x8] sm:$0xff] }
 0xd49   :  { %2484 = vmatpush.msra.mxu0 %v2467_v60  ;;  %v2530_v60 = vperm.slane %v6619_v30, 1 }
 0xd4b   :  { %2485 = vmatpush.msra.mxu0 %v2466_v38 }
 0xd4d   :  { %2486 = vmatpush.msra.mxu0 %v2465_v6 }
 0xd4f   :  { %2487 = vmatpush.msra.mxu0 %v2464_v8 }
 0xd51   :  { %2488 = vmatpush.msra.mxu0 %v2463_v13 }
 0xd53   :  { %2489 = vmatpush.msra.mxu0 %v2462_v22 }
 0xd55   :  { %2490 = vmatpush.msra.mxu0 %v2461_v10 }
 0xd57   :  { %2491 = vmatpush.msra.mxu0 %v2460_v31 }
 0xd59   :  { %2492 = vmatpush.msra.mxu0 %v2459_v47 }
 0xd5b   :  { %2493 = vmatpush.msra.mxu0 %v2458_v33 }
 0xd5c   :  { %2494 = vmatmul.f32.vlgmr.msra.gmra.mxu0 %v4909_v41 }
 0xd64   :  { %2497 = vmatmul.f32.gmra.mxu0 %v4910_v35 }
 0xd6c   :  { %2500 = vmatmul.f32.gmra.mxu0 %v4911_v9 }
 0xd7c   :  { %v2449_v26 = vpop.f32.mrf.mxu1 }
 0xd7d   :  { %v2475_v4 = vmul.f32 %v6592_v5, %v2449_v26 }
 0xda2   :  { %v2452_v63 = vpop.f32.mrf.mxu1 }
 0xda3   :  { %v2476_v0 = vmul.f32 %v6586_v32, %v2452_v63 }
 0xdaa   :  { %v2455_v23 = vpop.f32.mrf.mxu1 }
 0xdab   :  { %v2477_v21 = vmul.f32 %v6580_v50, %v2455_v23 }
 0xdad   :  { %2516 = vmatpush.msrb.mxu0 %v2477_v21 }
 0xdaf   :  { %2517 = vmatpush.msrb.mxu0 %v2476_v0 }
 0xdb1   :  { %2518 = vmatpush.msrb.mxu0 %v2475_v4 }
 0xdb3   :  { %2519 = vmatpush.msrb.mxu0 %v2474_v19 }
 0xdb4   :  { %4389 = vmatmul.msk.f32.vlgmr.msrb.gmra.mxu0 %vm179_vm2, %v4916_v25 }
 0xdb5   :  { %2568 = vmatpush.msra.mxu0 %v4529_v58 }
 0xdb7   :  { %2569 = vmatpush.msra.mxu0 %v4530_v57  ;;  %v4312_v57 = vld [vmem:[%s7474_s8 + $0x78] sm:$0xff] }
 0xdb9   :  { %2570 = vmatpush.msra.mxu0 %v4534_v43 }
 0xdbb   :  { %2571 = vmatpush.msra.mxu0 %v4535_v12  ;;  %v4306_v12 = vld [vmem:[%s7474_s8 + $0x48] sm:$0xff] }
 0xdbc   :  { %4390 = vmatmul.msk.f32.gmra.mxu0 %vm179_vm2, %v4917_v14 }
 0xdbd   :  { %2681 = vmatpush.msrb.mxu0 %v4312_v57 }
 0xdc4   :  { %4391 = vmatmul.msk.f32.gmra.mxu0 %vm179_vm2, %v4918_v37  ;;  %v4310_v37 = vld [vmem:[%s7474_s8 + $0x68] sm:$0xff] }
 0xdc5   :  { %2682 = vmatpush.msrb.mxu0 %v4310_v37 }
 0xdc7   :  { %2683 = vmatpush.msrb.mxu0 %v4308_v27 }
 0xdc9   :  { %2684 = vmatpush.msrb.mxu0 %v4306_v12 }
 0xdd9   :  { %v2495_v34 = vpop.f32.mrf.mxu0 }
 0xde1   :  { %v2498_v24 = vpop.f32.mrf.mxu0 }
 0xde9   :  { %v2501_v7 = vpop.f32.mrf.mxu0 }
 0xe31   :  { %v2521_v59 = vpop.f32.mrf.mxu0 }
 0xe32   :  { %v2522_v11 = vadd.f32 %v2521_v59, %v2495_v34 }
 0xe34   :  { %4392 = vmatmul.msk.f32.vlgmr.msra.gmra.mxu0 %vm179_vm2, %v2522_v11 }
 0xe39   :  { %v2524_v39 = vpop.f32.mrf.mxu0 }
 0xe3a   :  { %v2525_v2 = vadd.f32 %v2524_v39, %v2498_v24 }
 0xe3c   :  { %4393 = vmatmul.msk.f32.gmra.mxu0 %vm179_vm2, %v2525_v2 }
 0xe41   :  { %v2527_v15 = vpop.f32.mrf.mxu0 }
 0xe42   :  { %v2528_v44 = vadd.f32 %v2527_v15, %v2501_v7  ;;  %v4320_v15 = vld [vmem:[%s7482_s9 + $0x78] sm:$0xff] }
 0xe43   :  { %2716 = vmatpush.msra.mxu0 %v4320_v15 }
 0xe44   :  { %4394 = vmatmul.msk.f32.gmra.mxu0 %vm179_vm2, %v2528_v44  ;;  %v4319_v44 = vld [vmem:[%s7482_s9 + $0x70] sm:$0xff] }
 0xe45   :  { %2717 = vmatpush.msra.mxu0 %v4319_v44 }
 0xeb1   :  { %v2573_v38 = vpop.f32.mrf.mxu0 }
 0xeb2   :  { %v2574_v6 = vadd.f32 %v2573_v38, %v2530_v60  ;;  %v4318_v38 = vld [vmem:[%s7482_s9 + $0x68] sm:$0xff] }
 0xeb3   :  { %2718 = vmatpush.msra.mxu0 %v4318_v38 }
 0xeb4   :  { %v2582_v8 = vadd.f32 %v2574_v6, %v5943_v18 }
 0xeb6   :  { %v2585_v13 = vsel %vm179_vm2, %v2582_v8, 0.0 }
 0xeb7   :  { %2586 = vadd.xlane.f32.xlu0 %v2585_v13 }
 0xeb9   :  { %v2576_v22 = vpop.f32.mrf.mxu0 }
 0xeba   :  { %v2577_v10 = vadd.f32 %v2576_v22, %v2530_v60  ;;  %v4317_v22 = vld [vmem:[%s7482_s9 + $0x60] sm:$0xff] }
 0xebb   :  { %2719 = vmatpush.msra.mxu0 %v4317_v22 }
 0xebc   :  { %v2583_v31 = vadd.f32 %v2577_v10, %v5947_v46 }
 0xebe   :  { %v2588_v47 = vsel %vm179_vm2, %v2583_v31, 0.0 }
 0xebf   :  { %2589 = vadd.xlane.f32.xlu0 %v2588_v47 }
 0xec1   :  { %v2579_v33 = vpop.f32.mrf.mxu0 }
 0xec2   :  { %v2580_v41 = vadd.f32 %v2579_v33, %v2530_v60  ;;  %v4316_v33 = vld [vmem:[%s7482_s9 + $0x58] sm:$0xff] }
 0xec3   :  { %2720 = vmatpush.msra.mxu0 %v4316_v33 }
 0xec4   :  { %v2584_v35 = vadd.f32 %v2580_v41, %v5952_v49 }
 0xec6   :  { %v2591_v9 = vsel %vm1297_vm7, %v2584_v35, 0.0 }
 0xec7   :  { %2592 = vadd.xlane.f32.xlu0 %v2591_v9  ;;  %v2651_v9 = vperm.slane %v6619_v30, 2 }
 0xf2a   :  { %v2587_v20 = vpop.xlane.xlu0 %2586 }
 0xf2b   :  { %v2594_v18 = vmul.f32 %v2587_v20, %v5830_v17 }
 0xf2d   :  { %v2597_v26 = vsub.f32 %v2582_v8, %v2594_v18 }
 0xf2f   :  { %v2600_v63 = vmul.f32 %v2597_v26, %v2597_v26 }
 0xf31   :  { %v2603_v23 = vsel %vm179_vm2, %v2600_v63, 0.0  ;;  %v2655_v63 = vperm.slane %v6619_v30, 3 }
 0xf32   :  { %2604 = vadd.xlane.f32.xlu2 %v2603_v23  ;;  %v2590_v21 = vpop.xlane.xlu0 %2589 }
 0xf33   :  { %v2595_v46 = vmul.f32 %v2590_v21, %v5830_v17 }
 0xf35   :  { %v6631_v0 = vsub.f32 %v2583_v31, %v2595_v46 }
 0xf37   :  { %v2601_v4 = vmul.f32 %v6631_v0, %v6631_v0 }
 0xf39   :  { %v2606_v49 = vsel %vm179_vm2, %v2601_v4, 0.0 }
 0xf3a   :  { %2607 = vadd.xlane.f32.xlu1 %v2606_v49  ;;  %v2593_v19 = vpop.xlane.xlu0 %2592 }
 0xf3b   :  { %v2596_v25 = vmul.f32 %v2593_v19, %v5830_v17 }
 0xf3d   :  { %v6637_v14 = vsub.f32 %v2584_v35, %v2596_v25 }
 0xf3f   :  { %v2602_v48 = vmul.f32 %v6637_v14, %v6637_v14 }
 0xf41   :  { %v2609_v58 = vsel %vm1297_vm7, %v2602_v48, 0.0 }
 0xf42   :  { %2610 = vadd.xlane.f32.xlu0 %v2609_v58 }
 0xfa5   :  { %v2605_v43 = vpop.xlane.xlu2 %2604 }
 0xfa6   :  { %v2612_v34 = vmul.f32 %v2605_v43, %v5830_v17 }
 0xfa8   :  { %v2615_v24 = vadd.f32 1e-05, %v2612_v34 }
 0xfaa   :  { %4728 = vrsqrt.f32 %v2615_v24  ;;  %vm2624_vm9 = vweird.f32 %v2615_v24 }
 0xfad   :  { %v2608_v7 = vpop.xlane.xlu1 %2607 }
 0xfae   :  { %v2613_v59 = vmul.f32 %v2608_v7, %v5830_v17 }
 0xfb0   :  { %v4729_v11 = vpop.eup %4728  ;;  %v2616_v39 = vadd.f32 1e-05, %v2613_v59 }
 0xfb1   :  { %v2619_v2 = vmul.f32 %v4729_v11, %v2615_v24  ;;  %vm2625_vm8 = vweird.f32 %v4729_v11 }
 0xfb2   :  { %4730 = vrsqrt.f32 %v2616_v39  ;;  %vm2626_vm10 = vmor %vm2624_vm9, %vm2625_vm8  ;;  %vm2634_vm12 = vweird.f32 %v2616_v39 }
 0xfb3   :  { %v2620_v60 = vmul.f32 %v4729_v11, %v2619_v2  ;;  %v4313_v2 = vld [vmem:[%s7482_s9 + $0x40] sm:$0xff] }
 0xfb5   :  { %v2621_v6 = vmul.f32 0.5, %v2620_v60  ;;  %v2611_v8 = vpop.xlane.xlu0 %2610 }
 0xfb6   :  { %v2614_v13 = vmul.f32 %v2611_v8, %v5830_v17 }
 0xfb7   :  { %v2622_v10 = vsub.f32 1.5, %v2621_v6 }
 0xfb8   :  { %v4731_v31 = vpop.eup %4730  ;;  %v2617_v47 = vadd.f32 1e-05, %v2614_v13 }
 0xfb9   :  { %v2623_v41 = vmul.f32 %v4729_v11, %v2622_v10  ;;  %v2629_v35 = vmul.f32 %v4731_v31, %v2616_v39  ;;  %vm2635_vm11 = vweird.f32 %v4731_v31  ;;  %v4314_v39 = vld [vmem:[%s7482_s9 + $0x48] sm:$0xff] }
 0xfba   :  { %4732 = vrsqrt.f32 %v2617_v47  ;;  %vm2636_vm13 = vmor %vm2634_vm12, %vm2635_vm11  ;;  %vm2644_vm15 = vweird.f32 %v2617_v47 }
 0xfbb   :  { %v2627_v20 = vsel %vm2626_vm10, %v4729_v11, %v2623_v41  ;;  %v2630_v18 = vmul.f32 %v4731_v31, %v2629_v35 }
 0xfbc   :  { %v2648_v23 = vmul.f32 %v2627_v20, %v2597_v26 }
 0xfbd   :  { %v2631_v21 = vmul.f32 0.5, %v2630_v18 }
 0xfbe   :  { %v2652_v46 = vmul.f32 %v2651_v9, %v2648_v23 }
 0xfbf   :  { %v2632_v4 = vsub.f32 1.5, %v2631_v21 }
 0xfc0   :  { %v4733_v49 = vpop.eup %4732  ;;  %v2656_v19 = vadd.f32 %v2655_v63, %v2652_v46 }
 0xfc1   :  { %v2633_v25 = vmul.f32 %v4731_v31, %v2632_v4  ;;  %v2639_v48 = vmul.f32 %v4733_v49, %v2617_v47  ;;  %vm2645_vm14 = vweird.f32 %v4733_v49 }
 0xfc2   :  { %4395 = vmatmul.msk.f32.vlgmr.msrb.gmra.mxu0 %vm179_vm2, %v2656_v19  ;;  %vm2646_vm0 = vmor %vm2644_vm15, %vm2645_vm14 }
 0xfc3   :  { %v2637_v58 = vsel %vm2636_vm13, %v4731_v31, %v2633_v25  ;;  %v2640_v57 = vmul.f32 %v4733_v49, %v2639_v48  ;;  %v2698_v31 = vperm.slane %v6619_v30, 5 }
 0xfc4   :  { %v2649_v37 = vmul.f32 %v2637_v58, %v6631_v0  ;;  %v4315_v0 = vld [vmem:[%s7482_s9 + $0x50] sm:$0xff] }
 0xfc5   :  { %v2641_v27 = vmul.f32 0.5, %v2640_v57  ;;  %2721 = vmatpush.msra.mxu0 %v4315_v0  ;;  %v6715_v0 = vld [vmem:[%s7474_s8 + $0xa0] sm:$0xff] }
 0xfc6   :  { %v2653_v12 = vmul.f32 %v2651_v9, %v2649_v37 }
 0xfc7   :  { %v2642_v43 = vsub.f32 1.5, %v2641_v27  ;;  %2722 = vmatpush.msra.mxu0 %v4314_v39  ;;  %v6721_v39 = vld [vmem:[%s7474_s8 + $0x90] sm:$0xff] }
 0xfc8   :  { %v2657_v26 = vadd.f32 %v2655_v63, %v2653_v12 }
 0xfc9   :  { %v2643_v34 = vmul.f32 %v4733_v49, %v2642_v43  ;;  %2723 = vmatpush.msra.mxu0 %v4313_v2  ;;  %v6727_v2 = vld [vmem:[%s7474_s8 + $0x80] sm:$0xff] }
 0xfca   :  { %4396 = vmatmul.msk.f32.gmra.mxu0 %vm179_vm2, %v2657_v26 }
 0xfcb   :  { %v2647_v24 = vsel %vm2646_vm0, %v4733_v49, %v2643_v34 }
 0xfcc   :  { %v2650_v7 = vmul.f32 %v2647_v24, %v6637_v14  ;;  %v2659_v14 = vperm.slane %v6619_v30, 4 }
 0xfce   :  { %v2654_v59 = vmul.f32 %v2651_v9, %v2650_v7 }
 0xfd0   :  { %v2658_v11 = vadd.f32 %v2655_v63, %v2654_v59 }
 0xfd2   :  { %4397 = vmatmul.msk.f32.gmra.mxu0 %vm179_vm2, %v2658_v11 }
0x103f   :  { %v2686_v15 = vpop.f32.mrf.mxu0 }
0x1040   :  { %v2687_v44 = vadd.f32 %v2686_v15, %v2659_v14 }
0x1042   :  { %v2695_v60 = vmax.f32 %v2687_v44, 0.0 }
0x1044   :  { %4398 = vmatmul.msk.f32.vlgmr.msra.gmra.mxu0 %vm1413_vm5, %v2695_v60 }
0x1047   :  { %v2689_v38 = vpop.f32.mrf.mxu0 }
0x1048   :  { %v2690_v6 = vadd.f32 %v2689_v38, %v2659_v14  ;;  %v4546_v38 = vpack.i.bf16 %v6727_v2, %v6721_v39 }
0x104a   :  { %v2696_v8 = vmax.f32 %v2690_v6, 0.0 }
0x104c   :  { %4399 = vmatmul.msk.f32.gmra.mxu0 %vm1413_vm5, %v2696_v8 }
0x104f   :  { %v2692_v13 = vpop.f32.mrf.mxu0 }
0x1050   :  { %v2693_v22 = vadd.f32 %v2692_v13, %v2659_v14 }
0x1052   :  { %v2697_v10 = vmax.f32 %v2693_v22, 0.0 }
0x1054   :  { %4400 = vmatmul.msk.f32.gmra.mxu0 %vm1413_vm5, %v2697_v10 }
0x10c1   :  { %v2725_v47 = vpop.f32.mrf.mxu0 }
0x10c2   :  { %v2726_v33 = vadd.f32 %v2725_v47, %v2698_v31 }
0x10c4   :  { %v2734_v41 = vadd.f32 %v2726_v33, %v2656_v19 }
0x10c6   :  { %v2737_v35 = vsel %vm179_vm2, %v2734_v41, 0.0 }
0x10c7   :  { %2738 = vadd.xlane.f32.xlu0 %v2737_v35 }
0x10c9   :  { %v2728_v9 = vpop.f32.mrf.mxu0 }
0x10ca   :  { %v2729_v20 = vadd.f32 %v2728_v9, %v2698_v31 }
0x10cc   :  { %v2735_v18 = vadd.f32 %v2729_v20, %v2657_v26 }
0x10ce   :  { %v2740_v63 = vsel %vm179_vm2, %v2735_v18, 0.0 }
0x10cf   :  { %2741 = vadd.xlane.f32.xlu0 %v2740_v63 }
0x10d1   :  { %v2731_v23 = vpop.f32.mrf.mxu0 }
0x10d2   :  { %v2732_v21 = vadd.f32 %v2731_v23, %v2698_v31  ;;  %v2803_v23 = vperm.slane %v6619_v30, 6 }
0x10d4   :  { %v2736_v46 = vadd.f32 %v2732_v21, %v2658_v11  ;;  %v6709_v11 = vld [vmem:[%s7474_s8 + $0xb0] sm:$0xff] }
0x10d5   :  { %2851 = vmatpush.msrb.mxu0 %v6709_v11  ;;  %v4541_v60 = vpack.i.bf16 %v6715_v0, %v6709_v11 }
0x10d6   :  { %v2743_v4 = vsel %vm1297_vm7, %v2736_v46, 0.0 }
0x10d7   :  { %2744 = vadd.xlane.f32.xlu0 %v2743_v4  ;;  %2852 = vmatpush.msrb.mxu0 %v6715_v0  ;;  %v2807_v4 = vperm.slane %v6619_v30, 7 }
0x10d9   :  { %2853 = vmatpush.msrb.mxu0 %v6721_v39 }
0x10db   :  { %2854 = vmatpush.msrb.mxu0 %v6727_v2 }
0x113a   :  { %v2739_v49 = vpop.xlane.xlu0 %2738 }
0x113b   :  { %v2746_v25 = vmul.f32 %v2739_v49, %v5830_v17 }
0x113d   :  { %v2749_v48 = vsub.f32 %v2734_v41, %v2746_v25 }
0x113f   :  { %v2752_v19 = vmul.f32 %v2749_v48, %v2749_v48 }
0x1141   :  { %v2755_v58 = vsel %vm179_vm2, %v2752_v19, 0.0 }
0x1142   :  { %v2742_v57 = vpop.xlane.xlu0 %2741  ;;  %2756 = vadd.xlane.f32.xlu0 %v2755_v58 }
0x1143   :  { %v2747_v37 = vmul.f32 %v2742_v57, %v5830_v17 }
0x1145   :  { %v2750_v27 = vsub.f32 %v2735_v18, %v2747_v37 }
0x1147   :  { %v2753_v12 = vmul.f32 %v2750_v27, %v2750_v27 }
0x1149   :  { %v2758_v43 = vsel %vm179_vm2, %v2753_v12, 0.0 }
0x114a   :  { %2759 = vadd.xlane.f32.xlu2 %v2758_v43  ;;  %v2745_v26 = vpop.xlane.xlu0 %2744 }
0x114b   :  { %v2748_v34 = vmul.f32 %v2745_v26, %v5830_v17 }
0x114d   :  { %v6701_v24 = vsub.f32 %v2736_v46, %v2748_v34 }
0x114f   :  { %v2754_v7 = vmul.f32 %v6701_v24, %v6701_v24 }
0x1151   :  { %v2761_v59 = vsel %vm1297_vm7, %v2754_v7, 0.0 }
0x1152   :  { %2762 = vadd.xlane.f32.xlu1 %v2761_v59 }
0x11b5   :  { %v2757_v14 = vpop.xlane.xlu0 %2756 }
0x11b6   :  { %v2764_v15 = vmul.f32 %v2757_v14, %v5830_v17 }
0x11b8   :  { %v2767_v44 = vadd.f32 1e-05, %v2764_v15 }
0x11ba   :  { %4734 = vrsqrt.f32 %v2767_v44  ;;  %vm2776_vm6 = vweird.f32 %v2767_v44 }
0x11bd   :  { %v2760_v6 = vpop.xlane.xlu2 %2759 }
0x11be   :  { %v2765_v8 = vmul.f32 %v2760_v6, %v5830_v17 }
0x11c0   :  { %v4735_v13 = vpop.eup %4734  ;;  %v2768_v22 = vadd.f32 1e-05, %v2765_v8 }
0x11c1   :  { %v2771_v10 = vmul.f32 %v4735_v13, %v2767_v44  ;;  %vm2777_vm1 = vweird.f32 %v4735_v13 }
0x11c2   :  { %4736 = vrsqrt.f32 %v2768_v22  ;;  %vm2778_vm8 = vmor %vm2776_vm6, %vm2777_vm1  ;;  %vm2786_vm10 = vweird.f32 %v2768_v22 }
0x11c3   :  { %v2772_v31 = vmul.f32 %v4735_v13, %v2771_v10 }
0x11c5   :  { %v2773_v47 = vmul.f32 0.5, %v2772_v31  ;;  %v2763_v33 = vpop.xlane.xlu1 %2762 }
0x11c6   :  { %v2766_v41 = vmul.f32 %v2763_v33, %v5830_v17 }
0x11c7   :  { %v2774_v35 = vsub.f32 1.5, %v2773_v47 }
0x11c8   :  { %v4737_v9 = vpop.eup %4736  ;;  %v2769_v20 = vadd.f32 1e-05, %v2766_v41 }
0x11c9   :  { %v2775_v18 = vmul.f32 %v4735_v13, %v2774_v35  ;;  %v2781_v63 = vmul.f32 %v4737_v9, %v2768_v22  ;;  %vm2787_vm9 = vweird.f32 %v4737_v9 }
0x11ca   :  { %4738 = vrsqrt.f32 %v2769_v20  ;;  %vm2788_vm11 = vmor %vm2786_vm10, %vm2787_vm9  ;;  %vm2796_vm13 = vweird.f32 %v2769_v20 }
0x11cb   :  { %v2779_v21 = vsel %vm2778_vm8, %v4735_v13, %v2775_v18  ;;  %v2782_v46 = vmul.f32 %v4737_v9, %v2781_v63  ;;  %v4922_v18 = vld [vmem:[%s7478_s3 + $0x10] sm:$0xff]  ;;  %v4923_v63 = vld [vmem:[%s7478_s3 + $0x18] sm:$0xff] }
0x11cc   :  { %v2800_v49 = vmul.f32 %v2779_v21, %v2749_v48  ;;  %v4925_v21 = vld [vmem:[%s7478_s3 + $0x28] sm:$0xff] }
0x11cd   :  { %v2783_v25 = vmul.f32 0.5, %v2782_v46  ;;  %v4926_v46 = vld [vmem:[%s7478_s3 + $0x30] sm:$0xff] }
0x11ce   :  { %v2804_v19 = vmul.f32 %v2803_v23, %v2800_v49  ;;  %v4928_v49 = vld [vmem:[%s7478_s3 + $0x40] sm:$0xff] }
0x11cf   :  { %v2784_v58 = vsub.f32 1.5, %v2783_v25  ;;  %v4929_v25 = vld [vmem:[%s7478_s3 + $0x48] sm:$0xff] }
0x11d0   :  { %v4739_v57 = vpop.eup %4738  ;;  %v6739_v37 = vadd.f32 %v2807_v4, %v2804_v19  ;;  %v4930_v19 = vld [vmem:[%s7478_s3 + $0x50] sm:$0xff] }
0x11d1   :  { %v2785_v12 = vmul.f32 %v4737_v9, %v2784_v58  ;;  %v2791_v43 = vmul.f32 %v4739_v57, %v2769_v20  ;;  %vm2797_vm12 = vweird.f32 %v4739_v57  ;;  %v4921_v20 = vld [vmem:[%s7478_s3 + $0x8] sm:$0xff]  ;;  %v4931_v58 = vld [vmem:[%s7478_s3 + $0x58] sm:$0xff] }
0x11d2   :  { %4417 = vmatmul.msk.f32.vlgmr.msrb.gmra.mxu0 %vm179_vm2, %v6739_v37  ;;  %vm2798_vm14 = vmor %vm2796_vm13, %vm2797_vm12 }
0x11d3   :  { %v2789_v26 = vsel %vm2788_vm11, %v4737_v9, %v2785_v12  ;;  %v2792_v34 = vmul.f32 %v4739_v57, %v2791_v43  ;;  %v4920_v9 = vld [vmem:[%s7478_s3] sm:$0xff]  ;;  %v4933_v12 = vld [vmem:[%s7478_s3 + $0x68] sm:$0xff] }
0x11d4   :  { %v2801_v7 = vmul.f32 %v2789_v26, %v2750_v27  ;;  %v161_v27 = vld [vmem:[%s7477_s10 + $0x10] sm:$0xff] }
0x11d5   :  { %v2793_v59 = vmul.f32 0.5, %v2792_v34  ;;  %v2829_v22 = vperm.slane %v161_v27, 0  ;;  %v4934_v26 = vld [vmem:[%s7478_s3 + $0x70] sm:$0xff] }
0x11d6   :  { %v2805_v30 = vmul.f32 %v2803_v23, %v2801_v7  ;;  %v4938_v27 = vld [vmem:[%s7478_s3 + $0x90] sm:$0xff] }
0x11d7   :  { %v2794_v48 = vsub.f32 1.5, %v2793_v59  ;;  %v4935_v59 = vld [vmem:[%s7478_s3 + $0x78] sm:$0xff] }
0x11d8   :  { %v6743_v14 = vadd.f32 %v2807_v4, %v2805_v30  ;;  %v4936_v30 = vld [vmem:[%s7478_s3 + $0x80] sm:$0xff] }
0x11d9   :  { %v2795_v15 = vmul.f32 %v4739_v57, %v2794_v48 }
0x11da   :  { %4418 = vmatmul.msk.f32.gmra.mxu0 %vm179_vm2, %v6743_v14 }
0x11db   :  { %v2799_v44 = vsel %vm2798_vm14, %v4739_v57, %v2795_v15  ;;  %v4932_v57 = vld [vmem:[%s7478_s3 + $0x60] sm:$0xff] }
0x11dc   :  { %v2802_v6 = vmul.f32 %v2799_v44, %v6701_v24  ;;  %v4937_v44 = vld [vmem:[%s7478_s3 + $0x88] sm:$0xff] }
0x11de   :  { %v2806_v8 = vmul.f32 %v2803_v23, %v2802_v6  ;;  %v4924_v23 = vld [vmem:[%s7478_s3 + $0x20] sm:$0xff] }
0x11e0   :  { %v6748_v13 = vadd.f32 %v2807_v4, %v2806_v8  ;;  %v4927_v4 = vld [vmem:[%s7478_s3 + $0x38] sm:$0xff] }
0x11e2   :  { %4419 = vmatmul.msk.f32.gmra.mxu0 %vm179_vm2, %v6748_v13 }
0x124f   :  { %v2856_v10 = vpop.f32.mrf.mxu0 }
0x1250   :  { %v6755_v31 = vadd.f32 %v2856_v10, %v2829_v22  ;;  %v4939_v10 = vld [vmem:[%s7478_s3 + $0x98] sm:$0xff] }
0x1252   :  { %2967 = vrot.lane.b32.xlu1 %v6755_v31, %s4987_s17 }
0x1257   :  { %v2859_v47 = vpop.f32.mrf.mxu0 }
0x1258   :  { %v6759_v33 = vadd.f32 %v2859_v47, %v2829_v22 }
0x125a   :  { %v4536_v24 = vpack.i.bf16 %v6755_v31, %v6759_v33  ;;  %2969 = vrot.lane.b32.xlu2 %v6759_v33, %s4987_s17 }
0x125f   :  { %v2862_v41 = vpop.f32.mrf.mxu0 }
0x1260   :  { %v6765_v35 = vadd.f32 %v2862_v41, %v2829_v22 }
0x1262   :  { %2971 = vrot.lane.b32.xlu0 %v6765_v35, %s4987_s17  ;;  %4420 = vmatpush.msk.msra.mxu2 %vm276_vm3, %v6765_v35 }
0x1264   :  { %2882 = vmatpush.msra.mxu2 %v6759_v33 }
0x1266   :  { %2883 = vmatpush.msra.mxu2 %v6755_v31 }
0x1267   :  { %4421 = vmatmul.msk.f32.vlgmr.msra.gmra.mxu2 %vm215_vm4, %v4920_v9 }
0x126f   :  { %4422 = vmatmul.msk.f32.gmra.mxu2 %vm215_vm4, %v4921_v20 }
0x1277   :  { %4423 = vmatmul.msk.f32.gmra.mxu2 %vm215_vm4, %v4922_v18 }
0x127f   :  { %4424 = vmatmul.msk.f32.gmra.mxu2 %vm215_vm4, %v4923_v63 }
0x1287   :  { %4425 = vmatmul.msk.f32.gmra.mxu2 %vm215_vm4, %v4924_v23 }
0x128f   :  { %4426 = vmatmul.msk.f32.gmra.mxu2 %vm215_vm4, %v4925_v21 }
0x1297   :  { %4427 = vmatmul.msk.f32.gmra.mxu2 %vm215_vm4, %v4926_v46 }
0x129f   :  { %4428 = vmatmul.msk.f32.gmra.mxu2 %vm215_vm4, %v4927_v4 }
0x12a7   :  { %4429 = vmatmul.msk.f32.gmra.mxu2 %vm215_vm4, %v4928_v49 }
0x12af   :  { %4430 = vmatmul.msk.f32.gmra.mxu2 %vm215_vm4, %v4929_v25 }
0x12b4   :  { %v2970_v34 = vpop.permute.xlu2 %2969 }
0x12b7   :  { %4431 = vmatmul.msk.f32.gmra.mxu2 %vm215_vm4, %v4930_v19 }
0x12bf   :  { %4432 = vmatmul.msk.f32.gmra.mxu2 %vm215_vm4, %v4931_v58 }
0x12c4   :  { %v2968_v7 = vpop.permute.xlu1 %2967 }
0x12c7   :  { %4433 = vmatmul.msk.f32.gmra.mxu2 %vm215_vm4, %v4932_v57 }
0x12cf   :  { %4434 = vmatmul.msk.f32.gmra.mxu2 %vm215_vm4, %v4933_v12 }
0x12d4   :  { %v2972_v43 = vpop.permute.xlu0 %2971 }
0x12d5   :  { %4441 = vmatpush.xpose.msk.msra.mxu3 %vm179_vm2, %v2972_v43 }
0x12d7   :  { %4435 = vmatmul.msk.f32.gmra.mxu2 %vm215_vm4, %v4934_v26 }
0x12d9   :  { %4442 = vmatpush.xpose.msk.msra.mxu3 %vm179_vm2, %v2970_v34 }
0x12dd   :  { %4443 = vmatpush.xpose.msk.msra.mxu3 %vm179_vm2, %v2968_v7  ;;  %v4942_v7 = vld [vmem:[%s7480_s6 + $0x10] sm:$0xff] }
0x12df   :  { %4436 = vmatmul.msk.f32.gmra.mxu2 %vm215_vm4, %v4935_v59 }
0x12e7   :  { %4437 = vmatmul.msk.f32.gmra.mxu2 %vm215_vm4, %v4936_v30 }
0x12ea   :  { %v2885_v48 = vpop.f32.mrf.mxu2 }
0x12eb   :  { %v2945_v15 = vmul.f32 %v6564_v36, %v2885_v48 }
0x12ed   :  { %4444 = vmatmul.msk.f32.vlgmr.msra.gmra.mxu3 %vm179_vm2, %v2945_v15 }
0x12ef   :  { %4438 = vmatmul.msk.f32.gmra.mxu2 %vm215_vm4, %v4937_v44  ;;  %v4943_v44 = vld [vmem:[%s7480_s6 + $0x18] sm:$0xff] }
0x12f2   :  { %v2888_v6 = vpop.f32.mrf.mxu2 }
0x12f3   :  { %v2946_v8 = vmul.f32 %v6557_v62, %v2888_v6 }
0x12f5   :  { %4445 = vmatmul.msk.f32.gmra.mxu3 %vm179_vm2, %v2946_v8 }
0x12f7   :  { %4439 = vmatmul.msk.f32.gmra.mxu2 %vm215_vm4, %v4938_v27 }
0x12fa   :  { %v2891_v36 = vpop.f32.mrf.mxu2 }
0x12fb   :  { %v2947_v22 = vmul.f32 %v6550_v53, %v2891_v36 }
0x12fd   :  { %4446 = vmatmul.msk.f32.gmra.mxu3 %vm179_vm2, %v2947_v22  ;;  %v4944_v22 = vld [vmem:[%s7480_s6 + $0x20] sm:$0xff] }
0x12ff   :  { %4440 = vmatmul.msk.f32.gmra.mxu2 %vm215_vm4, %v4939_v10 }
0x1302   :  { %v2894_v62 = vpop.f32.mrf.mxu2 }
0x1303   :  { %v2948_v47 = vmul.f32 %v6543_v55, %v2894_v62 }
0x1305   :  { %4447 = vmatmul.msk.f32.gmra.mxu3 %vm179_vm2, %v2948_v47 }
0x130a   :  { %v2897_v41 = vpop.f32.mrf.mxu2 }
0x130b   :  { %v2949_v9 = vmul.f32 %v6536_v45, %v2897_v41 }
0x130d   :  { %4448 = vmatmul.msk.f32.gmra.mxu3 %vm179_vm2, %v2949_v9 }
0x1312   :  { %v2900_v20 = vpop.f32.mrf.mxu2 }
0x1313   :  { %v2950_v53 = vmul.f32 %v6529_v61, %v2900_v20 }
0x1315   :  { %4449 = vmatmul.msk.f32.gmra.mxu3 %vm179_vm2, %v2950_v53 }
0x131a   :  { %v2903_v18 = vpop.f32.mrf.mxu2 }
0x131b   :  { %v2951_v63 = vmul.f32 %v6522_v56, %v2903_v18 }
0x131d   :  { %4450 = vmatmul.msk.f32.gmra.mxu3 %vm179_vm2, %v2951_v63  ;;  %v4946_v63 = vld [vmem:[%s7480_s6 + $0x30] sm:$0xff] }
0x1322   :  { %v2906_v23 = vpop.f32.mrf.mxu2 }
0x1323   :  { %v2952_v55 = vmul.f32 %v6515_v28, %v2906_v23 }
0x1325   :  { %4451 = vmatmul.msk.f32.gmra.mxu3 %vm179_vm2, %v2952_v55 }
0x132a   :  { %v2909_v21 = vpop.f32.mrf.mxu2 }
0x132b   :  { %v2953_v45 = vmul.f32 %v6508_v29, %v2909_v21 }
0x132d   :  { %4452 = vmatmul.msk.f32.gmra.mxu3 %vm179_vm2, %v2953_v45  ;;  %v4947_v45 = vld [vmem:[%s7480_s6 + $0x38] sm:$0xff] }
0x1332   :  { %v2912_v46 = vpop.f32.mrf.mxu2 }
0x1333   :  { %v2954_v61 = vmul.f32 %v6502_v52, %v2912_v46  ;;  %v4940_v52 = vld [vmem:[%s7480_s6] sm:$0xff] }
0x1335   :  { %4453 = vmatmul.msk.f32.gmra.mxu3 %vm179_vm2, %v2954_v61 }
0x133a   :  { %v2915_v4 = vpop.f32.mrf.mxu2 }
0x133b   :  { %v2955_v56 = vmul.f32 %v6496_v51, %v2915_v4  ;;  %v4948_v4 = vld [vmem:[%s7480_s6 + $0x40] sm:$0xff] }
0x133d   :  { %4454 = vmatmul.msk.f32.gmra.mxu3 %vm179_vm2, %v2955_v56 }
0x1342   :  { %v2918_v49 = vpop.f32.mrf.mxu2 }
0x1343   :  { %v2956_v28 = vmul.f32 %v6490_v42, %v2918_v49  ;;  %v4941_v42 = vld [vmem:[%s7480_s6 + $0x8] sm:$0xff] }
0x1345   :  { %4455 = vmatmul.msk.f32.gmra.mxu3 %vm179_vm2, %v2956_v28 }
0x134a   :  { %v2921_v25 = vpop.f32.mrf.mxu2 }
0x134b   :  { %v2957_v29 = vmul.f32 %v6484_v54, %v2921_v25  ;;  %v4949_v25 = vld [vmem:[%s7480_s6 + $0x48] sm:$0xff] }
0x134d   :  { %4456 = vmatmul.msk.f32.gmra.mxu3 %vm179_vm2, %v2957_v29 }
0x1352   :  { %v2924_v54 = vpop.f32.mrf.mxu2 }
0x1353   :  { %v2958_v43 = vmul.f32 %v6478_v16, %v2924_v54 }
0x1355   :  { %4457 = vmatmul.msk.f32.gmra.mxu3 %vm179_vm2, %v2958_v43  ;;  %v4950_v43 = vld [vmem:[%s7480_s6 + $0x60] sm:$0xff] }
0x135a   :  { %v2927_v30 = vpop.f32.mrf.mxu2 }
0x135b   :  { %v2959_v48 = vmul.f32 %v6472_v1, %v2927_v30 }
0x135d   :  { %4458 = vmatmul.msk.f32.gmra.mxu3 %vm179_vm2, %v2959_v48 }
0x1362   :  { %v2930_v8 = vpop.f32.mrf.mxu2 }
0x1363   :  { %v2960_v27 = vmul.f32 %v6466_v3, %v2930_v8  ;;  %v4945_v3 = vld [vmem:[%s7480_s6 + $0x28] sm:$0xff] }
0x1365   :  { %4459 = vmatmul.msk.f32.gmra.mxu3 %vm179_vm2, %v2960_v27 }
0x136a   :  { %v2933_v20 = vpop.f32.mrf.mxu2 }
0x136b   :  { %v2961_v53 = vmul.f32 %v6598_v40, %v2933_v20 }
0x136d   :  { %4460 = vmatmul.msk.f32.gmra.mxu3 %vm179_vm2, %v2961_v53 }
0x1370   :  { %v3056_v19 = vpop.f32.mrf.mxu3 }
0x1371   :  { %v6885_v58 = vadd.f32 %v4940_v52, %v3056_v19 }
0x1373   :  { %v3116_v51 = vsel %vm215_vm4, %v6885_v58, -inf }
0x1374   :  { %3117 = vmax.xlane.f32.xlu0 %v3116_v51 }
0x1378   :  { %v3059_v57 = vpop.f32.mrf.mxu3 }
0x1379   :  { %v6892_v12 = vadd.f32 %v4941_v42, %v3059_v57  ;;  %v2936_v57 = vpop.f32.mrf.mxu2 }
0x137a   :  { %v2962_v42 = vmul.f32 %v6592_v5, %v2936_v57  ;;  %v4951_v5 = vld [vmem:[%s7480_s6 + $0x50] sm:$0xff] }
0x137b   :  { %v3119_v26 = vsel %vm215_vm4, %v6892_v12, -inf }
0x137c   :  { %3120 = vmax.xlane.f32.xlu2 %v3119_v26  ;;  %4461 = vmatmul.msk.f32.gmra.mxu3 %vm179_vm2, %v2962_v42 }
0x1380   :  { %v3062_v34 = vpop.f32.mrf.mxu3 }
0x1381   :  { %v6901_v59 = vadd.f32 %v4942_v7, %v3062_v34  ;;  %v2939_v34 = vpop.f32.mrf.mxu2 }
0x1383   :  { %v3122_v15 = vsel %vm215_vm4, %v6901_v59, -inf }
0x1384   :  { %3123 = vmax.xlane.f32.xlu1 %v3122_v15 }
0x1388   :  { %v3065_v16 = vpop.f32.mrf.mxu3 }
0x1389   :  { %v6910_v6 = vadd.f32 %v4943_v44, %v3065_v16 }
0x138b   :  { %v3125_v36 = vsel %vm215_vm4, %v6910_v6, -inf }
0x138c   :  { %3126 = vmax.xlane.f32.xlu0 %v3125_v36 }
0x1390   :  { %v3068_v1 = vpop.f32.mrf.mxu3 }
0x1391   :  { %v6919_v10 = vadd.f32 %v4944_v22, %v3068_v1 }
0x1393   :  { %v3128_v62 = vsel %vm215_vm4, %v6919_v10, -inf }
0x1394   :  { %3129 = vmax.xlane.f32.xlu2 %v3128_v62 }
0x1398   :  { %v3071_v47 = vpop.f32.mrf.mxu3 }
0x1399   :  { %v6926_v41 = vadd.f32 %v4945_v3, %v3071_v47 }
0x139b   :  { %v3131_v9 = vsel %vm215_vm4, %v6926_v41, -inf }
0x139c   :  { %3132 = vmax.xlane.f32.xlu0 %v3131_v9 }
0x13a0   :  { %v3074_v18 = vpop.f32.mrf.mxu3 }
0x13a1   :  { %v6935_v23 = vadd.f32 %v4946_v63, %v3074_v18 }
0x13a3   :  { %v3134_v55 = vsel %vm215_vm4, %v6935_v23, -inf }
0x13a4   :  { %3135 = vmax.xlane.f32.xlu1 %v3134_v55 }
0x13a8   :  { %v3077_v21 = vpop.f32.mrf.mxu3 }
0x13a9   :  { %v6942_v46 = vadd.f32 %v4947_v45, %v3077_v21 }
0x13ab   :  { %v3137_v40 = vsel %vm215_vm4, %v6942_v46, -inf }
0x13ac   :  { %3138 = vmax.xlane.f32.xlu0 %v3137_v40 }
0x13b0   :  { %v3080_v61 = vpop.f32.mrf.mxu3 }
0x13b1   :  { %v6949_v56 = vadd.f32 %v4948_v4, %v3080_v61 }
0x13b3   :  { %v3140_v49 = vsel %vm215_vm4, %v6949_v56, -inf }
0x13b4   :  { %3141 = vmax.xlane.f32.xlu2 %v3140_v49 }
0x13b8   :  { %v3083_v28 = vpop.f32.mrf.mxu3 }
0x13b9   :  { %v6956_v29 = vadd.f32 %v4949_v25, %v3083_v28 }
0x13bb   :  { %v3143_v19 = vsel %vm215_vm4, %v6956_v29, -inf }
0x13bc   :  { %3144 = vmax.xlane.f32.xlu1 %v3143_v19 }
0x13c0   :  { %3600 = vrot.lane.b32.xlu0 %v6765_v35, %s4988_s0  ;;  %v3086_v52 = vpop.f32.mrf.mxu3  ;;  %v2963_v35 = vmul.f32 %v6586_v32, %v2939_v34 }
0x13c1   :  { %v6978_v30 = vadd.f32 %v4951_v5, %v3086_v52 }
0x13c2   :  { %4462 = vmatmul.msk.f32.gmra.mxu3 %vm179_vm2, %v2963_v35 }
0x13c3   :  { %v3146_v15 = vsel %vm215_vm4, %v6978_v30, -inf }
0x13c8   :  { %v6962_v51 = vpop.f32.mrf.mxu3 }
0x13d0   :  { %v3092_v54 = vpop.f32.mrf.mxu3 }
0x13d1   :  { %v6969_v26 = vadd.f32 %v4950_v43, %v3092_v54 }
0x13d3   :  { %v3152_v7 = vsel %vm215_vm4, %v6969_v26, -inf }
0x13d4   :  { %3153 = vmax.xlane.f32.xlu1 %v3152_v7 }
0x13d8   :  { %v3095_v28 = vpop.f32.mrf.mxu3 }
0x13e0   :  { %v3098_v57 = vpop.f32.mrf.mxu3 }
0x13e7   :  { %v3118_v48 = vpop.xlane.xlu0 %3117 }
0x13e8   :  { %v3176_v16 = vsub.f32 %v6885_v58, %v3118_v48  ;;  %v3101_v5 = vpop.f32.mrf.mxu3 }
0x13ea   :  { %v3196_v44 = vmul.f32 1.442695, %v3176_v16  ;;  %3147 = vmax.xlane.f32.xlu0 %v3146_v15  ;;  %v4953_v16 = vld [vmem:[%s7480_s6 + $0x70] sm:$0xff] }
0x13ec   :  { %4740 = vpow2.f32 %v3196_v44  ;;  %v7039_v44 = vadd.f32 %v4953_v16, %v3098_v57  ;;  %v4957_v16 = vld [vmem:[%s7480_s6 + $0x90] sm:$0xff] }
0x13ef   :  { %v3121_v8 = vpop.xlane.xlu2 %3120 }
0x13f0   :  { %v3177_v32 = vsub.f32 %v6892_v12, %v3121_v8  ;;  %v4954_v8 = vld [vmem:[%s7480_s6 + $0x78] sm:$0xff] }
0x13f2   :  { %v6984_v27 = vpop.eup %4740  ;;  %v3198_v36 = vmul.f32 1.442695, %v3177_v32  ;;  %v7044_v32 = vadd.f32 %v4954_v8, %v3101_v5 }
0x13f3   :  { %v3236_v1 = vsel %vm215_vm4, %v6984_v27, 0.0 }
0x13f4   :  { %4742 = vpow2.f32 %v3198_v36  ;;  %3237 = vadd.xlane.f32.xlu2 %v3236_v1 }
0x13f7   :  { %v3124_v22 = vpop.xlane.xlu1 %3123 }
0x13f8   :  { %v3178_v62 = vsub.f32 %v6901_v59, %v3124_v22  ;;  %v2942_v59 = vpop.f32.mrf.mxu2 }
0x13f9   :  { %v2964_v63 = vmul.f32 %v6580_v50, %v2942_v59 }
0x13fa   :  { %v6989_v47 = vpop.eup %4742  ;;  %v3200_v58 = vmul.f32 1.442695, %v3178_v62 }
0x13fb   :  { %v3239_v3 = vsel %vm215_vm4, %v6989_v47, 0.0  ;;  %4463 = vmatmul.msk.f32.gmra.mxu3 %vm179_vm2, %v2964_v63 }
0x13fc   :  { %4744 = vpow2.f32 %v3200_v58  ;;  %3240 = vadd.xlane.f32.xlu1 %v3239_v3  ;;  %v3158_v58 = vsel %vm215_vm4, %v7039_v44, -inf  ;;  %v3161_v3 = vsel %vm215_vm4, %v7044_v32, -inf }
0x13ff   :  { %v3127_v12 = vpop.xlane.xlu0 %3126 }
0x1400   :  { %v3179_v9 = vsub.f32 %v6910_v6, %v3127_v12 }
0x1402   :  { %v6994_v20 = vpop.eup %4744  ;;  %v3202_v53 = vmul.f32 1.442695, %v3179_v9 }
0x1403   :  { %v3242_v18 = vsel %vm215_vm4, %v6994_v20, 0.0 }
0x1404   :  { %4746 = vpow2.f32 %v3202_v53  ;;  %3243 = vadd.xlane.f32.xlu1 %v3242_v18  ;;  %v3104_v18 = vpop.f32.mrf.mxu3 }
0x1407   :  { %v3130_v55 = vpop.xlane.xlu2 %3129 }
0x1408   :  { %v3180_v21 = vsub.f32 %v6919_v10, %v3130_v55  ;;  %v4956_v55 = vld [vmem:[%s7480_s6 + $0x80] sm:$0xff] }
0x140a   :  { %v7001_v45 = vpop.eup %4746  ;;  %v3204_v40 = vmul.f32 1.442695, %v3180_v21  ;;  %v7071_v21 = vadd.f32 %v4956_v55, %v3104_v18 }
0x140b   :  { %v3245_v6 = vsel %vm215_vm4, %v7001_v45, 0.0 }
0x140c   :  { %4748 = vpow2.f32 %v3204_v40  ;;  %4537 = vrot.lane.b32.xlu2 %v4536_v24, %s4988_s0  ;;  %3246 = vadd.xlane.f32.xlu1 %v3245_v6  ;;  %v3164_v40 = vsel %vm215_vm4, %v7071_v21, -inf }
0x140f   :  { %v3133_v61 = vpop.xlane.xlu0 %3132 }
0x1410   :  { %v3181_v50 = vsub.f32 %v6926_v41, %v3133_v61 }
0x1412   :  { %v7010_v4 = vpop.eup %4748  ;;  %v3206_v49 = vmul.f32 1.442695, %v3181_v50 }
0x1413   :  { %v3248_v10 = vsel %vm215_vm4, %v7010_v4, 0.0 }
0x1414   :  { %4750 = vpow2.f32 %v3206_v49  ;;  %3249 = vadd.xlane.f32.xlu1 %v3248_v10 }
0x1417   :  { %v3136_v25 = vpop.xlane.xlu1 %3135 }
0x1418   :  { %v3182_v19 = vsub.f32 %v6935_v23, %v3136_v25  ;;  %v4952_v23 = vld [vmem:[%s7480_s6 + $0x68] sm:$0xff]  ;;  %v7077_v25 = vpop.f32.mrf.mxu3 }
0x1419   :  { %v7027_v34 = vadd.f32 %v4952_v23, %v3095_v28 }
0x141a   :  { %v7015_v52 = vpop.eup %4750  ;;  %v3208_v31 = vmul.f32 1.442695, %v3182_v19 }
0x141b   :  { %v3251_v33 = vsel %vm215_vm4, %v7015_v52, 0.0  ;;  %v3155_v35 = vsel %vm215_vm4, %v7027_v34, -inf }
0x141c   :  { %4752 = vpow2.f32 %v3208_v31  ;;  %3252 = vadd.xlane.f32.xlu1 %v3251_v33 }
0x141f   :  { %v3139_v24 = vpop.xlane.xlu0 %3138 }
0x1420   :  { %v3183_v41 = vsub.f32 %v6942_v46, %v3139_v24 }
0x1422   :  { %v7020_v42 = vpop.eup %4752  ;;  %v3210_v54 = vmul.f32 1.442695, %v3183_v41 }
0x1423   :  { %v3254_v43 = vsel %vm215_vm4, %v7020_v42, 0.0 }
0x1424   :  { %4754 = vpow2.f32 %v3210_v54  ;;  %3255 = vadd.xlane.f32.xlu1 %v3254_v43 }
0x1427   :  { %v3142_v7 = vpop.xlane.xlu2 %3141 }
0x1428   :  { %v3184_v15 = vsub.f32 %v6949_v56, %v3142_v7  ;;  %v4955_v56 = vld [vmem:[%s7480_s6 + $0x58] sm:$0xff] }
0x1429   :  { %v7050_v22 = vadd.f32 %v4955_v56, %v6962_v51 }
0x142a   :  { %v7031_v46 = vpop.eup %4754  ;;  %v3212_v1 = vmul.f32 1.442695, %v3184_v15 }
0x142b   :  { %v3257_v48 = vsel %vm215_vm4, %v7031_v46, 0.0  ;;  %v3149_v51 = vsel %vm215_vm4, %v7050_v22, -inf }
0x142c   :  { %3258 = vadd.xlane.f32.xlu0 %v3257_v48  ;;  %3156 = vmax.xlane.f32.xlu1 %v3155_v35  ;;  %4756 = vpow2.f32 %v3212_v1 }
0x142f   :  { %v3145_v36 = vpop.xlane.xlu1 %3144 }
0x1430   :  { %v3185_v62 = vsub.f32 %v6956_v29, %v3145_v36 }
0x1432   :  { %v3214_v12 = vmul.f32 1.442695, %v3185_v62  ;;  %v3601_v9 = vpop.permute.xlu0 %3600  ;;  %v7060_v53 = vpop.eup %4756 }
0x1433   :  { %4464 = vmatpush.msk.msra.mxu0 %vm276_vm3, %v3601_v9  ;;  %v3260_v63 = vsel %vm215_vm4, %v7060_v53, 0.0 }
0x1434   :  { %4758 = vpow2.f32 %v3214_v12  ;;  %3159 = vmax.xlane.f32.xlu1 %v3158_v58  ;;  %3162 = vmax.xlane.f32.xlu0 %v3161_v3 }
0x1435   :  { %3150 = vmax.xlane.f32.xlu2 %v3149_v51 }
0x143a   :  { %v7062_v29 = vpop.eup %4758 }
0x143b   :  { %v3263_v59 = vsel %vm215_vm4, %v7062_v29, 0.0 }
0x143c   :  { %3264 = vadd.xlane.f32.xlu1 %v3263_v59 }
0x143d   :  { %3261 = vadd.xlane.f32.xlu2 %v3260_v63 }
0x1444   :  { %3165 = vmax.xlane.f32.xlu1 %v3164_v40 }
0x1445   :  { %v3110_v43 = vpop.f32.mrf.mxu3 }
0x1446   :  { %v7090_v8 = vadd.f32 %v4957_v16, %v3110_v43 }
0x1447   :  { %v3154_v6 = vpop.xlane.xlu1 %3153 }
0x1448   :  { %v3188_v49 = vsub.f32 %v6969_v26, %v3154_v6  ;;  %v3170_v12 = vsel %vm215_vm4, %v7090_v8, -inf }
0x144a   :  { %v3220_v28 = vmul.f32 1.442695, %v3188_v49 }
0x145d   :  { %v3148_v61 = vpop.xlane.xlu0 %3147 }
0x145e   :  { %v3186_v50 = vsub.f32 %v6978_v30, %v3148_v61 }
0x1460   :  { %v3216_v10 = vmul.f32 1.442695, %v3186_v50 }
0x1462   :  { %4760 = vpow2.f32 %v3216_v10 }
0x1463   :  { %4762 = vpow2.f32 %v3220_v28 }
0x1467   :  { %v3238_v19 = vpop.xlane.xlu2 %3237 }
0x1468   :  { %v7079_v31 = vpop.eup %4760  ;;  %4764 = vrcp.f32 %v3238_v19  ;;  %v3307_v35 = vand.u32 2147483648, %v3238_v19  ;;  %v3305_v15 = vand.u32 2147483647, %v3238_v19  ;;  %vm3301_vm0 = vweird.f32 %v3238_v19 }
0x1469   :  { %v3266_v33 = vsel %vm215_vm4, %v7079_v31, 0.0  ;;  %v7083_v24 = vpop.eup %4762 }
0x146a   :  { %3267 = vadd.xlane.f32.xlu2 %v3266_v33  ;;  %v3272_v7 = vsel %vm215_vm4, %v7083_v24, 0.0  ;;  %v3308_v56 = vor.u32 1.1754944e-38, %v3307_v35  ;;  %vm3306_vm6 = vcmp.eq.f32.partialorder %v3305_v15, 8.507059e+37 }
0x146e   :  { %v4765_v41 = vpop.eup %4764 }
0x146f   :  { %v3297_v30 = vmul.f32 %v4765_v41, %v3238_v19  ;;  %v4538_v57 = vpop.permute.xlu2 %4537  ;;  %v3241_v26 = vpop.xlane.xlu1 %3240  ;;  %vm3302_vm15 = vweird.f32 %v4765_v41 }
0x1470   :  { %v4539_v54 = vunpack.i.l.bf16 %v4538_v57  ;;  %4766 = vrcp.f32 %v3241_v26  ;;  %v4540_v5 = vunpack.i.h.bf16 %v4538_v57  ;;  %vm3303_vm1 = vmor %vm3301_vm0, %vm3302_vm15  ;;  %v3322_v63 = vand.u32 2147483648, %v3241_v26 }
0x1471   :  { %v3298_v23 = vsub.f32 1.0, %v3297_v30  ;;  %v3320_v55 = vand.u32 2147483647, %v3241_v26  ;;  %vm3316_vm9 = vweird.f32 %v3241_v26 }
0x1472   :  { %3680 = vmatpush.msra.mxu0 %v4539_v54  ;;  %3273 = vadd.xlane.f32.xlu2 %v3272_v7  ;;  %v3323_v61 = vor.u32 1.1754944e-38, %v3322_v63 }
0x1473   :  { %v3299_v48 = vmul.f32 %v4765_v41, %v3298_v23  ;;  %vm3321_vm11 = vcmp.eq.f32.partialorder %v3320_v55, 8.507059e+37 }
0x1474   :  { %3681 = vmatpush.msra.mxu0 %v4540_v5 }
0x1475   :  { %v3300_v36 = vadd.f32 %v4765_v41, %v3299_v48 }
0x1476   :  { %v4767_v1 = vpop.eup %4766 }
0x1477   :  { %v3304_v62 = vsel %vm3303_vm1, %v4765_v41, %v3300_v36  ;;  %v3312_v58 = vmul.f32 %v4767_v1, %v3241_v26  ;;  %v3244_v3 = vpop.xlane.xlu1 %3243  ;;  %vm3317_vm8 = vweird.f32 %v4767_v1 }
0x1478   :  { %v3309_v9 = vsel %vm3306_vm6, %v3308_v56, %v3304_v62  ;;  %4768 = vrcp.f32 %v3244_v3  ;;  %vm3318_vm10 = vmor %vm3316_vm9, %vm3317_vm8  ;;  %v3337_v41 = vand.u32 2147483648, %v3244_v3  ;;  %v3335_v30 = vand.u32 2147483647, %v3244_v3 }
0x1479   :  { %v3310_v51 = vmul.f32 %v6984_v27, %v3309_v9  ;;  %v3313_v18 = vsub.f32 1.0, %v3312_v58  ;;  %vm3331_vm13 = vweird.f32 %v3244_v3 }
0x147a   :  { %3171 = vmax.xlane.f32.xlu2 %v3170_v12  ;;  %v3338_v54 = vor.u32 1.1754944e-38, %v3337_v41  ;;  %vm3336_vm15 = vcmp.eq.f32.partialorder %v3335_v30, 8.507059e+37 }
0x147b   :  { %v3314_v59 = vmul.f32 %v4767_v1, %v3313_v18  ;;  %4465 = vmatmul.msk.f32.vlgmr.msra.gmra.mxu0 %vm215_vm4, %v3310_v51 }
0x147d   :  { %v3315_v40 = vadd.f32 %v4767_v1, %v3314_v59 }
0x147e   :  { %v4769_v6 = vpop.eup %4768 }
0x147f   :  { %v3327_v50 = vmul.f32 %v4769_v6, %v3244_v3  ;;  %v3247_v49 = vpop.xlane.xlu1 %3246  ;;  %v3319_v10 = vsel %vm3318_vm10, %v4767_v1, %v3315_v40  ;;  %vm3332_vm12 = vweird.f32 %v4769_v6 }
0x1480   :  { %4770 = vrcp.f32 %v3247_v49  ;;  %v3324_v27 = vsel %vm3321_vm11, %v3323_v61, %v3319_v10  ;;  %vm3333_vm14 = vmor %vm3331_vm13, %vm3332_vm12  ;;  %v3352_v15 = vand.u32 2147483648, %v3247_v49  ;;  %v3350_v16 = vand.u32 2147483647, %v3247_v49 }
0x1481   :  { %v3328_v28 = vsub.f32 1.0, %v3327_v50  ;;  %v3325_v19 = vmul.f32 %v6989_v47, %v3324_v27  ;;  %vm3346_vm1 = vweird.f32 %v3247_v49 }
0x1482   :  { %v3353_v56 = vor.u32 1.1754944e-38, %v3352_v15  ;;  %vm3351_vm8 = vcmp.eq.f32.partialorder %v3350_v16, 8.507059e+37 }
0x1483   :  { %v3329_v33 = vmul.f32 %v4769_v6, %v3328_v28  ;;  %4466 = vmatmul.msk.f32.gmra.mxu0 %vm215_vm4, %v3325_v19 }
0x1485   :  { %v3330_v57 = vadd.f32 %v4769_v6, %v3329_v33 }
0x1486   :  { %v4771_v26 = vpop.eup %4770 }
0x1487   :  { %v3342_v43 = vmul.f32 %v4771_v26, %v3247_v49  ;;  %v3250_v23 = vpop.xlane.xlu1 %3249  ;;  %v3334_v7 = vsel %vm3333_vm14, %v4769_v6, %v3330_v57  ;;  %vm3347_vm0 = vweird.f32 %v4771_v26 }
0x1488   :  { %4772 = vrcp.f32 %v3250_v23  ;;  %v3339_v5 = vsel %vm3336_vm15, %v3338_v54, %v3334_v7  ;;  %vm3348_vm6 = vmor %vm3346_vm1, %vm3347_vm0  ;;  %v3367_v18 = vand.u32 2147483648, %v3250_v23  ;;  %v3365_v59 = vand.u32 2147483647, %v3250_v23 }
0x1489   :  { %v3343_v35 = vsub.f32 1.0, %v3342_v43  ;;  %v3340_v47 = vmul.f32 %v6994_v20, %v3339_v5  ;;  %vm3361_vm10 = vweird.f32 %v3250_v23 }
0x148a   :  { %v3368_v40 = vor.u32 1.1754944e-38, %v3367_v18  ;;  %vm3366_vm12 = vcmp.eq.f32.partialorder %v3365_v59, 8.507059e+37 }
0x148b   :  { %v3344_v48 = vmul.f32 %v4771_v26, %v3343_v35  ;;  %4467 = vmatmul.msk.f32.gmra.mxu0 %vm215_vm4, %v3340_v47 }
0x148d   :  { %v3345_v36 = vadd.f32 %v4771_v26, %v3344_v48 }
0x148e   :  { %v4773_v1 = vpop.eup %4772 }
0x148f   :  { %v3357_v62 = vmul.f32 %v4773_v1, %v3250_v23  ;;  %v3253_v58 = vpop.xlane.xlu1 %3252  ;;  %v3349_v3 = vsel %vm3348_vm6, %v4771_v26, %v3345_v36  ;;  %vm3362_vm9 = vweird.f32 %v4773_v1 }
0x1490   :  { %4774 = vrcp.f32 %v3253_v58  ;;  %v3354_v9 = vsel %vm3351_vm8, %v3353_v56, %v3349_v3  ;;  %vm3363_vm11 = vmor %vm3361_vm10, %vm3362_vm9  ;;  %v3382_v27 = vand.u32 2147483648, %v3253_v58  ;;  %v3380_v19 = vand.u32 2147483647, %v3253_v58 }
0x1491   :  { %v3358_v12 = vsub.f32 1.0, %v3357_v62  ;;  %v3355_v20 = vmul.f32 %v7001_v45, %v3354_v9  ;;  %vm3376_vm14 = vweird.f32 %v3253_v58 }
0x1492   :  { %v3383_v30 = vor.u32 1.1754944e-38, %v3382_v27  ;;  %vm3381_vm0 = vcmp.eq.f32.partialorder %v3380_v19, 8.507059e+37 }
0x1493   :  { %v3359_v51 = vmul.f32 %v4773_v1, %v3358_v12  ;;  %4468 = vmatmul.msk.f32.gmra.mxu0 %vm215_vm4, %v3355_v20 }
0x1495   :  { %v3360_v63 = vadd.f32 %v4773_v1, %v3359_v51 }
0x1496   :  { %v4775_v55 = vpop.eup %4774 }
0x1497   :  { %v3372_v6 = vmul.f32 %v4775_v55, %v3253_v58  ;;  %v3256_v61 = vpop.xlane.xlu1 %3255  ;;  %v3364_v50 = vsel %vm3363_vm11, %v4773_v1, %v3360_v63  ;;  %vm3377_vm13 = vweird.f32 %v4775_v55 }
0x1498   :  { %4776 = vrcp.f32 %v3256_v61  ;;  %v3369_v10 = vsel %vm3366_vm12, %v3368_v40, %v3364_v50  ;;  %vm3378_vm15 = vmor %vm3376_vm14, %vm3377_vm13  ;;  %v3397_v35 = vand.u32 2147483648, %v3256_v61  ;;  %v3395_v48 = vand.u32 2147483647, %v3256_v61 }
0x1499   :  { %v3373_v49 = vsub.f32 1.0, %v3372_v6  ;;  %v3370_v45 = vmul.f32 %v7010_v4, %v3369_v10  ;;  %vm3391_vm6 = vweird.f32 %v3256_v61 }
0x149a   :  { %v3398_v1 = vor.u32 1.1754944e-38, %v3397_v35  ;;  %vm3396_vm9 = vcmp.eq.f32.partialorder %v3395_v48, 8.507059e+37 }
0x149b   :  { %v3374_v28 = vmul.f32 %v4775_v55, %v3373_v49  ;;  %4469 = vmatmul.msk.f32.gmra.mxu0 %vm215_vm4, %v3370_v45 }
0x149d   :  { %v3375_v33 = vadd.f32 %v4775_v55, %v3374_v28 }
0x149e   :  { %v4777_v41 = vpop.eup %4776 }
0x149f   :  { %v3387_v57 = vmul.f32 %v4777_v41, %v3256_v61  ;;  %v3259_v26 = vpop.xlane.xlu0 %3258  ;;  %v3157_v54 = vpop.xlane.xlu1 %3156  ;;  %v3379_v43 = vsel %vm3378_vm15, %v4775_v55, %v3375_v33  ;;  %vm3392_vm1 = vweird.f32 %v4777_v41 }
0x14a0   :  { %4778 = vrcp.f32 %v3259_v26  ;;  %v3189_v4 = vsub.f32 %v7027_v34, %v3157_v54  ;;  %v3384_v7 = vsel %vm3381_vm0, %v3383_v30, %v3379_v43  ;;  %vm3393_vm8 = vmor %vm3391_vm6, %vm3392_vm1  ;;  %v3412_v40 = vand.u32 2147483648, %v3259_v26 }
0x14a1   :  { %v3388_v23 = vsub.f32 1.0, %v3387_v57  ;;  %v3385_v5 = vmul.f32 %v7015_v52, %v3384_v7  ;;  %vm3406_vm11 = vweird.f32 %v3259_v26  ;;  %v3410_v50 = vand.u32 2147483647, %v3259_v26 }
0x14a2   :  { %v3222_v15 = vmul.f32 1.442695, %v3189_v4  ;;  %v3413_v45 = vor.u32 1.1754944e-38, %v3412_v40 }
0x14a3   :  { %v3389_v47 = vmul.f32 %v4777_v41, %v3388_v23  ;;  %4470 = vmatmul.msk.f32.gmra.mxu0 %vm215_vm4, %v3385_v5  ;;  %vm3411_vm13 = vcmp.eq.f32.partialorder %v3410_v50, 8.507059e+37 }
0x14a4   :  { %4780 = vpow2.f32 %v3222_v15 }
0x14a5   :  { %v3390_v16 = vadd.f32 %v4777_v41, %v3389_v47 }
0x14a6   :  { %v4779_v36 = vpop.eup %4778 }
0x14a7   :  { %v3402_v56 = vmul.f32 %v4779_v36, %v3259_v26  ;;  %v3160_v62 = vpop.xlane.xlu1 %3159  ;;  %v3163_v34 = vpop.xlane.xlu0 %3162  ;;  %v3394_v58 = vsel %vm3393_vm8, %v4777_v41, %v3390_v16  ;;  %vm3407_vm10 = vweird.f32 %v4779_v36 }
0x14a8   :  { %v3191_v3 = vsub.f32 %v7044_v32, %v3163_v34  ;;  %v3151_v52 = vpop.xlane.xlu2 %3150  ;;  %v3399_v12 = vsel %vm3396_vm9, %v3398_v1, %v3394_v58  ;;  %v3113_v32 = vpop.f32.mrf.mxu3  ;;  %vm3408_vm12 = vmor %vm3406_vm11, %vm3407_vm10  ;;  %v3190_v33 = vsub.f32 %v7039_v44, %v3160_v62 }
0x14a9   :  { %v3403_v9 = vsub.f32 1.0, %v3402_v56  ;;  %v3187_v20 = vsub.f32 %v7050_v22, %v3151_v52  ;;  %v3400_v51 = vmul.f32 %v7020_v42, %v3399_v12  ;;  %v4958_v22 = vld [vmem:[%s7480_s6 + $0x98] sm:$0xff] }
0x14aa   :  { %v3226_v18 = vmul.f32 1.442695, %v3191_v3  ;;  %v7110_v59 = vpop.eup %4780  ;;  %v7118_v49 = vadd.f32 %v4958_v22, %v3113_v32  ;;  %v3224_v4 = vmul.f32 1.442695, %v3190_v33 }
0x14ab   :  { %v3404_v63 = vmul.f32 %v4779_v36, %v3403_v9  ;;  %v3218_v55 = vmul.f32 1.442695, %v3187_v20  ;;  %4471 = vmatmul.msk.f32.gmra.mxu0 %vm215_vm4, %v3400_v51  ;;  %v3275_v6 = vsel %vm215_vm4, %v7110_v59, 0.0 }
0x14ac   :  { %4782 = vpow2.f32 %v3226_v18  ;;  %3276 = vadd.xlane.f32.xlu1 %v3275_v6  ;;  %v3173_v30 = vsel %vm215_vm4, %v7118_v49, -inf }
0x14ad   :  { %v3405_v61 = vadd.f32 %v4779_v36, %v3404_v63  ;;  %4784 = vpow2.f32 %v3218_v55 }
0x14af   :  { %v3265_v42 = vpop.xlane.xlu1 %3264  ;;  %v3409_v10 = vsel %vm3408_vm12, %v4779_v36, %v3405_v61 }
0x14b0   :  { %4786 = vrcp.f32 %v3265_v42  ;;  %v3262_v28 = vpop.xlane.xlu2 %3261  ;;  %v3414_v27 = vsel %vm3411_vm13, %v3413_v45, %v3409_v10  ;;  %v3442_v9 = vand.u32 2147483648, %v3265_v42  ;;  %vm3436_vm8 = vweird.f32 %v3265_v42 }
0x14b1   :  { %4788 = vrcp.f32 %v3262_v28  ;;  %v3415_v41 = vmul.f32 %v7031_v46, %v3414_v27  ;;  %v4959_v46 = vld [vmem:[%s7480_s6 + $0x88] sm:$0xff]  ;;  %v3425_v15 = vand.u32 2147483647, %v3262_v28  ;;  %v3427_v16 = vand.u32 2147483648, %v3262_v28 }
0x14b2   :  { %v7120_v19 = vpop.eup %4782  ;;  %v7137_v23 = vadd.f32 %v4959_v46, %v7077_v25  ;;  %4790 = vpow2.f32 %v3224_v4  ;;  %vm3421_vm15 = vweird.f32 %v3262_v28  ;;  %v3440_v51 = vand.u32 2147483647, %v3265_v42 }
0x14b3   :  { %v7126_v57 = vpop.eup %4784  ;;  %v3281_v26 = vsel %vm215_vm4, %v7120_v19, 0.0  ;;  %4472 = vmatmul.msk.f32.gmra.mxu0 %vm215_vm4, %v3415_v41  ;;  %vm3426_vm1 = vcmp.eq.f32.partialorder %v3425_v15, 8.507059e+37  ;;  %v3428_v25 = vor.u32 1.1754944e-38, %v3427_v16  ;;  %v3443_v63 = vor.u32 1.1754944e-38, %v3442_v9 }
0x14b4   :  { %3282 = vadd.xlane.f32.xlu2 %v3281_v26  ;;  %v3269_v54 = vsel %vm215_vm4, %v7126_v57, 0.0  ;;  %3174 = vmax.xlane.f32.xlu1 %v3173_v30  ;;  %v3167_v36 = vsel %vm215_vm4, %v7137_v23, -inf  ;;  %vm3441_vm10 = vcmp.eq.f32.partialorder %v3440_v51, 8.507059e+37 }
0x14b5   :  { %3270 = vadd.xlane.f32.xlu0 %v3269_v54 }
0x14b6   :  { %v4787_v43 = vpop.eup %4786 }
0x14b7   :  { %v4789_v44 = vpop.eup %4788  ;;  %v3432_v7 = vmul.f32 %v4787_v43, %v3265_v42  ;;  %v3166_v47 = vpop.xlane.xlu1 %3165  ;;  %vm3437_vm6 = vweird.f32 %v4787_v43 }
0x14b8   :  { %v3417_v35 = vmul.f32 %v4789_v44, %v3262_v28  ;;  %vm3422_vm14 = vweird.f32 %v4789_v44  ;;  %v3192_v62 = vsub.f32 %v7071_v21, %v3166_v47  ;;  %v7142_v12 = vpop.eup %4790  ;;  %vm3438_vm9 = vmor %vm3436_vm8, %vm3437_vm6 }
0x14b9   :  { %v3433_v5 = vsub.f32 1.0, %v3432_v7  ;;  %vm3423_vm0 = vmor %vm3421_vm15, %vm3422_vm14  ;;  %v3278_v55 = vsel %vm215_vm4, %v7142_v12, 0.0 }
0x14ba   :  { %v3418_v48 = vsub.f32 1.0, %v3417_v35  ;;  %v3228_v3 = vmul.f32 1.442695, %v3192_v62 }
0x14bb   :  { %v3434_v1 = vmul.f32 %v4787_v43, %v3433_v5 }
0x14bc   :  { %v3419_v56 = vmul.f32 %v4789_v44, %v3418_v48  ;;  %4792 = vpow2.f32 %v3228_v3 }
0x14bd   :  { %3168 = vmax.xlane.f32.xlu0 %v3167_v36  ;;  %v3435_v58 = vadd.f32 %v4787_v43, %v3434_v1 }
0x14be   :  { %v3420_v34 = vadd.f32 %v4789_v44, %v3419_v56 }
0x14bf   :  { %v3439_v21 = vsel %vm3438_vm9, %v4787_v43, %v3435_v58 }
0x14c0   :  { %v3424_v52 = vsel %vm3423_vm0, %v4789_v44, %v3420_v34  ;;  %v3444_v40 = vsel %vm3441_vm10, %v3443_v63, %v3439_v21 }
0x14c1   :  { %v3429_v20 = vsel %vm3426_vm1, %v3428_v25, %v3424_v52  ;;  %v3445_v32 = vmul.f32 %v7062_v29, %v3444_v40 }
0x14c2   :  { %v3430_v18 = vmul.f32 %v7060_v53, %v3429_v20  ;;  %v7148_v6 = vpop.eup %4792 }
0x14c3   :  { %v3284_v53 = vsel %vm215_vm4, %v7148_v6, 0.0 }
0x14c4   :  { %4473 = vmatmul.msk.f32.gmra.mxu0 %vm215_vm4, %v3430_v18 }
0x14c5   :  { %3279 = vadd.xlane.f32.xlu0 %v3278_v55 }
0x14cc   :  { %4474 = vmatmul.msk.f32.gmra.mxu0 %vm215_vm4, %v3445_v32 }
0x14cd   :  { %3285 = vadd.xlane.f32.xlu0 %v3284_v53 }
0x14dd   :  { %v3268_v61 = vpop.xlane.xlu2 %3267 }
0x14de   :  { %4794 = vrcp.f32 %v3268_v61  ;;  %v3457_v45 = vand.u32 2147483648, %v3268_v61  ;;  %v3455_v27 = vand.u32 2147483647, %v3268_v61  ;;  %vm3451_vm12 = vweird.f32 %v3268_v61 }
0x14e0   :  { %v3458_v29 = vor.u32 1.1754944e-38, %v3457_v45  ;;  %vm3456_vm14 = vcmp.eq.f32.partialorder %v3455_v27, 8.507059e+37 }
0x14e4   :  { %v4795_v50 = vpop.eup %4794 }
0x14e5   :  { %v3447_v42 = vmul.f32 %v4795_v50, %v3268_v61  ;;  %v7154_v22 = vpop.xlane.xlu2 %3273  ;;  %vm3452_vm11 = vweird.f32 %v4795_v50 }
0x14e6   :  { %vm3453_vm13 = vmor %vm3451_vm12, %vm3452_vm11  ;;  %v3487_v55 = vand.u32 2147483648, %v7154_v22  ;;  %vm3481_vm9 = vweird.f32 %v7154_v22  ;;  %v3485_v53 = vand.u32 2147483647, %v7154_v22 }
0x14e7   :  { %v3448_v10 = vsub.f32 1.0, %v3447_v42 }
0x14e8   :  { %v3488_v45 = vor.u32 1.1754944e-38, %v3487_v55  ;;  %vm3486_vm11 = vcmp.eq.f32.partialorder %v3485_v53, 8.507059e+37 }
0x14e9   :  { %v3449_v28 = vmul.f32 %v4795_v50, %v3448_v10 }
0x14eb   :  { %v3450_v33 = vadd.f32 %v4795_v50, %v3449_v28 }
0x14ed   :  { %v3172_v41 = vpop.xlane.xlu2 %3171  ;;  %v3454_v30 = vsel %vm3453_vm13, %v4795_v50, %v3450_v33 }
0x14ee   :  { %v3194_v26 = vsub.f32 %v7090_v8, %v3172_v41  ;;  %v3459_v54 = vsel %vm3456_vm14, %v3458_v29, %v3454_v30 }
0x14ef   :  { %v3460_v43 = vmul.f32 %v7079_v31, %v3459_v54 }
0x14f0   :  { %v3232_v44 = vmul.f32 1.442695, %v3194_v26 }
0x14f1   :  { %4475 = vmatmul.msk.f32.gmra.mxu0 %vm215_vm4, %v3460_v43 }
0x14f2   :  { %4796 = vpow2.f32 %v3232_v44 }
0x14f3   :  { %4798 = vrcp.f32 %v7154_v22 }
0x14f8   :  { %v7159_v46 = vpop.eup %4796 }
0x14f9   :  { %v3290_v4 = vsel %vm215_vm4, %v7159_v46, 0.0  ;;  %v4799_v5 = vpop.eup %4798 }
0x14fa   :  { %3291 = vadd.xlane.f32.xlu2 %v3290_v4  ;;  %v3477_v48 = vmul.f32 %v4799_v5, %v7154_v22  ;;  %vm3482_vm6 = vweird.f32 %v4799_v5 }
0x14fb   :  { %vm3483_vm10 = vmor %vm3481_vm9, %vm3482_vm6 }
0x1512   :  { %4547 = vrot.lane.b32.xlu2 %v4546_v38, %s4989_s26  ;;  %v3478_v38 = vsub.f32 1.0, %v3477_v48 }
0x1514   :  { %v3479_v58 = vmul.f32 %v4799_v5, %v3478_v38 }
0x1516   :  { %v3480_v18 = vadd.f32 %v4799_v5, %v3479_v58 }
0x1518   :  { %v3484_v10 = vsel %vm3483_vm10, %v4799_v5, %v3480_v18 }
0x1519   :  { %v3489_v22 = vsel %vm3486_vm11, %v3488_v45, %v3484_v10 }
0x151a   :  { %v3490_v54 = vmul.f32 %v7083_v24, %v3489_v22 }
0x151f   :  { %v7167_v7 = vpop.xlane.xlu1 %3276 }
0x1520   :  { %v3502_v41 = vand.u32 2147483648, %v7167_v7  ;;  %vm3496_vm13 = vweird.f32 %v7167_v7  ;;  %v3500_v26 = vand.u32 2147483647, %v7167_v7 }
0x1527   :  { %v3175_v31 = vpop.xlane.xlu1 %3174  ;;  %v7182_v63 = vpop.xlane.xlu2 %3282 }
0x1528   :  { %v3195_v8 = vsub.f32 %v7118_v49, %v3175_v31  ;;  %v3271_v35 = vpop.xlane.xlu0 %3270  ;;  %v3503_v31 = vor.u32 1.1754944e-38, %v3502_v41  ;;  %vm3526_vm10 = vweird.f32 %v7182_v63 }
0x1529   :  { %4800 = vrcp.f32 %v3271_v35  ;;  %v3472_v25 = vand.u32 2147483648, %v3271_v35  ;;  %v3470_v52 = vand.u32 2147483647, %v3271_v35  ;;  %vm3466_vm0 = vweird.f32 %v3271_v35 }
0x152a   :  { %v3234_v47 = vmul.f32 1.442695, %v3195_v8  ;;  %4802 = vrcp.f32 %v7167_v7 }
0x152b   :  { %vm3471_vm8 = vcmp.eq.f32.partialorder %v3470_v52, 8.507059e+37 }
0x152c   :  { %4804 = vpow2.f32 %v3234_v47 }
0x152f   :  { %v4801_v15 = vpop.eup %4800 }
0x1530   :  { %v3462_v16 = vmul.f32 %v4801_v15, %v3271_v35  ;;  %v3169_v39 = vpop.xlane.xlu0 %3168  ;;  %v7173_v2 = vpop.eup %4802  ;;  %vm3467_vm15 = vweird.f32 %v4801_v15 }
0x1531   :  { %v3193_v36 = vsub.f32 %v7137_v23, %v3169_v39  ;;  %v3492_v3 = vmul.f32 %v7173_v2, %v7167_v7  ;;  %vm3468_vm1 = vmor %vm3466_vm0, %vm3467_vm15  ;;  %v3473_v23 = vor.u32 1.1754944e-38, %v3472_v25  ;;  %vm3497_vm12 = vweird.f32 %v7173_v2 }
0x1532   :  { %v7176_v1 = vpop.eup %4804  ;;  %v3463_v49 = vsub.f32 1.0, %v3462_v16  ;;  %vm3498_vm14 = vmor %vm3496_vm13, %vm3497_vm12  ;;  %vm3501_vm15 = vcmp.eq.f32.partialorder %v3500_v26, 8.507059e+37 }
0x1533   :  { %v3230_v56 = vmul.f32 1.442695, %v3193_v36  ;;  %v3293_v62 = vsel %vm215_vm4, %v7176_v1, 0.0  ;;  %v3493_v21 = vsub.f32 1.0, %v3492_v3 }
0x1534   :  { %v3464_v34 = vmul.f32 %v4801_v15, %v3463_v49  ;;  %3294 = vadd.xlane.f32.xlu0 %v3293_v62  ;;  %v3532_v62 = vand.u32 2147483648, %v7182_v63 }
0x1535   :  { %4806 = vpow2.f32 %v3230_v56  ;;  %v3494_v42 = vmul.f32 %v7173_v2, %v3493_v21  ;;  %v7207_v56 = vpop.f32.mrf.mxu0 }
0x1536   :  { %v3465_v9 = vadd.f32 %v4801_v15, %v3464_v34  ;;  %v3533_v3 = vor.u32 1.1754944e-38, %v3532_v62 }
0x1538   :  { %v3280_v20 = vpop.xlane.xlu0 %3279  ;;  %v3469_v51 = vsel %vm3468_vm1, %v4801_v15, %v3465_v9 }
0x1539   :  { %4808 = vrcp.f32 %v3280_v20  ;;  %v3474_v40 = vsel %vm3471_vm8, %v3473_v23, %v3469_v51  ;;  %v3517_v48 = vand.u32 2147483648, %v3280_v20  ;;  %vm3511_vm1 = vweird.f32 %v3280_v20 }
0x153a   :  { %v3475_v61 = vmul.f32 %v7126_v57, %v3474_v40  ;;  %4810 = vrcp.f32 %v7182_v63  ;;  %v3495_v57 = vadd.f32 %v7173_v2, %v3494_v42  ;;  %v3515_v7 = vand.u32 2147483647, %v3280_v20 }
0x153b   :  { %v7185_v32 = vpop.eup %4806  ;;  %v3518_v38 = vor.u32 1.1754944e-38, %v3517_v48 }
0x153c   :  { %v3287_v50 = vsel %vm215_vm4, %v7185_v32, 0.0  ;;  %4476 = vmatmul.msk.f32.gmra.mxu0 %vm215_vm4, %v3475_v61  ;;  %v3499_v4 = vsel %vm3498_vm14, %v7173_v2, %v3495_v57  ;;  %vm3516_vm8 = vcmp.eq.f32.partialorder %v3515_v7, 8.507059e+37 }
0x153d   :  { %3288 = vadd.xlane.f32.xlu1 %v3287_v50  ;;  %v3504_v8 = vsel %vm3501_vm15, %v3503_v31, %v3499_v4  ;;  %v7219_v51 = vpop.f32.mrf.mxu0 }
0x153e   :  { %v3505_v24 = vmul.f32 %v7110_v59, %v3504_v8  ;;  %v3530_v59 = vand.u32 2147483647, %v7182_v63 }
0x153f   :  { %v4809_v28 = vpop.eup %4808 }
0x1540   :  { %v3507_v27 = vmul.f32 %v4809_v28, %v3280_v20  ;;  %v3286_v33 = vpop.xlane.xlu0 %3285  ;;  %v4811_v29 = vpop.eup %4810  ;;  %vm3512_vm0 = vweird.f32 %v4809_v28  ;;  %vm3531_vm12 = vcmp.eq.f32.partialorder %v3530_v59, 8.507059e+37 }
0x1541   :  { %4812 = vrcp.f32 %v3286_v33  ;;  %v3522_v43 = vmul.f32 %v4811_v29, %v7182_v63  ;;  %vm3513_vm6 = vmor %vm3511_vm1, %vm3512_vm0  ;;  %vm3527_vm9 = vweird.f32 %v4811_v29  ;;  %v3547_v23 = vand.u32 2147483648, %v3286_v33 }
0x1542   :  { %v3508_v30 = vsub.f32 1.0, %v3507_v27  ;;  %vm3528_vm11 = vmor %vm3526_vm10, %vm3527_vm9  ;;  %vm3541_vm14 = vweird.f32 %v3286_v33  ;;  %v3545_v20 = vand.u32 2147483647, %v3286_v33 }
0x1543   :  { %v3523_v35 = vsub.f32 1.0, %v3522_v43  ;;  %v3548_v21 = vor.u32 1.1754944e-38, %v3547_v23 }
0x1544   :  { %v3509_v44 = vmul.f32 %v4809_v28, %v3508_v30  ;;  %4477 = vmatmul.msk.f32.gmra.mxu0 %vm215_vm4, %v3490_v54  ;;  %vm3546_vm0 = vcmp.eq.f32.partialorder %v3545_v20, 8.507059e+37  ;;  %v4960_v20 = vld [vmem:[%s7479_s5 + $0x78] sm:$0xff] }
0x1545   :  { %v3524_v15 = vmul.f32 %v4811_v29, %v3523_v35  ;;  %v7224_v0 = vpop.f32.mrf.mxu0 }
0x1546   :  { %v3510_v5 = vadd.f32 %v4809_v28, %v3509_v44 }
0x1547   :  { %v4813_v47 = vpop.eup %4812  ;;  %v3525_v36 = vadd.f32 %v4811_v29, %v3524_v15 }
0x1548   :  { %v3537_v16 = vmul.f32 %v4813_v47, %v3286_v33  ;;  %v3514_v39 = vsel %vm3513_vm6, %v4809_v28, %v3510_v5  ;;  %vm3542_vm13 = vweird.f32 %v4813_v47 }
0x1549   :  { %v3519_v2 = vsel %vm3516_vm8, %v3518_v38, %v3514_v39  ;;  %v3529_v58 = vsel %vm3528_vm11, %v4811_v29, %v3525_v36  ;;  %vm3543_vm15 = vmor %vm3541_vm14, %vm3542_vm13 }
0x154a   :  { %v3538_v49 = vsub.f32 1.0, %v3537_v16  ;;  %v3520_v34 = vmul.f32 %v7142_v12, %v3519_v2  ;;  %v3534_v52 = vsel %vm3531_vm12, %v3533_v3, %v3529_v58 }
0x154b   :  { %v3535_v12 = vmul.f32 %v7120_v19, %v3534_v52 }
0x154c   :  { %4478 = vmatmul.msk.f32.gmra.mxu0 %vm215_vm4, %v3505_v24  ;;  %v3539_v25 = vmul.f32 %v4813_v47, %v3538_v49 }
0x154e   :  { %v3540_v9 = vadd.f32 %v4813_v47, %v3539_v25 }
0x1550   :  { %v3544_v18 = vsel %vm3543_vm15, %v4813_v47, %v3540_v9 }
0x1551   :  { %v3549_v63 = vsel %vm3546_vm0, %v3548_v21, %v3544_v18  ;;  %v4962_v21 = vld [vmem:[%s7479_s5 + $0x68] sm:$0xff] }
0x1552   :  { %v3550_v11 = vmul.f32 %v7148_v6, %v3549_v63 }
0x1554   :  { %4479 = vmatmul.msk.f32.gmra.mxu0 %vm215_vm4, %v3520_v34 }
0x1556   :  { %4542 = vrot.lane.b32.xlu1 %v4541_v60, %s4989_s26  ;;  %v7226_v60 = vpop.f32.mrf.mxu0 }
0x155c   :  { %4480 = vmatmul.msk.f32.gmra.mxu0 %vm215_vm4, %v3535_v12 }
0x155e   :  { %v7228_v55 = vpop.f32.mrf.mxu0 }
0x1564   :  { %4481 = vmatmul.msk.f32.gmra.mxu0 %vm215_vm4, %v3550_v11 }
0x1566   :  { %v7230_v19 = vpop.f32.mrf.mxu0 }
0x156d   :  { %v3292_v50 = vpop.xlane.xlu2 %3291 }
0x156e   :  { %v7232_v40 = vpop.f32.mrf.mxu0  ;;  %4814 = vrcp.f32 %v3292_v50  ;;  %v3577_v48 = vand.u32 2147483648, %v3292_v50  ;;  %vm3571_vm11 = vweird.f32 %v3292_v50  ;;  %v3575_v24 = vand.u32 2147483647, %v3292_v50 }
0x1570   :  { %v3578_v2 = vor.u32 1.1754944e-38, %v3577_v48  ;;  %vm3576_vm13 = vcmp.eq.f32.partialorder %v3575_v24, 8.507059e+37 }
0x1574   :  { %v4815_v6 = vpop.eup %4814 }
0x1575   :  { %v3567_v27 = vmul.f32 %v4815_v6, %v3292_v50  ;;  %vm3572_vm8 = vweird.f32 %v4815_v6  ;;  %v4964_v50 = vld [vmem:[%s7479_s5 + $0x58] sm:$0xff] }
0x1576   :  { %v7234_v53 = vpop.f32.mrf.mxu0  ;;  %vm3573_vm12 = vmor %vm3571_vm11, %vm3572_vm8 }
0x1577   :  { %v3568_v57 = vsub.f32 1.0, %v3567_v27  ;;  %v4966_v27 = vld [vmem:[%s7479_s5 + $0x48] sm:$0xff] }
0x1579   :  { %v3569_v26 = vmul.f32 %v4815_v6, %v3568_v57  ;;  %v4967_v57 = vld [vmem:[%s7479_s5 + $0x40] sm:$0xff] }
0x157b   :  { %v3570_v35 = vadd.f32 %v4815_v6, %v3569_v26  ;;  %v4971_v26 = vld [vmem:[%s7479_s5 + $0x20] sm:$0xff] }
0x157d   :  { %v3574_v38 = vsel %vm3573_vm12, %v4815_v6, %v3570_v35 }
0x157e   :  { %v7236_v61 = vpop.f32.mrf.mxu0  ;;  %v3579_v36 = vsel %vm3576_vm13, %v3578_v2, %v3574_v38  ;;  %v4983_v2 = vld [vmem:[%s7481_s4 + $0x8] sm:$0xff] }
0x157f   :  { %v3580_v25 = vmul.f32 %v7159_v46, %v3579_v36  ;;  %v4961_v46 = vld [vmem:[%s7479_s5 + $0x70] sm:$0xff]  ;;  %v4984_v36 = vld [vmem:[%s7481_s4 + $0x18] sm:$0xff] }
0x1586   :  { %v7238_v42 = vpop.f32.mrf.mxu0 }
0x158e   :  { %v7240_v28 = vpop.f32.mrf.mxu0 }
0x15a7   :  { %v3295_v10 = vpop.xlane.xlu0 %3294 }
0x15a8   :  { %v3592_v62 = vand.u32 2147483648, %v3295_v10  ;;  %vm3586_vm15 = vweird.f32 %v3295_v10  ;;  %v3590_v59 = vand.u32 2147483647, %v3295_v10 }
0x15aa   :  { %v3593_v58 = vor.u32 1.1754944e-38, %v3592_v62  ;;  %v4548_v62 = vpop.permute.xlu2 %4547 }
0x15b0   :  { %v3289_v45 = vpop.xlane.xlu1 %3288 }
0x15b1   :  { %4816 = vrcp.f32 %v3289_v45  ;;  %v3562_v54 = vand.u32 2147483648, %v3289_v45  ;;  %v3560_v4 = vand.u32 2147483647, %v3289_v45  ;;  %vm3556_vm6 = vweird.f32 %v3289_v45 }
0x15b2   :  { %4818 = vrcp.f32 %v3295_v10 }
0x15b3   :  { %v3563_v8 = vor.u32 1.1754944e-38, %v3562_v54  ;;  %vm3561_vm10 = vcmp.eq.f32.partialorder %v3560_v4, 8.507059e+37  ;;  %v4972_v54 = vld [vmem:[%s7479_s5 + $0x18] sm:$0xff]  ;;  %v4975_v4 = vld [vmem:[%s7479_s5] sm:$0xff] }
0x15b7   :  { %v4817_v22 = vpop.eup %4816 }
0x15b8   :  { %v3552_v33 = vmul.f32 %v4817_v22, %v3289_v45  ;;  %v4819_v29 = vpop.eup %4818  ;;  %vm3557_vm1 = vweird.f32 %v4817_v22 }
0x15b9   :  { %v3716_v30 = vpop.f32.mrf.mxu0  ;;  %v3582_v43 = vmul.f32 %v4819_v29, %v3295_v10  ;;  %vm3558_vm9 = vmor %vm3556_vm6, %vm3557_vm1  ;;  %vm3587_vm14 = vweird.f32 %v4819_v29  ;;  %vm3591_vm1 = vcmp.eq.f32.partialorder %v3590_v59, 8.507059e+37  ;;  %v4965_v10 = vld [vmem:[%s7479_s5 + $0x50] sm:$0xff] }
0x15ba   :  { %v3553_v41 = vsub.f32 1.0, %v3552_v33  ;;  %vm3588_vm0 = vmor %vm3586_vm15, %vm3587_vm14  ;;  %v3754_v6 = vmul.f32 %v4964_v50, %v3716_v30  ;;  %v3753_v45 = vmul.f32 %v4965_v10, %v7240_v28  ;;  %v3751_v33 = vmul.f32 %v4967_v57, %v7236_v61  ;;  %v4970_v30 = vld [vmem:[%s7479_s5 + $0x28] sm:$0xff] }
0x15bb   :  { %v3583_v5 = vsub.f32 1.0, %v3582_v43  ;;  %v3748_v61 = vmul.f32 %v4970_v30, %v7230_v19  ;;  %v4973_v43 = vld [vmem:[%s7479_s5 + $0x10] sm:$0xff] }
0x15bc   :  { %v3554_v44 = vmul.f32 %v4817_v22, %v3553_v41  ;;  %v4969_v41 = vld [vmem:[%s7479_s5 + $0x30] sm:$0xff]  ;;  %v3745_v19 = vmul.f32 %v4973_v43, %v7224_v0  ;;  %v4976_v0 = vld [vmem:[%s7481_s4] sm:$0xff] }
0x15bd   :  { %v3584_v39 = vmul.f32 %v4819_v29, %v3583_v5 }
0x15be   :  { %v3555_v31 = vadd.f32 %v4817_v22, %v3554_v44  ;;  %v4974_v44 = vld [vmem:[%s7479_s5 + $0x8] sm:$0xff] }
0x15bf   :  { %v3585_v49 = vadd.f32 %v4819_v29, %v3584_v39  ;;  %v4982_v39 = vld [vmem:[%s7479_s5 + $0x80] sm:$0xff] }
0x15c0   :  { %v3559_v47 = vsel %vm3558_vm9, %v4817_v22, %v3555_v31  ;;  %v3752_v22 = vmul.f32 %v4966_v27, %v7238_v42  ;;  %v3749_v42 = vmul.f32 %v4969_v41, %v7232_v40  ;;  %v3746_v40 = vmul.f32 %v4972_v54, %v7226_v60  ;;  %v4977_v31 = vld [vmem:[%s7481_s4 + $0x10] sm:$0xff] }
0x15c1   :  { %v3564_v7 = vsel %vm3561_vm10, %v3563_v8, %v3559_v47  ;;  %v3719_v15 = vpop.f32.mrf.mxu0  ;;  %v3743_v60 = vmul.f32 %v4975_v4, %v7207_v56  ;;  %v4979_v47 = vld [vmem:[%s7479_s5 + $0x98] sm:$0xff] }
0x15c2   :  { %v3565_v16 = vmul.f32 %v7185_v32, %v3564_v7  ;;  %v3589_v32 = vsel %vm3588_vm0, %v4819_v29, %v3585_v49  ;;  %v4968_v29 = vld [vmem:[%s7479_s5 + $0x38] sm:$0xff]  ;;  %v4980_v7 = vld [vmem:[%s7479_s5 + $0x90] sm:$0xff] }
0x15c3   :  { %v3594_v3 = vsel %vm3591_vm1, %v3593_v58, %v3589_v32  ;;  %v3750_v28 = vmul.f32 %v4968_v29, %v7234_v53  ;;  %v3747_v53 = vmul.f32 %v4971_v26, %v7228_v55  ;;  %v3744_v55 = vmul.f32 %v4974_v44, %v7219_v51  ;;  %v4978_v51 = vld [vmem:[%s7481_s4 + $0x20] sm:$0xf] }
0x15c4   :  { %4482 = vmatmul.msk.f32.gmra.mxu0 %vm215_vm4, %v3565_v16  ;;  %v3595_v9 = vmul.f32 %v7176_v1, %v3594_v3  ;;  %v4963_v1 = vld [vmem:[%s7479_s5 + $0x60] sm:$0xff]  ;;  %v4549_v32 = vunpack.i.l.bf16 %v4548_v62  ;;  %v4550_v58 = vunpack.i.h.bf16 %v4548_v62 }
0x15c5   :  { %v3755_v11 = vmul.f32 %v4963_v1, %v3719_v15  ;;  %v4981_v15 = vld [vmem:[%s7479_s5 + $0x88] sm:$0xff]  ;;  %v4413_v62 = vld [vmem:[%s7482_s9 + $0xa0] sm:$0xff] }
0x15c8   :  { %v4543_v49 = vpop.permute.xlu1 %4542 }
0x15c9   :  { %v3722_v34 = vpop.f32.mrf.mxu0  ;;  %v4545_v59 = vunpack.i.h.bf16 %v4543_v49 }
0x15ca   :  { %v3756_v63 = vmul.f32 %v4962_v21, %v3722_v34  ;;  %v4544_v34 = vunpack.i.l.bf16 %v4543_v49 }
0x15cc   :  { %4483 = vmatmul.msk.f32.gmra.mxu0 %vm215_vm4, %v3580_v25  ;;  %v4985_v25 = vld [vmem:[%s7481_s4 + $0x28] sm:$0xf] }
0x15d1   :  { %v3725_v52 = vpop.f32.mrf.mxu0 }
0x15d2   :  { %v3757_v18 = vmul.f32 %v4961_v46, %v3725_v52 }
0x15d4   :  { %4484 = vmatmul.msk.f32.gmra.mxu0 %vm215_vm4, %v3595_v9 }
0x15d9   :  { %v3728_v23 = vpop.f32.mrf.mxu0 }
0x15da   :  { %v3758_v12 = vmul.f32 %v4960_v20, %v3728_v23 }
0x15dc   :  { %3763 = vmatpush.msra.mxu1 %v3758_v12 }
0x15de   :  { %3764 = vmatpush.msra.mxu1 %v3757_v18 }
0x15e0   :  { %3765 = vmatpush.msra.mxu1 %v3756_v63  ;;  %v7346_v63 = vld [vmem:[%s7477_s10 + $0x10] sm:$0xff] }
0x15e1   :  { %v3731_v8 = vpop.f32.mrf.mxu0  ;;  %v3815_v1 = vperm.slane %v7346_v63, 1 }
0x15e2   :  { %3766 = vmatpush.msra.mxu1 %v3755_v11  ;;  %v3759_v38 = vmul.f32 %v4982_v39, %v3731_v8 }
0x15e4   :  { %3767 = vmatpush.msra.mxu1 %v3754_v6 }
0x15e6   :  { %3768 = vmatpush.msra.mxu1 %v3753_v45 }
0x15e8   :  { %3769 = vmatpush.msra.mxu1 %v3752_v22 }
0x15ea   :  { %3770 = vmatpush.msra.mxu1 %v3751_v33 }
0x15ec   :  { %3771 = vmatpush.msra.mxu1 %v3750_v28 }
0x15ee   :  { %3772 = vmatpush.msra.mxu1 %v3749_v42 }
0x15f0   :  { %3773 = vmatpush.msra.mxu1 %v3748_v61 }
0x15f2   :  { %3774 = vmatpush.msra.mxu1 %v3747_v53 }
0x15f4   :  { %3775 = vmatpush.msra.mxu1 %v3746_v40 }
0x15f6   :  { %3776 = vmatpush.msra.mxu1 %v3745_v19 }
0x15f8   :  { %3777 = vmatpush.msra.mxu1 %v3744_v55 }
0x15fa   :  { %3778 = vmatpush.msra.mxu1 %v3743_v60  ;;  %v4408_v60 = vld [vmem:[%s7474_s8 + $0xb8] sm:$0xff] }
0x15fb   :  { %3779 = vmatmul.f32.vlgmr.msra.gmra.mxu1 %v4976_v0  ;;  %v4406_v0 = vld [vmem:[%s7474_s8 + $0xa8] sm:$0xff] }
0x1603   :  { %3782 = vmatmul.f32.gmra.mxu1 %v4977_v31  ;;  %v4404_v31 = vld [vmem:[%s7474_s8 + $0x98] sm:$0xff] }
0x160b   :  { %3785 = vmatmul.f32.gmra.mxu1 %v4978_v51  ;;  %v4402_v51 = vld [vmem:[%s7474_s8 + $0x88] sm:$0xff] }
0x1641   :  { %v3734_v35 = vpop.f32.mrf.mxu0 }
0x1642   :  { %v3760_v16 = vmul.f32 %v4981_v15, %v3734_v35  ;;  %v4416_v15 = vld [vmem:[%s7482_s9 + $0xb8] sm:$0xff] }
0x1649   :  { %v3737_v56 = vpop.f32.mrf.mxu0 }
0x164a   :  { %v3761_v24 = vmul.f32 %v4980_v7, %v3737_v56 }
0x1651   :  { %v3740_v5 = vpop.f32.mrf.mxu0 }
0x1652   :  { %v3762_v48 = vmul.f32 %v4979_v47, %v3740_v5 }
0x1654   :  { %3801 = vmatpush.msrb.mxu1 %v3762_v48 }
0x1656   :  { %3802 = vmatpush.msrb.mxu1 %v3761_v24 }
0x1658   :  { %3803 = vmatpush.msrb.mxu1 %v3760_v16  ;;  %v4415_v16 = vld [vmem:[%s7482_s9 + $0xb0] sm:$0xff] }
0x165a   :  { %3804 = vmatpush.msrb.mxu1 %v3759_v38  ;;  %v4414_v38 = vld [vmem:[%s7482_s9 + $0xa8] sm:$0xff] }
0x165b   :  { %4485 = vmatmul.msk.f32.vlgmr.msrb.gmra.mxu1 %vm179_vm2, %v4983_v2 }
0x165c   :  { %3853 = vmatpush.msra.mxu1 %v4544_v34 }
0x165e   :  { %3854 = vmatpush.msra.mxu1 %v4545_v59 }
0x1660   :  { %3855 = vmatpush.msra.mxu1 %v4549_v32  ;;  %v4412_v32 = vld [vmem:[%s7482_s9 + $0x98] sm:$0xff] }
0x1662   :  { %3856 = vmatpush.msra.mxu1 %v4550_v58 }
0x1663   :  { %4486 = vmatmul.msk.f32.gmra.mxu1 %vm179_vm2, %v4984_v36 }
0x1664   :  { %3966 = vmatpush.msrb.mxu1 %v4408_v60 }
0x1666   :  { %3967 = vmatpush.msrb.mxu1 %v4406_v0 }
0x1668   :  { %3968 = vmatpush.msrb.mxu1 %v4404_v31  ;;  %v3983_v31 = vperm.slane %v7346_v63, 5 }
0x166a   :  { %3969 = vmatpush.msrb.mxu1 %v4402_v51 }
0x166b   :  { %4487 = vmatmul.msk.f32.gmra.mxu1 %vm179_vm2, %v4985_v25 }
0x1678   :  { %v3780_v3 = vpop.f32.mrf.mxu1 }
0x1680   :  { %v3783_v52 = vpop.f32.mrf.mxu1 }
0x1688   :  { %v3786_v9 = vpop.f32.mrf.mxu1 }
0x16d8   :  { %v3806_v23 = vpop.f32.mrf.mxu1 }
0x16d9   :  { %v3807_v20 = vadd.f32 %v3806_v23, %v3780_v3 }
0x16db   :  { %4488 = vmatmul.msk.f32.vlgmr.msra.gmra.mxu1 %vm179_vm2, %v3807_v20  ;;  %v3940_v20 = vperm.slane %v7346_v63, 3 }
0x16dc   :  { %4001 = vmatpush.msra.mxu1 %v4416_v15 }
0x16de   :  { %4002 = vmatpush.msra.mxu1 %v4415_v16 }
0x16e0   :  { %v3809_v12 = vpop.f32.mrf.mxu1  ;;  %4003 = vmatpush.msra.mxu1 %v4414_v38 }
0x16e1   :  { %v3810_v46 = vadd.f32 %v3809_v12, %v3783_v52  ;;  %v3936_v52 = vperm.slane %v7346_v63, 2 }
0x16e2   :  { %4004 = vmatpush.msra.mxu1 %v4413_v62 }
0x16e3   :  { %4489 = vmatmul.msk.f32.gmra.mxu1 %vm179_vm2, %v3810_v46 }
0x16e4   :  { %4005 = vmatpush.msra.mxu1 %v4412_v32 }
0x16e8   :  { %v3812_v18 = vpop.f32.mrf.mxu1 }
0x16e9   :  { %v3813_v21 = vadd.f32 %v3812_v18, %v3786_v9 }
0x16eb   :  { %4490 = vmatmul.msk.f32.gmra.mxu1 %vm179_vm2, %v3813_v21 }
0x1758   :  { %v3858_v11 = vpop.f32.mrf.mxu1 }
0x1759   :  { %v3859_v50 = vadd.f32 %v3858_v11, %v3815_v1 }
0x175b   :  { %v3867_v6 = vadd.f32 %v3859_v50, %v6739_v37 }
0x175d   :  { %v3870_v10 = vsel %vm179_vm2, %v3867_v6, 0.0 }
0x175e   :  { %3871 = vadd.xlane.f32.xlu0 %v3870_v10 }
0x1760   :  { %v3861_v45 = vpop.f32.mrf.mxu1 }
0x1761   :  { %v3862_v27 = vadd.f32 %v3861_v45, %v3815_v1 }
0x1763   :  { %v3868_v22 = vadd.f32 %v3862_v27, %v6743_v14 }
0x1765   :  { %v3873_v57 = vsel %vm179_vm2, %v3868_v22, 0.0 }
0x1766   :  { %3874 = vadd.xlane.f32.xlu0 %v3873_v57 }
0x1768   :  { %v3864_v33 = vpop.f32.mrf.mxu1 }
0x1769   :  { %v3865_v29 = vadd.f32 %v3864_v33, %v3815_v1 }
0x176b   :  { %v3869_v28 = vadd.f32 %v3865_v29, %v6748_v13 }
0x176d   :  { %v3876_v41 = vsel %vm1297_vm7, %v3869_v28, 0.0 }
0x176e   :  { %3877 = vadd.xlane.f32.xlu0 %v3876_v41 }
0x17d1   :  { %v3872_v42 = vpop.xlane.xlu0 %3871 }
0x17d2   :  { %v3879_v37 = vmul.f32 %v3872_v42, %v5830_v17 }
0x17d4   :  { %v3882_v30 = vsub.f32 %v3867_v6, %v3879_v37 }
0x17d6   :  { %v3885_v61 = vmul.f32 %v3882_v30, %v3882_v30 }
0x17d8   :  { %v3888_v26 = vsel %vm179_vm2, %v3885_v61, 0.0  ;;  %v4411_v61 = vld [vmem:[%s7482_s9 + $0x90] sm:$0xff] }
0x17d9   :  { %3889 = vadd.xlane.f32.xlu1 %v3888_v26  ;;  %v3875_v53 = vpop.xlane.xlu0 %3874  ;;  %4006 = vmatpush.msra.mxu1 %v4411_v61  ;;  %v4410_v26 = vld [vmem:[%s7482_s9 + $0x88] sm:$0xff] }
0x17da   :  { %v3880_v14 = vmul.f32 %v3875_v53, %v5830_v17  ;;  %v4409_v53 = vld [vmem:[%s7482_s9 + $0x80] sm:$0xff] }
0x17db   :  { %4007 = vmatpush.msra.mxu1 %v4410_v26 }
0x17dc   :  { %v7358_v54 = vsub.f32 %v3868_v22, %v3880_v14  ;;  %v3944_v14 = vperm.slane %v7346_v63, 4 }
0x17dd   :  { %4008 = vmatpush.msra.mxu1 %v4409_v53 }
0x17de   :  { %v3886_v40 = vmul.f32 %v7358_v54, %v7358_v54 }
0x17e0   :  { %v3891_v13 = vsel %vm179_vm2, %v3886_v40, 0.0 }
0x17e1   :  { %3892 = vadd.xlane.f32.xlu2 %v3891_v13  ;;  %v3878_v43 = vpop.xlane.xlu0 %3877 }
0x17e2   :  { %v3881_v19 = vmul.f32 %v3878_v43, %v5830_v17 }
0x17e4   :  { %v7364_v44 = vsub.f32 %v3869_v28, %v3881_v19 }
0x17e6   :  { %v3887_v55 = vmul.f32 %v7364_v44, %v7364_v44 }
0x17e8   :  { %v3894_v4 = vsel %vm1297_vm7, %v3887_v55, 0.0 }
0x17e9   :  { %3895 = vadd.xlane.f32.xlu0 %v3894_v4 }
0x184c   :  { %v3890_v8 = vpop.xlane.xlu1 %3889 }
0x184d   :  { %v3897_v35 = vmul.f32 %v3890_v8, %v5830_v17 }
0x184f   :  { %v3900_v56 = vadd.f32 1e-05, %v3897_v35 }
0x1851   :  { %4820 = vrsqrt.f32 %v3900_v56  ;;  %vm3909_vm8 = vweird.f32 %v3900_v56 }
0x1854   :  { %v3893_v5 = vpop.xlane.xlu2 %3892 }
0x1855   :  { %v3898_v47 = vmul.f32 %v3893_v5, %v5830_v17 }
0x1857   :  { %v4821_v48 = vpop.eup %4820  ;;  %v3901_v7 = vadd.f32 1e-05, %v3898_v47 }
0x1858   :  { %v3904_v24 = vmul.f32 %v4821_v48, %v3900_v56  ;;  %vm3910_vm6 = vweird.f32 %v4821_v48 }
0x1859   :  { %4822 = vrsqrt.f32 %v3901_v7  ;;  %vm3911_vm9 = vmor %vm3909_vm8, %vm3910_vm6  ;;  %vm3919_vm11 = vweird.f32 %v3901_v7 }
0x185a   :  { %v3905_v39 = vmul.f32 %v4821_v48, %v3904_v24 }
0x185c   :  { %v3906_v2 = vmul.f32 0.5, %v3905_v39  ;;  %v3896_v36 = vpop.xlane.xlu0 %3895 }
0x185d   :  { %v3899_v49 = vmul.f32 %v3896_v36, %v5830_v17 }
0x185e   :  { %v3907_v59 = vsub.f32 1.5, %v3906_v2 }
0x185f   :  { %v4823_v34 = vpop.eup %4822  ;;  %v3902_v25 = vadd.f32 1e-05, %v3899_v49 }
0x1860   :  { %v3908_v58 = vmul.f32 %v4821_v48, %v3907_v59  ;;  %v3914_v3 = vmul.f32 %v4823_v34, %v3901_v7  ;;  %vm3920_vm10 = vweird.f32 %v4823_v34 }
0x1861   :  { %4824 = vrsqrt.f32 %v3902_v25  ;;  %vm3921_vm12 = vmor %vm3919_vm11, %vm3920_vm10  ;;  %vm3929_vm14 = vweird.f32 %v3902_v25 }
0x1862   :  { %v3912_v9 = vsel %vm3911_vm9, %v4821_v48, %v3908_v58  ;;  %v3915_v23 = vmul.f32 %v4823_v34, %v3914_v3 }
0x1863   :  { %v3933_v12 = vmul.f32 %v3912_v9, %v3882_v30 }
0x1864   :  { %v3916_v46 = vmul.f32 0.5, %v3915_v23 }
0x1865   :  { %v3937_v18 = vmul.f32 %v3936_v52, %v3933_v12 }
0x1866   :  { %v3917_v21 = vsub.f32 1.5, %v3916_v46 }
0x1867   :  { %v4825_v1 = vpop.eup %4824  ;;  %v3941_v11 = vadd.f32 %v3940_v20, %v3937_v18 }
0x1868   :  { %v3918_v50 = vmul.f32 %v4823_v34, %v3917_v21  ;;  %v3924_v6 = vmul.f32 %v4825_v1, %v3902_v25  ;;  %vm3930_vm13 = vweird.f32 %v4825_v1 }
0x1869   :  { %4491 = vmatmul.msk.f32.vlgmr.msrb.gmra.mxu1 %vm179_vm2, %v3941_v11  ;;  %vm3931_vm15 = vmor %vm3929_vm14, %vm3930_vm13 }
0x186a   :  { %v3922_v10 = vsel %vm3921_vm12, %v4823_v34, %v3918_v50  ;;  %v3925_v45 = vmul.f32 %v4825_v1, %v3924_v6 }
0x186b   :  { %v3934_v27 = vmul.f32 %v3922_v10, %v7358_v54 }
0x186c   :  { %v3926_v22 = vmul.f32 0.5, %v3925_v45 }
0x186d   :  { %v3938_v57 = vmul.f32 %v3936_v52, %v3934_v27 }
0x186e   :  { %v3927_v33 = vsub.f32 1.5, %v3926_v22 }
0x186f   :  { %v3942_v29 = vadd.f32 %v3940_v20, %v3938_v57 }
0x1870   :  { %v3928_v28 = vmul.f32 %v4825_v1, %v3927_v33 }
0x1871   :  { %4492 = vmatmul.msk.f32.gmra.mxu1 %vm179_vm2, %v3942_v29 }
0x1872   :  { %v3932_v41 = vsel %vm3931_vm15, %v4825_v1, %v3928_v28 }
0x1873   :  { %v3935_v42 = vmul.f32 %v3932_v41, %v7364_v44 }
0x1875   :  { %v3939_v37 = vmul.f32 %v3936_v52, %v3935_v42 }
0x1877   :  { %v3943_v30 = vadd.f32 %v3940_v20, %v3939_v37 }
0x1879   :  { %4493 = vmatmul.msk.f32.gmra.mxu1 %vm179_vm2, %v3943_v30 }
0x18e6   :  { %v3971_v54 = vpop.f32.mrf.mxu1 }
0x18e7   :  { %v3972_v40 = vadd.f32 %v3971_v54, %v3944_v14 }
0x18e9   :  { %v3980_v13 = vmax.f32 %v3972_v40, 0.0 }
0x18eb   :  { %4494 = vmatmul.msk.f32.vlgmr.msra.gmra.mxu1 %vm1413_vm5, %v3980_v13 }
0x18ee   :  { %v3974_v43 = vpop.f32.mrf.mxu1 }
0x18ef   :  { %v3975_v19 = vadd.f32 %v3974_v43, %v3944_v14 }
0x18f1   :  { %v3981_v44 = vmax.f32 %v3975_v19, 0.0 }
0x18f3   :  { %4495 = vmatmul.msk.f32.gmra.mxu1 %vm1413_vm5, %v3981_v44  ;;  %v4092_v44 = vperm.slane %v7346_v63, 7 }
0x18f6   :  { %v3977_v55 = vpop.f32.mrf.mxu1 }
0x18f7   :  { %v3978_v4 = vadd.f32 %v3977_v55, %v3944_v14 }
0x18f9   :  { %v3982_v60 = vmax.f32 %v3978_v4, 0.0 }
0x18fb   :  { %4496 = vmatmul.msk.f32.gmra.mxu1 %vm1413_vm5, %v3982_v60 }
0x1968   :  { %v4010_v0 = vpop.f32.mrf.mxu1 }
0x1969   :  { %v4011_v7 = vadd.f32 %v4010_v0, %v3983_v31 }
0x196b   :  { %v4019_v15 = vadd.f32 %v4011_v7, %v3941_v11  ;;  %v4123_v7 = vld [vmem:[%s7484_s11] sm:$0xff] }
0x196d   :  { %v4022_v16 = vsel %vm179_vm2, %v4019_v15, 0.0 }
0x1970   :  { %v4013_v51 = vpop.f32.mrf.mxu1 }
0x1971   :  { %v4014_v8 = vadd.f32 %v4013_v51, %v3983_v31 }
0x1973   :  { %v4020_v35 = vadd.f32 %v4014_v8, %v3942_v29 }
0x1975   :  { %v4025_v56 = vsel %vm179_vm2, %v4020_v35, 0.0 }
0x1976   :  { %4026 = vadd.xlane.f32.xlu0 %v4025_v56 }
0x1978   :  { %v4016_v5 = vpop.f32.mrf.mxu1 }
0x1979   :  { %v4017_v47 = vadd.f32 %v4016_v5, %v3983_v31  ;;  %v4096_v5 = vld [vmem:[%s7483_s7] sm:$0xf] }
0x197b   :  { %v4021_v48 = vadd.f32 %v4017_v47, %v3943_v30  ;;  %v4125_v47 = vld [vmem:[%s7484_s11 + $0x10] sm:$0xff] }
0x197d   :  { %v4028_v24 = vsel %vm1297_vm7, %v4021_v48, 0.0 }
0x197e   :  { %4029 = vadd.xlane.f32.xlu0 %v4028_v24  ;;  %v4129_v24 = vld [vmem:[%s7484_s11 + $0x40] sm:$0xff] }
0x197f   :  { %4210 = vmatpush.msrb.mxu2 %v4129_v24 }
0x1986   :  { %4023 = vadd.xlane.f32.xlu0 %v4022_v16 }
0x19e9   :  { %v4027_v39 = vpop.xlane.xlu0 %4026 }
0x19ea   :  { %v4032_v38 = vmul.f32 %v4027_v39, %v5830_v17  ;;  %v4127_v39 = vld [vmem:[%s7484_s11 + $0x20] sm:$0xff] }
0x19ec   :  { %v4035_v2 = vsub.f32 %v4020_v35, %v4032_v38  ;;  %v4551_v38 = vld [vmem:[%s7485_s12] ss:$0 sm:$0xff] }
0x19ee   :  { %v4038_v36 = vmul.f32 %v4035_v2, %v4035_v2 }
0x19f0   :  { %v4043_v49 = vsel %vm179_vm2, %v4038_v36, 0.0 }
0x19f1   :  { %4044 = vadd.xlane.f32.xlu1 %v4043_v49  ;;  %v4030_v62 = vpop.xlane.xlu0 %4029 }
0x19f2   :  { %v4033_v59 = vmul.f32 %v4030_v62, %v5830_v17  ;;  %v4552_v62 = vld [vmem:[%s7485_s12 + $0x1] ss:$0 sm:$0xff] }
0x19f4   :  { %v4036_v34 = vsub.f32 %v4021_v48, %v4033_v59  ;;  %v4124_v48 = vld [vmem:[%s7484_s11 + $0x8] sm:$0xff] }
0x19f6   :  { %v4039_v25 = vmul.f32 %v4036_v34, %v4036_v34 }
0x19f8   :  { %v4046_v32 = vsel %vm1297_vm7, %v4039_v25, 0.0 }
0x19f9   :  { %4047 = vadd.xlane.f32.xlu0 %v4046_v32  ;;  %v4024_v58 = vpop.xlane.xlu0 %4023  ;;  %v4553_v32 = vld [vmem:[%s7485_s12 + $0x2] ss:$0 sm:$0xff] }
0x19fa   :  { %v4031_v3 = vmul.f32 %v4024_v58, %v5830_v17 }
0x19fc   :  { %v4034_v52 = vsub.f32 %v4019_v15, %v4031_v3  ;;  %v4128_v15 = vld [vmem:[%s7484_s11 + $0x28] sm:$0xff] }
0x19fe   :  { %v4037_v9 = vmul.f32 %v4034_v52, %v4034_v52 }
0x1a00   :  { %v4040_v23 = vsel %vm179_vm2, %v4037_v9, 0.0 }
0x1a01   :  { %4041 = vadd.xlane.f32.xlu0 %v4040_v23 }
0x1a64   :  { %v4045_v20 = vpop.xlane.xlu1 %4044 }
0x1a65   :  { %v4050_v12 = vmul.f32 %v4045_v20, %v5830_v17 }
0x1a67   :  { %v4053_v46 = vadd.f32 1e-05, %v4050_v12 }
0x1a69   :  { %4826 = vrsqrt.f32 %v4053_v46  ;;  %vm4071_vm5 = vweird.f32 %v4053_v46 }
0x1a6c   :  { %v4048_v18 = vpop.xlane.xlu0 %4047 }
0x1a6d   :  { %v4051_v21 = vmul.f32 %v4048_v18, %v5830_v17 }
0x1a6f   :  { %v4827_v1 = vpop.eup %4826  ;;  %v4054_v11 = vadd.f32 1e-05, %v4051_v21 }
0x1a70   :  { %v4066_v50 = vmul.f32 %v4827_v1, %v4053_v46  ;;  %vm4072_vm7 = vweird.f32 %v4827_v1 }
0x1a71   :  { %4828 = vrsqrt.f32 %v4054_v11  ;;  %vm4073_vm0 = vmor %vm4071_vm5, %vm4072_vm7  ;;  %vm4081_vm6 = vweird.f32 %v4054_v11 }
0x1a72   :  { %v4067_v6 = vmul.f32 %v4827_v1, %v4066_v50 }
0x1a74   :  { %v4068_v10 = vmul.f32 0.5, %v4067_v6  ;;  %v4042_v45 = vpop.xlane.xlu0 %4041 }
0x1a75   :  { %v4049_v27 = vmul.f32 %v4042_v45, %v5830_v17  ;;  %v4088_v17 = vperm.slane %v7346_v63, 6  ;;  %v4126_v63 = vld [vmem:[%s7484_s11 + $0x18] sm:$0xff] }
0x1a76   :  { %v4069_v22 = vsub.f32 1.5, %v4068_v10 }
0x1a77   :  { %v4829_v57 = vpop.eup %4828  ;;  %v4052_v33 = vadd.f32 1e-05, %v4049_v27 }
0x1a78   :  { %v4076_v29 = vmul.f32 %v4829_v57, %v4054_v11  ;;  %v4070_v28 = vmul.f32 %v4827_v1, %v4069_v22  ;;  %vm4082_vm1 = vweird.f32 %v4829_v57 }
0x1a79   :  { %4830 = vrsqrt.f32 %v4052_v33  ;;  %vm4083_vm8 = vmor %vm4081_vm6, %vm4082_vm1  ;;  %vm4061_vm10 = vweird.f32 %v4052_v33 }
0x1a7a   :  { %v4077_v41 = vmul.f32 %v4829_v57, %v4076_v29  ;;  %v4074_v37 = vsel %vm4073_vm0, %v4827_v1, %v4070_v28 }
0x1a7b   :  { %v4086_v14 = vmul.f32 %v4074_v37, %v4035_v2 }
0x1a7c   :  { %v4078_v42 = vmul.f32 0.5, %v4077_v41 }
0x1a7d   :  { %v4090_v55 = vmul.f32 %v4088_v17, %v4086_v14 }
0x1a7e   :  { %v4079_v30 = vsub.f32 1.5, %v4078_v42 }
0x1a7f   :  { %v4831_v61 = vpop.eup %4830  ;;  %v4094_v31 = vadd.f32 %v4092_v44, %v4090_v55 }
0x1a80   :  { %v4080_v26 = vmul.f32 %v4829_v57, %v4079_v30  ;;  %v4056_v53 = vmul.f32 %v4831_v61, %v4052_v33  ;;  %vm4062_vm9 = vweird.f32 %v4831_v61 }
0x1a81   :  { %vm4063_vm11 = vmor %vm4061_vm10, %vm4062_vm9 }
0x1a82   :  { %v4084_v54 = vsel %vm4083_vm8, %v4829_v57, %v4080_v26  ;;  %v4057_v40 = vmul.f32 %v4831_v61, %v4056_v53 }
0x1a83   :  { %v4087_v13 = vmul.f32 %v4084_v54, %v4036_v34 }
0x1a84   :  { %v4058_v43 = vmul.f32 0.5, %v4057_v40 }
0x1a85   :  { %v4091_v19 = vmul.f32 %v4088_v17, %v4087_v13 }
0x1a86   :  { %v4059_v4 = vsub.f32 1.5, %v4058_v43 }
0x1a87   :  { %v4095_v60 = vadd.f32 %v4092_v44, %v4091_v19 }
0x1a88   :  { %v4060_v0 = vmul.f32 %v4831_v61, %v4059_v4 }
0x1a89   :  { %4497 = vmatpush.msk.msrb.mxu1 %vm276_vm3, %v4095_v60  ;;  %vm4163_vm3 = vcmask 130048  }
0x1a8a   :  { %v4064_v51 = vsel %vm4063_vm11, %v4831_v61, %v4060_v0 }
0x1a8b   :  { %4117 = vmatpush.msrb.mxu1 %v4094_v31  ;;  %v4085_v8 = vmul.f32 %v4064_v51, %v4034_v52 }
0x1a8d   :  { %v4089_v35 = vmul.f32 %v4088_v17, %v4085_v8 }
0x1a8f   :  { %v4093_v56 = vadd.f32 %v4092_v44, %v4089_v35 }
0x1a91   :  { %4118 = vmatpush.msrb.mxu1 %v4093_v56 }
0x1a92   :  { %4498 = vmatmul.msk.f32.vlgmr.msrb.gmra.mxu1 %vm215_vm4, %v4096_v5  ;;  %vm4215_vm4 = vcmask 3072  }
0x1a93   :  { %4151 = vmatpush.msra.mxu1 %v4126_v63 }
0x1a95   :  { %4152 = vmatpush.msra.mxu1 %v4125_v47 }
0x1a97   :  { %4153 = vmatpush.msra.mxu1 %v4124_v48 }
0x1a99   :  { %4154 = vmatpush.msra.mxu1 %v4123_v7 }
0x1a9b   :  { %4181 = vmatpush.msrb.mxu1 %v4128_v15 }
0x1a9d   :  { %4182 = vmatpush.msrb.mxu1 %v4127_v39 }
0x1b0f   :  { %v4120_v16 = vpop.f32.mrf.mxu1 }
0x1b10   :  { %4499 = vmatmul.msk.f32.vlgmr.msra.gmra.mxu1 %vm179_vm2, %v4120_v16  ;;  %vm4191_vm2 = vcmask 64512  }
0x1b8d   :  { %v4156_v2 = vpop.f32.mrf.mxu1 }
0x1b8e   :  { %v4157_v36 = vadd.f32 %v4551_v38, %v4156_v2 }
0x1b90   :  { %v4159_v49 = vmax.f32 %v4157_v36, 0.0 }
0x1b92   :  { %4500 = vmatmul.msk.f32.vlgmr.msrb.gmra.mxu1 %vm4163_vm3, %v4159_v49 }
0x1c0f   :  { %v4184_v59 = vpop.f32.mrf.mxu1 }
0x1c10   :  { %v4185_v34 = vadd.f32 %v4552_v62, %v4184_v59 }
0x1c12   :  { %v4187_v25 = vmax.f32 %v4185_v34, 0.0 }
0x1c14   :  { %4501 = vmatmul.msk.f32.vlgmr.msrb.gmra.mxu2 %vm4191_vm2, %v4187_v25 }
0x1c97   :  { %v4212_v58 = vpop.f32.mrf.mxu2 }
0x1c98   :  { %v4213_v3 = vadd.f32 %v4553_v32, %v4212_v58 }
0x1c9a   :  { %4216 = vst.msk [vmem:[%s7486_s13] sm:$0xf] %vm4215_vm4, %v4213_v3 }

</bundles_post_ra>
